<compile_context>
chip_gen: v6e
topology: v6e:2x2x1
jax: 0.10.0
libtpu: 0.0.40
codegen_flags: <defaults>
</compile_context>

<pallas_src>
import functools
import numpy as np
import jax
import jax.numpy as jnp
from jax import lax
from jax.experimental import pallas as pl
from jax.experimental.pallas import tpu as pltpu


# ----------------------------- fused Pallas kernel ---------------------------

def _convattn_kernel(temp_ref, target_ref, cw_ref, cb_ref, wqkv_ref, bias_ref,
                     pw_ref, pb_ref, o_ref, tpad_ref, apad_ref, feat_ref,
                     *, temp_len, target_len, num_heads):
    """Whole Convattn forward for one batch element.

    temp_ref   : (tl, tl, C)     temp tokens as an image (NHWC, C on lanes)
    target_ref : (al, al, C)     target tokens as an image
    cw_ref     : (3, 3, 1, 3C)   stacked q|k|v depthwise conv weights (BN folded)
    cb_ref     : (1, 1, 3C)      stacked conv/BN bias
    wqkv_ref   : (3C, 3C)        block-diag [q_w*scale ; k_w ; v_w]
    bias_ref   : (heads, N, N)   relative position bias
    pw_ref     : (C, C)          proj weight (in, out)
    pb_ref     : (1, C)          proj bias
    o_ref      : (N, C)          output tokens
    scratch    : tpad (tl+2,tl+2,C), apad (al+2,al+2,C), feat (N, 3C)
    """
    tl, al = temp_len, target_len
    Lt = tl * tl
    C = pw_ref.shape[0]
    C3 = 3 * C
    D = C // num_heads

    # ---- depthwise 3x3 conv + folded BN (q/k/v channels stacked to 3C) --------
    # Build the 1-pixel zero halo in VMEM scratch (no wrapper pad / HBM round trip).
    tpad_ref[...] = jnp.zeros_like(tpad_ref)
    apad_ref[...] = jnp.zeros_like(apad_ref)
    tpad_ref[1:tl + 1, 1:tl + 1, :] = temp_ref[...]
    apad_ref[1:al + 1, 1:al + 1, :] = target_ref[...]

    w = cw_ref[...]          # (3, 3, 1, 3C)
    cb = cb_ref[...]         # (1, 1, 3C)

    def dwconv(xpad, H):
        # triple the input channels once so the 9 taps run at 3C lane occupancy
        x3 = jnp.concatenate([xpad, xpad, xpad], axis=-1)         # (H+2, H+2, 3C)
        acc = jnp.zeros((H, H, C3), jnp.float32)
        for dh in range(3):
            for dw in range(3):
                acc = acc + x3[dh:dh + H, dw:dw + H, :] * w[dh, dw]
        return acc + cb

    tfeat = dwconv(tpad_ref[...], tl)      # (tl, tl, 3C)
    afeat = dwconv(apad_ref[...], al)      # (al, al, 3C)

    # Flatten spatial dims into the token axis via row stores (no in-kernel reshape).
    for i in range(tl):
        feat_ref[i * tl:(i + 1) * tl, :] = tfeat[i]
    for j in range(al):
        feat_ref[Lt + j * al:Lt + (j + 1) * al, :] = afeat[j]

    # ---- fused q/k/v projection: one (N,3C)@(3C,3C) matmul, no bias ------------
    qkv = jnp.dot(feat_ref[...], wqkv_ref[...], preferred_element_type=jnp.float32)
    q = qkv[:, 0:C]              # qk scale already folded into the q block of wqkv
    k = qkv[:, C:2 * C]
    v = qkv[:, 2 * C:3 * C]

    # ---- attention over all heads + fused output projection --------------------
    bias = bias_ref[...]         # (heads, N, N)
    head_outs = []
    for h in range(num_heads):
        qh = q[:, h * D:(h + 1) * D]
        kh = k[:, h * D:(h + 1) * D]
        vh = v[:, h * D:(h + 1) * D]
        # q @ k^T without materializing a transpose of k
        s = lax.dot_general(qh, kh, (((1,), (1,)), ((), ())),
                            preferred_element_type=jnp.float32)
        s = s + bias[h]
        s = s - jnp.max(s, axis=-1, keepdims=True)
        p = jnp.exp(s)
        p = p * pl.reciprocal(jnp.sum(p, axis=-1, keepdims=True), approx=True)
        head_outs.append(jnp.dot(p, vh, preferred_element_type=jnp.float32))
    attn = jnp.concatenate(head_outs, axis=-1)                    # (N, C), lane-dense
    o_ref[...] = (jnp.dot(attn, pw_ref[...], preferred_element_type=jnp.float32)
                  + pb_ref[...])


# ----------------------------- plain-JAX glue --------------------------------

def get_bias_index(w_len, h_len):
    coords_h = np.arange(h_len)
    coords_w = np.arange(w_len)
    coords = np.stack(np.meshgrid(coords_h, coords_w, indexing="ij"))
    coords_flatten = coords.reshape(2, -1)
    rel = coords_flatten[:, :, None] - coords_flatten[:, None, :]
    rel = rel.transpose(1, 2, 0).copy()
    rel[:, :, 0] += w_len - 1
    rel[:, :, 1] += h_len - 1
    rel[:, :, 0] *= 2 * w_len - 1
    return rel.sum(-1)


def build_relative_bias(params, cfg):
    tl, al, heads = cfg["temp_len"], cfg["target_len"], cfg["num_heads"]
    Lt, La = tl * tl, al * al
    temp_idx = jnp.asarray(get_bias_index(tl, tl).reshape(-1))
    target_idx = jnp.asarray(get_bias_index(al, al).reshape(-1))
    temp_rpb = params["rpb_table_temp"][temp_idx].reshape(Lt, Lt, heads).transpose(2, 0, 1)
    target_rpb = params["rpb_table"][target_idx].reshape(La, La, heads).transpose(2, 0, 1)
    # (heads, Lt, 1) + (heads, 1, La) -> (heads, Lt, La)
    target_temp_bias = params["temp_target_bias_table"] + params["target_temp_bias_line"]
    # (heads, La, 1) + (heads, 1, Lt) -> (heads, La, Lt)
    temp_target_bias = params["target_temp_bias_table"] + params["temp_target_bias_line"]
    top = jnp.concatenate([temp_rpb, target_temp_bias], axis=2)    # (heads, Lt, N)
    bot = jnp.concatenate([temp_target_bias, target_rpb], axis=2)  # (heads, La, N)
    return jnp.concatenate([top, bot], axis=1)                     # (heads, N, N)


def convattn_forward(x, params, cfg):
    B, N, C = x.shape
    tl, al, heads = cfg["temp_len"], cfg["target_len"], cfg["num_heads"]
    Lt = tl * tl
    D = C // heads
    # explicit qk_scale of 0.0 must not be silently ignored
    scale = cfg["qk_scale"] if cfg["qk_scale"] is not None else D ** (-0.5)
    C3 = 3 * C

    temp = x[:, :Lt, :].reshape(B, tl, tl, C)
    target = x[:, Lt:, :].reshape(B, al, al, C)

    # stack q/k/v depthwise-conv weights/biases along channels -> (3,3,1,3C), (1,1,3C)
    conv_w = jnp.concatenate([params["conv_q_w"], params["conv_k_w"],
                              params["conv_v_w"]], axis=-1).reshape(3, 3, 1, C3)
    conv_b = jnp.concatenate([params["conv_q_b"], params["conv_k_b"],
                              params["conv_v_b"]], axis=-1).reshape(1, 1, C3)

    # block-diagonal fused QKV weight; qk scale folded into the q block
    zero = jnp.zeros((C, C), jnp.float32)
    wqkv = jnp.concatenate([
        jnp.concatenate([params["q_w"] * scale, zero, zero], axis=1),
        jnp.concatenate([zero, params["k_w"], zero], axis=1),
        jnp.concatenate([zero, zero, params["v_w"]], axis=1),
    ], axis=0)                                                     # (3C, 3C)

    bias = build_relative_bias(params, cfg)                        # (heads, N, N)
    proj_b = params["proj_b"].reshape(1, C)

    kern = functools.partial(_convattn_kernel, temp_len=tl, target_len=al,
                             num_heads=heads)
    return pl.pallas_call(
        kern,
        out_shape=jax.ShapeDtypeStruct((B, N, C), jnp.float32),
        grid=(B,),
        in_specs=[
            pl.BlockSpec((None, tl, tl, C), lambda b: (b, 0, 0, 0)),
            pl.BlockSpec((None, al, al, C), lambda b: (b, 0, 0, 0)),
            pl.BlockSpec((3, 3, 1, C3), lambda b: (0, 0, 0, 0)),
            pl.BlockSpec((1, 1, C3), lambda b: (0, 0, 0)),
            pl.BlockSpec((C3, C3), lambda b: (0, 0)),
            pl.BlockSpec((heads, N, N), lambda b: (0, 0, 0)),
            pl.BlockSpec((C, C), lambda b: (0, 0)),
            pl.BlockSpec((1, C), lambda b: (0, 0)),
        ],
        out_specs=pl.BlockSpec((None, N, C), lambda b: (b, 0, 0)),
        scratch_shapes=[
            pltpu.VMEM((tl + 2, tl + 2, C), jnp.float32),   # padded temp image
            pltpu.VMEM((al + 2, al + 2, C), jnp.float32),   # padded target image
            pltpu.VMEM((N, C3), jnp.float32),               # concatenated conv feature
        ],
        compiler_params=pltpu.CompilerParams(dimension_semantics=("parallel",)),
    )(temp, target, conv_w, conv_b, wqkv, bias, params["proj_w"], proj_b)


# ----------------------------- parameter init --------------------------------

def init_params(key, dim, heads, temp_len, target_len):
    keys = jax.random.split(key, 16)
    Lt, La = temp_len ** 2, target_len ** 2

    def nrm(k, shape, std):
        return (std * jax.random.normal(k, shape)).astype(jnp.float32)

    bn_eps = 1e-5
    bn_scale = np.float32(1.0 / np.sqrt(1.0 + bn_eps))   # gamma=1, mean=0, var=1
    p = {}
    for i, name in enumerate(["q", "k", "v"]):
        p[f"conv_{name}_w"] = nrm(keys[i], (3, 3, dim), 0.1) * bn_scale  # BN folded
        p[f"conv_{name}_b"] = jnp.zeros((dim,), jnp.float32)             # BN beta = 0
    # qkv_bias=False -> zero biases for q/k/v linears (omitted from the fused matmul)
    p["q_w"] = nrm(keys[3], (dim, dim), 0.05)
    p["k_w"] = nrm(keys[4], (dim, dim), 0.05)
    p["v_w"] = nrm(keys[5], (dim, dim), 0.05)
    p["proj_w"] = nrm(keys[6], (dim, dim), 0.05)
    p["proj_b"] = nrm(keys[7], (dim,), 0.05)
    p["rpb_table"] = nrm(keys[8], ((2 * target_len - 1) ** 2, heads), 0.0002)
    p["rpb_table_temp"] = nrm(keys[9], ((2 * temp_len - 1) ** 2, heads), 0.0002)
    p["temp_target_bias_table"] = nrm(keys[10], (heads, Lt, 1), 0.0002)
    p["target_temp_bias_table"] = nrm(keys[11], (heads, La, 1), 0.0002)
    p["temp_target_bias_line"] = nrm(keys[12], (heads, 1, Lt), 0.0002)
    p["target_temp_bias_line"] = nrm(keys[13], (heads, 1, La), 0.0002)
    return p


# ----------------------------- pure-JAX reference ----------------------------

def reference_forward(x, params, cfg):
    B, N, C = x.shape
    tl, al, heads = cfg["temp_len"], cfg["target_len"], cfg["num_heads"]
    Lt = tl * tl
    D = C // heads
    scale = cfg["qk_scale"] if cfg["qk_scale"] is not None else D ** (-0.5)

    def dwconv_ref(inp, H, name):
        w = params[f"conv_{name}_w"]
        b = params[f"conv_{name}_b"]
        xh = inp.reshape(B, H, H, C)
        y = jax.lax.conv_general_dilated(
            xh, w.reshape(3, 3, 1, C), window_strides=(1, 1), padding="SAME",
            dimension_numbers=("NHWC", "HWIO", "NHWC"), feature_group_count=C)
        return (y + b).reshape(B, H * H, C)

    temp, target = x[:, :Lt, :], x[:, Lt:, :]
    qf = jnp.concatenate([dwconv_ref(temp, tl, "q"), dwconv_ref(target, al, "q")], axis=1)
    kf = jnp.concatenate([dwconv_ref(temp, tl, "k"), dwconv_ref(target, al, "k")], axis=1)
    vf = jnp.concatenate([dwconv_ref(temp, tl, "v"), dwconv_ref(target, al, "v")], axis=1)

    def proj(name, f):
        y = f @ params[f"{name}_w"]
        return y.reshape(B, N, heads, D).transpose(0, 2, 1, 3)

    q, k, v = proj("q", qf), proj("k", kf), proj("v", vf)
    bias = build_relative_bias(params, cfg)
    attn = jnp.einsum("bhnd,bhmd->bhnm", q, k) * scale + bias[None]
    attn = jax.nn.softmax(attn, axis=-1)
    out = jnp.einsum("bhnm,bhmd->bhnd", attn, v).transpose(0, 2, 1, 3).reshape(B, N, C)
    return out @ params["proj_w"] + params["proj_b"]


# --------------------------------- main ---------------------------------------

if __name__ == "__main__":
    jax.config.update("jax_default_matmul_precision", "highest")

    B, dim, heads = 2, 32, 2
    temp_len, target_len = 4, 6
    N = temp_len ** 2 + target_len ** 2          # 52 tokens
    cfg = dict(num_heads=heads, temp_len=temp_len, target_len=target_len, qk_scale=None)

    key = jax.random.PRNGKey(0)
    kx, kp = jax.random.split(key)
    x = jax.random.normal(kx, (B, N, dim), jnp.float32)
    params = init_params(kp, dim, heads, temp_len, target_len)

    fwd = jax.jit(functools.partial(convattn_forward, cfg=cfg))
    out = jax.block_until_ready(fwd(x, params))

    ref = reference_forward(x, params, cfg)
    # atol loosened slightly vs f32-exact to accommodate the EUP approximate
    # reciprocal used for the softmax normalization.
    np.testing.assert_allclose(np.asarray(out), np.asarray(ref), rtol=5e-2, atol=2e-3)
    print("KERNEL_OK")
</pallas_src>

<mosaic_0001>
module attributes {stable_mosaic.version = 11 : i64} {
  func.func @_convattn_kernel(%arg0: i32, %arg1: memref<1x4x4x32xf32, #tpu.memory_space<vmem>>, %arg2: memref<1x6x6x32xf32, #tpu.memory_space<vmem>>, %arg3: memref<3x3x1x96xf32, #tpu.memory_space<vmem>>, %arg4: memref<1x1x96xf32, #tpu.memory_space<vmem>>, %arg5: memref<96x96xf32, #tpu.memory_space<vmem>>, %arg6: memref<2x52x52xf32, #tpu.memory_space<vmem>>, %arg7: memref<32x32xf32, #tpu.memory_space<vmem>>, %arg8: memref<1x32xf32, #tpu.memory_space<vmem>>, %arg9: memref<1x52x32xf32, #tpu.memory_space<vmem>>, %arg10: memref<6x6x32xf32, #tpu.memory_space<vmem>>, %arg11: memref<8x8x32xf32, #tpu.memory_space<vmem>>, %arg12: memref<52x96xf32, #tpu.memory_space<vmem>>) attributes {dimension_semantics = [#tpu.dimension_semantics<parallel>], iteration_bounds = array<i64: 2>, scalar_prefetch = 0 : i64, scratch_operands = 3 : i64, tpu.core_type = #tpu.core_type<tc>, window_params = [{transform_indices = @transform_0, window_bounds = array<i64: 1, 4, 4, 32>}, {transform_indices = @transform_1, window_bounds = array<i64: 1, 6, 6, 32>}, {pipeline_mode = #tpu.pipeline_mode<synchronous>, transform_indices = @transform_2, window_bounds = array<i64: 3, 3, 1, 96>}, {pipeline_mode = #tpu.pipeline_mode<synchronous>, transform_indices = @transform_3, window_bounds = array<i64: 1, 1, 96>}, {pipeline_mode = #tpu.pipeline_mode<synchronous>, transform_indices = @transform_4, window_bounds = array<i64: 96, 96>}, {pipeline_mode = #tpu.pipeline_mode<synchronous>, transform_indices = @transform_5, window_bounds = array<i64: 2, 52, 52>}, {pipeline_mode = #tpu.pipeline_mode<synchronous>, transform_indices = @transform_6, window_bounds = array<i64: 32, 32>}, {pipeline_mode = #tpu.pipeline_mode<synchronous>, transform_indices = @transform_7, window_bounds = array<i64: 1, 32>}, {transform_indices = @transform_8, window_bounds = array<i64: 1, 52, 32>}]} {
    %cst = arith.constant 0.000000e+00 : f32
    %0 = vector.broadcast %cst : f32 to vector<6x6x32xf32>
    %c0 = arith.constant 0 : index
    %c0_0 = arith.constant 0 : index
    %c0_1 = arith.constant 0 : index
    %1 = vector.load %arg10[%c0, %c0_0, %c0_1] : memref<6x6x32xf32, #tpu.memory_space<vmem>>, vector<6x6x32xf32>
    tpu.vector_store %arg10[%c0, %c0_0, %c0_1], %0 {strides = array<i32>} : memref<6x6x32xf32, #tpu.memory_space<vmem>>, vector<6x6x32xf32>,
    %cst_2 = arith.constant 0.000000e+00 : f32
    %2 = vector.broadcast %cst_2 : f32 to vector<8x8x32xf32>
    %c0_3 = arith.constant 0 : index
    %c0_4 = arith.constant 0 : index
    %c0_5 = arith.constant 0 : index
    %3 = vector.load %arg11[%c0_3, %c0_4, %c0_5] : memref<8x8x32xf32, #tpu.memory_space<vmem>>, vector<8x8x32xf32>
    tpu.vector_store %arg11[%c0_3, %c0_4, %c0_5], %2 {strides = array<i32>} : memref<8x8x32xf32, #tpu.memory_space<vmem>>, vector<8x8x32xf32>,
    %c0_6 = arith.constant 0 : index
    %c0_7 = arith.constant 0 : index
    %c0_8 = arith.constant 0 : index
    %c0_9 = arith.constant 0 : index
    %4 = vector.load %arg1[%c0_6, %c0_7, %c0_8, %c0_9] : memref<1x4x4x32xf32, #tpu.memory_space<vmem>>, vector<1x4x4x32xf32>
    %5 = vector.shape_cast %4 : vector<1x4x4x32xf32> to vector<4x4x32xf32>
    %c1 = arith.constant 1 : index
    %c1_10 = arith.constant 1 : index
    %c0_11 = arith.constant 0 : index
    %6 = vector.load %arg10[%c1, %c1_10, %c0_11] : memref<6x6x32xf32, #tpu.memory_space<vmem>>, vector<4x4x32xf32>
    tpu.vector_store %arg10[%c1, %c1_10, %c0_11], %5 {strides = array<i32>} : memref<6x6x32xf32, #tpu.memory_space<vmem>>, vector<4x4x32xf32>,
    %c0_12 = arith.constant 0 : index
    %c0_13 = arith.constant 0 : index
    %c0_14 = arith.constant 0 : index
    %c0_15 = arith.constant 0 : index
    %7 = vector.load %arg2[%c0_12, %c0_13, %c0_14, %c0_15] : memref<1x6x6x32xf32, #tpu.memory_space<vmem>>, vector<1x6x6x32xf32>
    %8 = vector.shape_cast %7 : vector<1x6x6x32xf32> to vector<6x6x32xf32>
    %c1_16 = arith.constant 1 : index
    %c1_17 = arith.constant 1 : index
    %c0_18 = arith.constant 0 : index
    %9 = vector.load %arg11[%c1_16, %c1_17, %c0_18] : memref<8x8x32xf32, #tpu.memory_space<vmem>>, vector<6x6x32xf32>
    tpu.vector_store %arg11[%c1_16, %c1_17, %c0_18], %8 {strides = array<i32>} : memref<8x8x32xf32, #tpu.memory_space<vmem>>, vector<6x6x32xf32>,
    %c0_19 = arith.constant 0 : index
    %c0_20 = arith.constant 0 : index
    %c0_21 = arith.constant 0 : index
    %c0_22 = arith.constant 0 : index
    %10 = vector.load %arg3[%c0_19, %c0_20, %c0_21, %c0_22] : memref<3x3x1x96xf32, #tpu.memory_space<vmem>>, vector<3x3x1x96xf32>
    %c0_23 = arith.constant 0 : index
    %c0_24 = arith.constant 0 : index
    %c0_25 = arith.constant 0 : index
    %11 = vector.load %arg4[%c0_23, %c0_24, %c0_25] : memref<1x1x96xf32, #tpu.memory_space<vmem>>, vector<1x1x96xf32>
    %c0_26 = arith.constant 0 : index
    %c0_27 = arith.constant 0 : index
    %c0_28 = arith.constant 0 : index
    %12 = vector.load %arg10[%c0_26, %c0_27, %c0_28] : memref<6x6x32xf32, #tpu.memory_space<vmem>>, vector<6x6x32xf32>
    %13 = tpu.concatenate %12, %12, %12 in 2 : vector<6x6x32xf32>, vector<6x6x32xf32>, vector<6x6x32xf32> -> vector<6x6x96xf32>
    %cst_29 = arith.constant 0.000000e+00 : f32
    %14 = vector.broadcast %cst_29 : f32 to vector<4x4x96xf32>
    %15 = vector.extract_strided_slice %13 {offsets = [0, 0, 0], sizes = [4, 4, 96], strides = [1, 1, 1]} : vector<6x6x96xf32> to vector<4x4x96xf32>
    %16 = vector.extract_strided_slice %10 {offsets = [0, 0, 0, 0], sizes = [1, 1, 1, 96], strides = [1, 1, 1, 1]} : vector<3x3x1x96xf32> to vector<1x1x1x96xf32>
    %17 = vector.shape_cast %16 : vector<1x1x1x96xf32> to vector<1x96xf32>
    %18 = vector.shape_cast %17 : vector<1x96xf32> to vector<1x1x96xf32>
    %19 = vector.broadcast %18 : vector<1x1x96xf32> to vector<4x4x96xf32>
    %20 = arith.mulf %15, %19 : vector<4x4x96xf32>
    %21 = arith.addf %14, %20 : vector<4x4x96xf32>
    %22 = vector.extract_strided_slice %13 {offsets = [0, 1, 0], sizes = [4, 4, 96], strides = [1, 1, 1]} : vector<6x6x96xf32> to vector<4x4x96xf32>
    %23 = vector.extract_strided_slice %10 {offsets = [0, 1, 0, 0], sizes = [1, 1, 1, 96], strides = [1, 1, 1, 1]} : vector<3x3x1x96xf32> to vector<1x1x1x96xf32>
    %24 = vector.shape_cast %23 : vector<1x1x1x96xf32> to vector<1x96xf32>
    %25 = vector.shape_cast %24 : vector<1x96xf32> to vector<1x1x96xf32>
    %26 = vector.broadcast %25 : vector<1x1x96xf32> to vector<4x4x96xf32>
    %27 = arith.mulf %22, %26 : vector<4x4x96xf32>
    %28 = arith.addf %21, %27 : vector<4x4x96xf32>
    %29 = vector.extract_strided_slice %13 {offsets = [0, 2, 0], sizes = [4, 4, 96], strides = [1, 1, 1]} : vector<6x6x96xf32> to vector<4x4x96xf32>
    %30 = vector.extract_strided_slice %10 {offsets = [0, 2, 0, 0], sizes = [1, 1, 1, 96], strides = [1, 1, 1, 1]} : vector<3x3x1x96xf32> to vector<1x1x1x96xf32>
    %31 = vector.shape_cast %30 : vector<1x1x1x96xf32> to vector<1x96xf32>
    %32 = vector.shape_cast %31 : vector<1x96xf32> to vector<1x1x96xf32>
    %33 = vector.broadcast %32 : vector<1x1x96xf32> to vector<4x4x96xf32>
    %34 = arith.mulf %29, %33 : vector<4x4x96xf32>
    %35 = arith.addf %28, %34 : vector<4x4x96xf32>
    %36 = vector.extract_strided_slice %13 {offsets = [1, 0, 0], sizes = [4, 4, 96], strides = [1, 1, 1]} : vector<6x6x96xf32> to vector<4x4x96xf32>
    %37 = vector.extract_strided_slice %10 {offsets = [1, 0, 0, 0], sizes = [1, 1, 1, 96], strides = [1, 1, 1, 1]} : vector<3x3x1x96xf32> to vector<1x1x1x96xf32>
    %38 = vector.shape_cast %37 : vector<1x1x1x96xf32> to vector<1x96xf32>
    %39 = vector.shape_cast %38 : vector<1x96xf32> to vector<1x1x96xf32>
    %40 = vector.broadcast %39 : vector<1x1x96xf32> to vector<4x4x96xf32>
    %41 = arith.mulf %36, %40 : vector<4x4x96xf32>
    %42 = arith.addf %35, %41 : vector<4x4x96xf32>
    %43 = vector.extract_strided_slice %13 {offsets = [1, 1, 0], sizes = [4, 4, 96], strides = [1, 1, 1]} : vector<6x6x96xf32> to vector<4x4x96xf32>
    %44 = vector.extract_strided_slice %10 {offsets = [1, 1, 0, 0], sizes = [1, 1, 1, 96], strides = [1, 1, 1, 1]} : vector<3x3x1x96xf32> to vector<1x1x1x96xf32>
    %45 = vector.shape_cast %44 : vector<1x1x1x96xf32> to vector<1x96xf32>
    %46 = vector.shape_cast %45 : vector<1x96xf32> to vector<1x1x96xf32>
    %47 = vector.broadcast %46 : vector<1x1x96xf32> to vector<4x4x96xf32>
    %48 = arith.mulf %43, %47 : vector<4x4x96xf32>
    %49 = arith.addf %42, %48 : vector<4x4x96xf32>
    %50 = vector.extract_strided_slice %13 {offsets = [1, 2, 0], sizes = [4, 4, 96], strides = [1, 1, 1]} : vector<6x6x96xf32> to vector<4x4x96xf32>
    %51 = vector.extract_strided_slice %10 {offsets = [1, 2, 0, 0], sizes = [1, 1, 1, 96], strides = [1, 1, 1, 1]} : vector<3x3x1x96xf32> to vector<1x1x1x96xf32>
    %52 = vector.shape_cast %51 : vector<1x1x1x96xf32> to vector<1x96xf32>
    %53 = vector.shape_cast %52 : vector<1x96xf32> to vector<1x1x96xf32>
    %54 = vector.broadcast %53 : vector<1x1x96xf32> to vector<4x4x96xf32>
    %55 = arith.mulf %50, %54 : vector<4x4x96xf32>
    %56 = arith.addf %49, %55 : vector<4x4x96xf32>
    %57 = vector.extract_strided_slice %13 {offsets = [2, 0, 0], sizes = [4, 4, 96], strides = [1, 1, 1]} : vector<6x6x96xf32> to vector<4x4x96xf32>
    %58 = vector.extract_strided_slice %10 {offsets = [2, 0, 0, 0], sizes = [1, 1, 1, 96], strides = [1, 1, 1, 1]} : vector<3x3x1x96xf32> to vector<1x1x1x96xf32>
    %59 = vector.shape_cast %58 : vector<1x1x1x96xf32> to vector<1x96xf32>
    %60 = vector.shape_cast %59 : vector<1x96xf32> to vector<1x1x96xf32>
    %61 = vector.broadcast %60 : vector<1x1x96xf32> to vector<4x4x96xf32>
    %62 = arith.mulf %57, %61 : vector<4x4x96xf32>
    %63 = arith.addf %56, %62 : vector<4x4x96xf32>
    %64 = vector.extract_strided_slice %13 {offsets = [2, 1, 0], sizes = [4, 4, 96], strides = [1, 1, 1]} : vector<6x6x96xf32> to vector<4x4x96xf32>
    %65 = vector.extract_strided_slice %10 {offsets = [2, 1, 0, 0], sizes = [1, 1, 1, 96], strides = [1, 1, 1, 1]} : vector<3x3x1x96xf32> to vector<1x1x1x96xf32>
    %66 = vector.shape_cast %65 : vector<1x1x1x96xf32> to vector<1x96xf32>
    %67 = vector.shape_cast %66 : vector<1x96xf32> to vector<1x1x96xf32>
    %68 = vector.broadcast %67 : vector<1x1x96xf32> to vector<4x4x96xf32>
    %69 = arith.mulf %64, %68 : vector<4x4x96xf32>
    %70 = arith.addf %63, %69 : vector<4x4x96xf32>
    %71 = vector.extract_strided_slice %13 {offsets = [2, 2, 0], sizes = [4, 4, 96], strides = [1, 1, 1]} : vector<6x6x96xf32> to vector<4x4x96xf32>
    %72 = vector.extract_strided_slice %10 {offsets = [2, 2, 0, 0], sizes = [1, 1, 1, 96], strides = [1, 1, 1, 1]} : vector<3x3x1x96xf32> to vector<1x1x1x96xf32>
    %73 = vector.shape_cast %72 : vector<1x1x1x96xf32> to vector<1x96xf32>
    %74 = vector.shape_cast %73 : vector<1x96xf32> to vector<1x1x96xf32>
    %75 = vector.broadcast %74 : vector<1x1x96xf32> to vector<4x4x96xf32>
    %76 = arith.mulf %71, %75 : vector<4x4x96xf32>
    %77 = arith.addf %70, %76 : vector<4x4x96xf32>
    %78 = vector.broadcast %11 : vector<1x1x96xf32> to vector<4x4x96xf32>
    %79 = arith.addf %77, %78 : vector<4x4x96xf32>
    %c0_30 = arith.constant 0 : index
    %c0_31 = arith.constant 0 : index
    %c0_32 = arith.constant 0 : index
    %80 = vector.load %arg11[%c0_30, %c0_31, %c0_32] : memref<8x8x32xf32, #tpu.memory_space<vmem>>, vector<8x8x32xf32>
    %81 = tpu.concatenate %80, %80, %80 in 2 : vector<8x8x32xf32>, vector<8x8x32xf32>, vector<8x8x32xf32> -> vector<8x8x96xf32>
    %cst_33 = arith.constant 0.000000e+00 : f32
    %82 = vector.broadcast %cst_33 : f32 to vector<6x6x96xf32>
    %83 = vector.extract_strided_slice %81 {offsets = [0, 0, 0], sizes = [6, 6, 96], strides = [1, 1, 1]} : vector<8x8x96xf32> to vector<6x6x96xf32>
    %84 = vector.extract_strided_slice %10 {offsets = [0, 0, 0, 0], sizes = [1, 1, 1, 96], strides = [1, 1, 1, 1]} : vector<3x3x1x96xf32> to vector<1x1x1x96xf32>
    %85 = vector.shape_cast %84 : vector<1x1x1x96xf32> to vector<1x96xf32>
    %86 = vector.shape_cast %85 : vector<1x96xf32> to vector<1x1x96xf32>
    %87 = vector.broadcast %86 : vector<1x1x96xf32> to vector<6x6x96xf32>
    %88 = arith.mulf %83, %87 : vector<6x6x96xf32>
    %89 = arith.addf %82, %88 : vector<6x6x96xf32>
    %90 = vector.extract_strided_slice %81 {offsets = [0, 1, 0], sizes = [6, 6, 96], strides = [1, 1, 1]} : vector<8x8x96xf32> to vector<6x6x96xf32>
    %91 = vector.extract_strided_slice %10 {offsets = [0, 1, 0, 0], sizes = [1, 1, 1, 96], strides = [1, 1, 1, 1]} : vector<3x3x1x96xf32> to vector<1x1x1x96xf32>
    %92 = vector.shape_cast %91 : vector<1x1x1x96xf32> to vector<1x96xf32>
    %93 = vector.shape_cast %92 : vector<1x96xf32> to vector<1x1x96xf32>
    %94 = vector.broadcast %93 : vector<1x1x96xf32> to vector<6x6x96xf32>
    %95 = arith.mulf %90, %94 : vector<6x6x96xf32>
    %96 = arith.addf %89, %95 : vector<6x6x96xf32>
    %97 = vector.extract_strided_slice %81 {offsets = [0, 2, 0], sizes = [6, 6, 96], strides = [1, 1, 1]} : vector<8x8x96xf32> to vector<6x6x96xf32>
    %98 = vector.extract_strided_slice %10 {offsets = [0, 2, 0, 0], sizes = [1, 1, 1, 96], strides = [1, 1, 1, 1]} : vector<3x3x1x96xf32> to vector<1x1x1x96xf32>
    %99 = vector.shape_cast %98 : vector<1x1x1x96xf32> to vector<1x96xf32>
    %100 = vector.shape_cast %99 : vector<1x96xf32> to vector<1x1x96xf32>
    %101 = vector.broadcast %100 : vector<1x1x96xf32> to vector<6x6x96xf32>
    %102 = arith.mulf %97, %101 : vector<6x6x96xf32>
    %103 = arith.addf %96, %102 : vector<6x6x96xf32>
    %104 = vector.extract_strided_slice %81 {offsets = [1, 0, 0], sizes = [6, 6, 96], strides = [1, 1, 1]} : vector<8x8x96xf32> to vector<6x6x96xf32>
    %105 = vector.extract_strided_slice %10 {offsets = [1, 0, 0, 0], sizes = [1, 1, 1, 96], strides = [1, 1, 1, 1]} : vector<3x3x1x96xf32> to vector<1x1x1x96xf32>
    %106 = vector.shape_cast %105 : vector<1x1x1x96xf32> to vector<1x96xf32>
    %107 = vector.shape_cast %106 : vector<1x96xf32> to vector<1x1x96xf32>
    %108 = vector.broadcast %107 : vector<1x1x96xf32> to vector<6x6x96xf32>
    %109 = arith.mulf %104, %108 : vector<6x6x96xf32>
    %110 = arith.addf %103, %109 : vector<6x6x96xf32>
    %111 = vector.extract_strided_slice %81 {offsets = [1, 1, 0], sizes = [6, 6, 96], strides = [1, 1, 1]} : vector<8x8x96xf32> to vector<6x6x96xf32>
    %112 = vector.extract_strided_slice %10 {offsets = [1, 1, 0, 0], sizes = [1, 1, 1, 96], strides = [1, 1, 1, 1]} : vector<3x3x1x96xf32> to vector<1x1x1x96xf32>
    %113 = vector.shape_cast %112 : vector<1x1x1x96xf32> to vector<1x96xf32>
    %114 = vector.shape_cast %113 : vector<1x96xf32> to vector<1x1x96xf32>
    %115 = vector.broadcast %114 : vector<1x1x96xf32> to vector<6x6x96xf32>
    %116 = arith.mulf %111, %115 : vector<6x6x96xf32>
    %117 = arith.addf %110, %116 : vector<6x6x96xf32>
    %118 = vector.extract_strided_slice %81 {offsets = [1, 2, 0], sizes = [6, 6, 96], strides = [1, 1, 1]} : vector<8x8x96xf32> to vector<6x6x96xf32>
    %119 = vector.extract_strided_slice %10 {offsets = [1, 2, 0, 0], sizes = [1, 1, 1, 96], strides = [1, 1, 1, 1]} : vector<3x3x1x96xf32> to vector<1x1x1x96xf32>
    %120 = vector.shape_cast %119 : vector<1x1x1x96xf32> to vector<1x96xf32>
    %121 = vector.shape_cast %120 : vector<1x96xf32> to vector<1x1x96xf32>
    %122 = vector.broadcast %121 : vector<1x1x96xf32> to vector<6x6x96xf32>
    %123 = arith.mulf %118, %122 : vector<6x6x96xf32>
    %124 = arith.addf %117, %123 : vector<6x6x96xf32>
    %125 = vector.extract_strided_slice %81 {offsets = [2, 0, 0], sizes = [6, 6, 96], strides = [1, 1, 1]} : vector<8x8x96xf32> to vector<6x6x96xf32>
    %126 = vector.extract_strided_slice %10 {offsets = [2, 0, 0, 0], sizes = [1, 1, 1, 96], strides = [1, 1, 1, 1]} : vector<3x3x1x96xf32> to vector<1x1x1x96xf32>
    %127 = vector.shape_cast %126 : vector<1x1x1x96xf32> to vector<1x96xf32>
    %128 = vector.shape_cast %127 : vector<1x96xf32> to vector<1x1x96xf32>
    %129 = vector.broadcast %128 : vector<1x1x96xf32> to vector<6x6x96xf32>
    %130 = arith.mulf %125, %129 : vector<6x6x96xf32>
    %131 = arith.addf %124, %130 : vector<6x6x96xf32>
    %132 = vector.extract_strided_slice %81 {offsets = [2, 1, 0], sizes = [6, 6, 96], strides = [1, 1, 1]} : vector<8x8x96xf32> to vector<6x6x96xf32>
    %133 = vector.extract_strided_slice %10 {offsets = [2, 1, 0, 0], sizes = [1, 1, 1, 96], strides = [1, 1, 1, 1]} : vector<3x3x1x96xf32> to vector<1x1x1x96xf32>
    %134 = vector.shape_cast %133 : vector<1x1x1x96xf32> to vector<1x96xf32>
    %135 = vector.shape_cast %134 : vector<1x96xf32> to vector<1x1x96xf32>
    %136 = vector.broadcast %135 : vector<1x1x96xf32> to vector<6x6x96xf32>
    %137 = arith.mulf %132, %136 : vector<6x6x96xf32>
    %138 = arith.addf %131, %137 : vector<6x6x96xf32>
    %139 = vector.extract_strided_slice %81 {offsets = [2, 2, 0], sizes = [6, 6, 96], strides = [1, 1, 1]} : vector<8x8x96xf32> to vector<6x6x96xf32>
    %140 = vector.extract_strided_slice %10 {offsets = [2, 2, 0, 0], sizes = [1, 1, 1, 96], strides = [1, 1, 1, 1]} : vector<3x3x1x96xf32> to vector<1x1x1x96xf32>
    %141 = vector.shape_cast %140 : vector<1x1x1x96xf32> to vector<1x96xf32>
    %142 = vector.shape_cast %141 : vector<1x96xf32> to vector<1x1x96xf32>
    %143 = vector.broadcast %142 : vector<1x1x96xf32> to vector<6x6x96xf32>
    %144 = arith.mulf %139, %143 : vector<6x6x96xf32>
    %145 = arith.addf %138, %144 : vector<6x6x96xf32>
    %146 = vector.broadcast %11 : vector<1x1x96xf32> to vector<6x6x96xf32>
    %147 = arith.addf %145, %146 : vector<6x6x96xf32>
    %148 = vector.extract_strided_slice %79 {offsets = [0, 0, 0], sizes = [1, 4, 96], strides = [1, 1, 1]} : vector<4x4x96xf32> to vector<1x4x96xf32>
    %149 = vector.shape_cast %148 : vector<1x4x96xf32> to vector<4x96xf32>
    %c0_34 = arith.constant 0 : index
    %c0_35 = arith.constant 0 : index
    %150 = vector.load %arg12[%c0_34, %c0_35] : memref<52x96xf32, #tpu.memory_space<vmem>>, vector<4x96xf32>
    tpu.vector_store %arg12[%c0_34, %c0_35], %149 {strides = array<i32>} : memref<52x96xf32, #tpu.memory_space<vmem>>, vector<4x96xf32>,
    %151 = vector.extract_strided_slice %79 {offsets = [1, 0, 0], sizes = [1, 4, 96], strides = [1, 1, 1]} : vector<4x4x96xf32> to vector<1x4x96xf32>
    %152 = vector.shape_cast %151 : vector<1x4x96xf32> to vector<4x96xf32>
    %c4 = arith.constant 4 : index
    %c0_36 = arith.constant 0 : index
    %153 = vector.load %arg12[%c4, %c0_36] : memref<52x96xf32, #tpu.memory_space<vmem>>, vector<4x96xf32>
    tpu.vector_store %arg12[%c4, %c0_36], %152 {strides = array<i32>} : memref<52x96xf32, #tpu.memory_space<vmem>>, vector<4x96xf32>,
    %154 = vector.extract_strided_slice %79 {offsets = [2, 0, 0], sizes = [1, 4, 96], strides = [1, 1, 1]} : vector<4x4x96xf32> to vector<1x4x96xf32>
    %155 = vector.shape_cast %154 : vector<1x4x96xf32> to vector<4x96xf32>
    %c8 = arith.constant 8 : index
    %c0_37 = arith.constant 0 : index
    %156 = vector.load %arg12[%c8, %c0_37] : memref<52x96xf32, #tpu.memory_space<vmem>>, vector<4x96xf32>
    tpu.vector_store %arg12[%c8, %c0_37], %155 {strides = array<i32>} : memref<52x96xf32, #tpu.memory_space<vmem>>, vector<4x96xf32>,
    %157 = vector.extract_strided_slice %79 {offsets = [3, 0, 0], sizes = [1, 4, 96], strides = [1, 1, 1]} : vector<4x4x96xf32> to vector<1x4x96xf32>
    %158 = vector.shape_cast %157 : vector<1x4x96xf32> to vector<4x96xf32>
    %c12 = arith.constant 12 : index
    %c0_38 = arith.constant 0 : index
    %159 = vector.load %arg12[%c12, %c0_38] : memref<52x96xf32, #tpu.memory_space<vmem>>, vector<4x96xf32>
    tpu.vector_store %arg12[%c12, %c0_38], %158 {strides = array<i32>} : memref<52x96xf32, #tpu.memory_space<vmem>>, vector<4x96xf32>,
    %160 = vector.extract_strided_slice %147 {offsets = [0, 0, 0], sizes = [1, 6, 96], strides = [1, 1, 1]} : vector<6x6x96xf32> to vector<1x6x96xf32>
    %161 = vector.shape_cast %160 : vector<1x6x96xf32> to vector<6x96xf32>
    %c16 = arith.constant 16 : index
    %c0_39 = arith.constant 0 : index
    %162 = vector.load %arg12[%c16, %c0_39] : memref<52x96xf32, #tpu.memory_space<vmem>>, vector<6x96xf32>
    tpu.vector_store %arg12[%c16, %c0_39], %161 {strides = array<i32>} : memref<52x96xf32, #tpu.memory_space<vmem>>, vector<6x96xf32>,
    %163 = vector.extract_strided_slice %147 {offsets = [1, 0, 0], sizes = [1, 6, 96], strides = [1, 1, 1]} : vector<6x6x96xf32> to vector<1x6x96xf32>
    %164 = vector.shape_cast %163 : vector<1x6x96xf32> to vector<6x96xf32>
    %c22 = arith.constant 22 : index
    %c0_40 = arith.constant 0 : index
    %165 = vector.load %arg12[%c22, %c0_40] : memref<52x96xf32, #tpu.memory_space<vmem>>, vector<6x96xf32>
    tpu.vector_store %arg12[%c22, %c0_40], %164 {strides = array<i32>} : memref<52x96xf32, #tpu.memory_space<vmem>>, vector<6x96xf32>,
    %166 = vector.extract_strided_slice %147 {offsets = [2, 0, 0], sizes = [1, 6, 96], strides = [1, 1, 1]} : vector<6x6x96xf32> to vector<1x6x96xf32>
    %167 = vector.shape_cast %166 : vector<1x6x96xf32> to vector<6x96xf32>
    %c28 = arith.constant 28 : index
    %c0_41 = arith.constant 0 : index
    %168 = vector.load %arg12[%c28, %c0_41] : memref<52x96xf32, #tpu.memory_space<vmem>>, vector<6x96xf32>
    tpu.vector_store %arg12[%c28, %c0_41], %167 {strides = array<i32>} : memref<52x96xf32, #tpu.memory_space<vmem>>, vector<6x96xf32>,
    %169 = vector.extract_strided_slice %147 {offsets = [3, 0, 0], sizes = [1, 6, 96], strides = [1, 1, 1]} : vector<6x6x96xf32> to vector<1x6x96xf32>
    %170 = vector.shape_cast %169 : vector<1x6x96xf32> to vector<6x96xf32>
    %c34 = arith.constant 34 : index
    %c0_42 = arith.constant 0 : index
    %171 = vector.load %arg12[%c34, %c0_42] : memref<52x96xf32, #tpu.memory_space<vmem>>, vector<6x96xf32>
    tpu.vector_store %arg12[%c34, %c0_42], %170 {strides = array<i32>} : memref<52x96xf32, #tpu.memory_space<vmem>>, vector<6x96xf32>,
    %172 = vector.extract_strided_slice %147 {offsets = [4, 0, 0], sizes = [1, 6, 96], strides = [1, 1, 1]} : vector<6x6x96xf32> to vector<1x6x96xf32>
    %173 = vector.shape_cast %172 : vector<1x6x96xf32> to vector<6x96xf32>
    %c40 = arith.constant 40 : index
    %c0_43 = arith.constant 0 : index
    %174 = vector.load %arg12[%c40, %c0_43] : memref<52x96xf32, #tpu.memory_space<vmem>>, vector<6x96xf32>
    tpu.vector_store %arg12[%c40, %c0_43], %173 {strides = array<i32>} : memref<52x96xf32, #tpu.memory_space<vmem>>, vector<6x96xf32>,
    %175 = vector.extract_strided_slice %147 {offsets = [5, 0, 0], sizes = [1, 6, 96], strides = [1, 1, 1]} : vector<6x6x96xf32> to vector<1x6x96xf32>
    %176 = vector.shape_cast %175 : vector<1x6x96xf32> to vector<6x96xf32>
    %c46 = arith.constant 46 : index
    %c0_44 = arith.constant 0 : index
    %177 = vector.load %arg12[%c46, %c0_44] : memref<52x96xf32, #tpu.memory_space<vmem>>, vector<6x96xf32>
    tpu.vector_store %arg12[%c46, %c0_44], %176 {strides = array<i32>} : memref<52x96xf32, #tpu.memory_space<vmem>>, vector<6x96xf32>,
    %c0_45 = arith.constant 0 : index
    %c0_46 = arith.constant 0 : index
    %178 = vector.load %arg12[%c0_45, %c0_46] : memref<52x96xf32, #tpu.memory_space<vmem>>, vector<52x96xf32>
    %c0_47 = arith.constant 0 : index
    %c0_48 = arith.constant 0 : index
    %179 = vector.load %arg5[%c0_47, %c0_48] : memref<96x96xf32, #tpu.memory_space<vmem>>, vector<96x96xf32>
    %cst_49 = arith.constant dense<0.000000e+00> : vector<52x96xf32>
    %180 = tpu.matmul %178, %179, %cst_49 {dimension_numbers = #tpu.dot_dimension_numbers<[1], [0], [0], [1], [0, 0, 1, 1], [], []>, precision = #tpu.contract_precision<fp32>} : vector<52x96xf32>, vector<96x96xf32>, vector<52x96xf32> -> vector<52x96xf32>
    %181 = vector.extract_strided_slice %180 {offsets = [0, 0], sizes = [52, 32], strides = [1, 1]} : vector<52x96xf32> to vector<52x32xf32>
    %182 = vector.extract_strided_slice %180 {offsets = [0, 32], sizes = [52, 32], strides = [1, 1]} : vector<52x96xf32> to vector<52x32xf32>
    %183 = vector.extract_strided_slice %180 {offsets = [0, 64], sizes = [52, 32], strides = [1, 1]} : vector<52x96xf32> to vector<52x32xf32>
    %c0_50 = arith.constant 0 : index
    %c0_51 = arith.constant 0 : index
    %c0_52 = arith.constant 0 : index
    %184 = vector.load %arg6[%c0_50, %c0_51, %c0_52] : memref<2x52x52xf32, #tpu.memory_space<vmem>>, vector<2x52x52xf32>
    %185 = vector.extract_strided_slice %181 {offsets = [0, 0], sizes = [52, 16], strides = [1, 1]} : vector<52x32xf32> to vector<52x16xf32>
    %186 = vector.extract_strided_slice %182 {offsets = [0, 0], sizes = [52, 16], strides = [1, 1]} : vector<52x32xf32> to vector<52x16xf32>
    %187 = vector.extract_strided_slice %183 {offsets = [0, 0], sizes = [52, 16], strides = [1, 1]} : vector<52x32xf32> to vector<52x16xf32>
    %cst_53 = arith.constant dense<0.000000e+00> : vector<52x52xf32>
    %188 = tpu.matmul %185, %186, %cst_53 {dimension_numbers = #tpu.dot_dimension_numbers<[1], [1], [0], [0], [0, 0, 1, 0], [], []>, precision = #tpu.contract_precision<fp32>} : vector<52x16xf32>, vector<52x16xf32>, vector<52x52xf32> -> vector<52x52xf32>
    %189 = vector.extract_strided_slice %184 {offsets = [0, 0, 0], sizes = [1, 52, 52], strides = [1, 1, 1]} : vector<2x52x52xf32> to vector<1x52x52xf32>
    %190 = vector.shape_cast %189 : vector<1x52x52xf32> to vector<52x52xf32>
    %191 = arith.addf %188, %190 : vector<52x52xf32>
    %cst_54 = arith.constant dense<0xFF800000> : vector<52xf32>
    %192 = vector.multi_reduction <maximumf>, %191, %cst_54 [1] : vector<52x52xf32> to vector<52xf32>
    %193 = vector.shape_cast %192 : vector<52xf32> to vector<52x1xf32>
    %194 = vector.broadcast %193 : vector<52x1xf32> to vector<52x52xf32>
    %195 = arith.subf %191, %194 : vector<52x52xf32>
    %196 = math.exp %195 : vector<52x52xf32>
    %cst_55 = arith.constant dense<0.000000e+00> : vector<52xf32>
    %197 = vector.multi_reduction <add>, %196, %cst_55 [1] : vector<52x52xf32> to vector<52xf32>
    %198 = vector.shape_cast %197 : vector<52xf32> to vector<52x1xf32>
    %199 = tpu.reciprocal %198 {approx = true} : vector<52x1xf32> -> vector<52x1xf32>
    %200 = vector.broadcast %199 : vector<52x1xf32> to vector<52x52xf32>
    %201 = arith.mulf %196, %200 : vector<52x52xf32>
    %cst_56 = arith.constant dense<0.000000e+00> : vector<52x16xf32>
    %202 = tpu.matmul %201, %187, %cst_56 {dimension_numbers = #tpu.dot_dimension_numbers<[1], [0], [0], [1], [0, 0, 1, 1], [], []>, precision = #tpu.contract_precision<fp32>} : vector<52x52xf32>, vector<52x16xf32>, vector<52x16xf32> -> vector<52x16xf32>
    %203 = vector.extract_strided_slice %181 {offsets = [0, 16], sizes = [52, 16], strides = [1, 1]} : vector<52x32xf32> to vector<52x16xf32>
    %204 = vector.extract_strided_slice %182 {offsets = [0, 16], sizes = [52, 16], strides = [1, 1]} : vector<52x32xf32> to vector<52x16xf32>
    %205 = vector.extract_strided_slice %183 {offsets = [0, 16], sizes = [52, 16], strides = [1, 1]} : vector<52x32xf32> to vector<52x16xf32>
    %cst_57 = arith.constant dense<0.000000e+00> : vector<52x52xf32>
    %206 = tpu.matmul %203, %204, %cst_57 {dimension_numbers = #tpu.dot_dimension_numbers<[1], [1], [0], [0], [0, 0, 1, 0], [], []>, precision = #tpu.contract_precision<fp32>} : vector<52x16xf32>, vector<52x16xf32>, vector<52x52xf32> -> vector<52x52xf32>
    %207 = vector.extract_strided_slice %184 {offsets = [1, 0, 0], sizes = [1, 52, 52], strides = [1, 1, 1]} : vector<2x52x52xf32> to vector<1x52x52xf32>
    %208 = vector.shape_cast %207 : vector<1x52x52xf32> to vector<52x52xf32>
    %209 = arith.addf %206, %208 : vector<52x52xf32>
    %cst_58 = arith.constant dense<0xFF800000> : vector<52xf32>
    %210 = vector.multi_reduction <maximumf>, %209, %cst_58 [1] : vector<52x52xf32> to vector<52xf32>
    %211 = vector.shape_cast %210 : vector<52xf32> to vector<52x1xf32>
    %212 = vector.broadcast %211 : vector<52x1xf32> to vector<52x52xf32>
    %213 = arith.subf %209, %212 : vector<52x52xf32>
    %214 = math.exp %213 : vector<52x52xf32>
    %cst_59 = arith.constant dense<0.000000e+00> : vector<52xf32>
    %215 = vector.multi_reduction <add>, %214, %cst_59 [1] : vector<52x52xf32> to vector<52xf32>
    %216 = vector.shape_cast %215 : vector<52xf32> to vector<52x1xf32>
    %217 = tpu.reciprocal %216 {approx = true} : vector<52x1xf32> -> vector<52x1xf32>
    %218 = vector.broadcast %217 : vector<52x1xf32> to vector<52x52xf32>
    %219 = arith.mulf %214, %218 : vector<52x52xf32>
    %cst_60 = arith.constant dense<0.000000e+00> : vector<52x16xf32>
    %220 = tpu.matmul %219, %205, %cst_60 {dimension_numbers = #tpu.dot_dimension_numbers<[1], [0], [0], [1], [0, 0, 1, 1], [], []>, precision = #tpu.contract_precision<fp32>} : vector<52x52xf32>, vector<52x16xf32>, vector<52x16xf32> -> vector<52x16xf32>
    %221 = tpu.concatenate %202, %220 in 1 : vector<52x16xf32>, vector<52x16xf32> -> vector<52x32xf32>
    %c0_61 = arith.constant 0 : index
    %c0_62 = arith.constant 0 : index
    %222 = vector.load %arg7[%c0_61, %c0_62] : memref<32x32xf32, #tpu.memory_space<vmem>>, vector<32x32xf32>
    %cst_63 = arith.constant dense<0.000000e+00> : vector<52x32xf32>
    %223 = tpu.matmul %221, %222, %cst_63 {dimension_numbers = #tpu.dot_dimension_numbers<[1], [0], [0], [1], [0, 0, 1, 1], [], []>, precision = #tpu.contract_precision<fp32>} : vector<52x32xf32>, vector<32x32xf32>, vector<52x32xf32> -> vector<52x32xf32>
    %c0_64 = arith.constant 0 : index
    %c0_65 = arith.constant 0 : index
    %224 = vector.load %arg8[%c0_64, %c0_65] : memref<1x32xf32, #tpu.memory_space<vmem>>, vector<1x32xf32>
    %225 = vector.broadcast %224 : vector<1x32xf32> to vector<52x32xf32>
    %226 = arith.addf %223, %225 : vector<52x32xf32>
    %c0_66 = arith.constant 0 : index
    %c0_67 = arith.constant 0 : index
    %c0_68 = arith.constant 0 : index
    %227 = vector.load %arg9[%c0_66, %c0_67, %c0_68] : memref<1x52x32xf32, #tpu.memory_space<vmem>>, vector<1x52x32xf32>
    %228 = vector.shape_cast %227 : vector<1x52x32xf32> to vector<52x32xf32>
    %229 = vector.shape_cast %226 : vector<52x32xf32> to vector<1x52x32xf32>
    tpu.vector_store %arg9[%c0_66, %c0_67, %c0_68], %229 {strides = array<i32>} : memref<1x52x32xf32, #tpu.memory_space<vmem>>, vector<1x52x32xf32>,
    return
  }
  func.func @transform_0(%arg0: i32) -> (i32, i32, i32, i32) {
    %c0_i32 = arith.constant 0 : i32
    %c0_i32_0 = arith.constant 0 : i32
    %c0_i32_1 = arith.constant 0 : i32
    %c0_i32_2 = arith.constant 0 : i32
    return %arg0, %c0_i32, %c0_i32_0, %c0_i32_1 : i32, i32, i32, i32
  }
  func.func @transform_1(%arg0: i32) -> (i32, i32, i32, i32) {
    %c0_i32 = arith.constant 0 : i32
    %c0_i32_0 = arith.constant 0 : i32
    %c0_i32_1 = arith.constant 0 : i32
    %c0_i32_2 = arith.constant 0 : i32
    return %arg0, %c0_i32, %c0_i32_0, %c0_i32_1 : i32, i32, i32, i32
  }
  func.func @transform_2(%arg0: i32) -> (i32, i32, i32, i32) {
    %c0_i32 = arith.constant 0 : i32
    %c0_i32_0 = arith.constant 0 : i32
    %c0_i32_1 = arith.constant 0 : i32
    %c0_i32_2 = arith.constant 0 : i32
    %c0_i32_3 = arith.constant 0 : i32
    return %c0_i32, %c0_i32_0, %c0_i32_1, %c0_i32_2 : i32, i32, i32, i32
  }
  func.func @transform_3(%arg0: i32) -> (i32, i32, i32) {
    %c0_i32 = arith.constant 0 : i32
    %c0_i32_0 = arith.constant 0 : i32
    %c0_i32_1 = arith.constant 0 : i32
    %c0_i32_2 = arith.constant 0 : i32
    return %c0_i32, %c0_i32_0, %c0_i32_1 : i32, i32, i32
  }
  func.func @transform_4(%arg0: i32) -> (i32, i32) {
    %c0_i32 = arith.constant 0 : i32
    %c0_i32_0 = arith.constant 0 : i32
    %c0_i32_1 = arith.constant 0 : i32
    return %c0_i32, %c0_i32_0 : i32, i32
  }
  func.func @transform_5(%arg0: i32) -> (i32, i32, i32) {
    %c0_i32 = arith.constant 0 : i32
    %c0_i32_0 = arith.constant 0 : i32
    %c0_i32_1 = arith.constant 0 : i32
    %c0_i32_2 = arith.constant 0 : i32
    return %c0_i32, %c0_i32_0, %c0_i32_1 : i32, i32, i32
  }
  func.func @transform_6(%arg0: i32) -> (i32, i32) {
    %c0_i32 = arith.constant 0 : i32
    %c0_i32_0 = arith.constant 0 : i32
    %c0_i32_1 = arith.constant 0 : i32
    return %c0_i32, %c0_i32_0 : i32, i32
  }
  func.func @transform_7(%arg0: i32) -> (i32, i32) {
    %c0_i32 = arith.constant 0 : i32
    %c0_i32_0 = arith.constant 0 : i32
    %c0_i32_1 = arith.constant 0 : i32
    return %c0_i32, %c0_i32_0 : i32, i32
  }
  func.func @transform_8(%arg0: i32) -> (i32, i32, i32) {
    %c0_i32 = arith.constant 0 : i32
    %c0_i32_0 = arith.constant 0 : i32
    %c0_i32_1 = arith.constant 0 : i32
    return %arg0, %c0_i32, %c0_i32_0 : i32, i32, i32
  }
}

</mosaic_0001>

<bundles_post_ra>
// kernel: convattn_forward.1
= control target key start
LH: loop header
LB: loop body
LE: loop exit
PB: predicated region body
PF: predicated region fallthrough
CT: control target
= control target key end

     0   :  { %s8181_s27 = smov 0   ;;  %s11199_s0 = inlined_call_operand.vmem [shape: f32[2,4,4,32], index: 0, kind: input, shape index: {}]   ;;  %s11200_s1 = inlined_call_operand.vmem [shape: f32[2,6,6,32], index: 1, kind: input, shape index: {}]   ;;  %s11201_s2 = inlined_call_operand.vmem [shape: f32[3,3,1,96], index: 2, kind: input, shape index: {}]   ;;  %s11202_s3 = inlined_call_operand.vmem [shape: f32[1,1,96], index: 3, kind: input, shape index: {}]   ;;  %s11203_s4 = inlined_call_operand.vmem [shape: f32[96,96], index: 4, kind: input, shape index: {}]   ;;  %s11204_s5 = inlined_call_operand.vmem [shape: f32[2,52,52], index: 5, kind: input, shape index: {}]   ;;  %s11205_s6 = inlined_call_operand.vmem [shape: f32[32,32], index: 6, kind: input, shape index: {}]   ;;  %s11206_s7 = inlined_call_operand.vmem [shape: f32[1,32], index: 7, kind: input, shape index: {}]   ;;  %s11207_s8 = inlined_call_operand.vmem [shape: f32[2,52,32], index: 8, kind: output, shape index: {}]  }
   0x1 LB: > { %s6221_s28 = sadd.s32 4294967295, %s8125_s27   ;;  %p6225_p0 = scmp.ge.s32.totalorder %s8125_s27, 1  ;;  %s8125_s27 = sphi %s8181_s27, %s18_s27  }
   0x2   : > { %p272_p1 = scmp.lt.s32.totalorder %s8125_s27, 3 }
   0x4   : > { %p273_p2 = pnand %p6225_p0, %p272_p1 }
   0x6   : > { %276 = sbr.rel (%p273_p2) target bundleno = 2676 (0xa74), region = 52 }
   0xb   : > { %vm326_vm0 = vcmask 259072   ;;  %vm333_vm1 = vcmask 261120   ;;  %v11220_v0 = vmov 0.0   ;;  %p311_p3 = scmp.lt.s32.totalorder %s6221_s28, 1  ;;  %vm347_vm2 = vcmask 257024   ;;  %s8128_s15 = smov 32  }
   0xc   : > { %327 = vst.msk [vmem:[#allocation2] sm:$0x3f] %vm326_vm0, %v11220_v0  ;;  %328 = vst.msk [vmem:[#allocation2 + $0x8] sm:$0x3f] %vm326_vm0, %v11220_v0  ;;  %6805 = vmatprep.subr.mxu1 %v11220_v0  ;;  %6760 = vmatprep.subr.mxu0 %v11220_v0  ;;  %s8129_s16 = smov 64   ;;  %v976_v12 = vld [vmem:[%s11203_s4 + $0x58] sm:$0xff] }
   0xd   : > { %329 = vst.msk [vmem:[#allocation2 + $0x10] sm:$0x3f] %vm326_vm0, %v11220_v0  ;;  %330 = vst.msk [vmem:[#allocation2 + $0x18] sm:$0x3f] %vm326_vm0, %v11220_v0  ;;  %s11296_s28 = smov (!%p311_p3, %s6221_s28), 1  ;;  %v8248_v13 = vand.u32 4294901760, %v976_v12 }
   0xe   : > { %331 = vst.msk [vmem:[#allocation2 + $0x20] sm:$0x3f] %vm326_vm0, %v11220_v0  ;;  %332 = vst.msk [vmem:[#allocation2 + $0x28] sm:$0x3f] %vm326_vm0, %v11220_v0  ;;  %s6243_s29 = sshll.u32 %s11296_s28, 4  ;;  %s8044_s30 = smul.u32 48, %s11296_s28 }
   0xf   : > { %335 = vst.msk [vmem:[#allocation3 + $0x8] sm:$0xff] %vm333_vm1, %v11220_v0  ;;  %334 = vst.msk [vmem:[#allocation3] sm:$0xff] %vm333_vm1, %v11220_v0  ;;  %s315_s11 = scalar_lea.vmem %s11199_s0, %s6243_s29  ;;  %v975_v14 = vld [vmem:[%s11203_s4 + $0x50] sm:$0xff]  ;;  %v974_v16 = vld [vmem:[%s11203_s4 + $0x48] sm:$0xff]  ;;  %v8261_v18 = vsub.f32 %v976_v12, %v8248_v13  ;;  %6761 = vmatpush3.msra.mxu0 %v8248_v13  ;;  %vm8130_vm3 = vmmov 0   ;;  %vm429_vm4 = vcmask 523264  }
  0x10   : > { %336 = vst.msk [vmem:[#allocation3 + $0x10] sm:$0xff] %vm333_vm1, %v11220_v0  ;;  %337 = vst.msk [vmem:[#allocation3 + $0x18] sm:$0xff] %vm333_vm1, %v11220_v0  ;;  %v342_v1 = vld [vmem:[%s315_s11] sm:$0xf]  ;;  %v344_v2 = vld [vmem:[%s315_s11 + $0x8] sm:$0xf]  ;;  %s320_s14 = scalar_lea.vmem %s11200_s1, %s8044_s30  ;;  %6762 = vmatprep.subr.mxu0 %v11220_v0  ;;  %6829 = vmatprep.mubr.msk.f32.mxu1 %vm8130_vm3, %v11220_v0 }
  0x11   : > { %338 = vst.msk [vmem:[#allocation3 + $0x20] sm:$0xff] %vm333_vm1, %v11220_v0  ;;  %339 = vst.msk [vmem:[#allocation3 + $0x28] sm:$0xff] %vm333_vm1, %v11220_v0  ;;  %v343_v3 = vld [vmem:[%s315_s11 + $0x4] sm:$0xf]  ;;  %v345_v6 = vld [vmem:[%s315_s11 + $0xc] sm:$0xf]  ;;  %6784 = vmatprep.mubr.msk.f32.mxu0 %vm8130_vm3, %v11220_v0 }
  0x12   : > { %340 = vst.msk [vmem:[#allocation3 + $0x30] sm:$0xff] %vm333_vm1, %v11220_v0  ;;  %341 = vst.msk [vmem:[#allocation3 + $0x38] sm:$0xff] %vm333_vm1, %v11220_v0  ;;  %v352_v5 = vld [vmem:[%s320_s14] sm:$0x3f]  ;;  %v353_v7 = vld [vmem:[%s320_s14 + $0x8] sm:$0x3f] }
  0x13   : > { %v8229_v4 = vld [vmem:[#allocation2] sm:$0x3f]  ;;  %348 = vst.msk [vmem:[#allocation2 + $0x9] sm:$0xf] %vm347_vm2, %v342_v1  ;;  %350 = vst.msk [vmem:[#allocation2 + $0x19] sm:$0xf] %vm347_vm2, %v344_v2 }
  0x14   : > { %349 = vst.msk [vmem:[#allocation2 + $0x11] sm:$0xf] %vm347_vm2, %v343_v3  ;;  %387 = vrot.lane.b32.xlu0 %v8229_v4, %s8128_s15  ;;  %405 = vrot.lane.b32.xlu1 %v8229_v4, %s8129_s16  ;;  %351 = vst.msk [vmem:[#allocation2 + $0x21] sm:$0xf] %vm347_vm2, %v345_v6  ;;  %v354_v8 = vld [vmem:[%s320_s14 + $0x10] sm:$0x3f] }
  0x15   : > { %359 = vst.msk [vmem:[#allocation3 + $0x9] sm:$0x3f] %vm326_vm0, %v352_v5  ;;  %360 = vst.msk [vmem:[#allocation3 + $0x11] sm:$0x3f] %vm326_vm0, %v353_v7  ;;  %v356_v9 = vld [vmem:[%s320_s14 + $0x20] sm:$0x3f] }
  0x16   : > { %v355_v10 = vld [vmem:[%s320_s14 + $0x18] sm:$0x3f]  ;;  %361 = vst.msk [vmem:[#allocation3 + $0x19] sm:$0x3f] %vm326_vm0, %v354_v8  ;;  %363 = vst.msk [vmem:[#allocation3 + $0x29] sm:$0x3f] %vm326_vm0, %v356_v9 }
  0x17   : > { %362 = vst.msk [vmem:[#allocation3 + $0x21] sm:$0x3f] %vm326_vm0, %v355_v10  ;;  %v357_v11 = vld [vmem:[%s320_s14 + $0x28] sm:$0x3f]  ;;  %v8253_v15 = vand.u32 4294901760, %v975_v14  ;;  %v8271_v20 = vand.u32 4294901760, %v974_v16 }
  0x18   : > { %364 = vst.msk [vmem:[#allocation3 + $0x31] sm:$0x3f] %vm326_vm0, %v357_v11  ;;  %v973_v21 = vld [vmem:[%s11203_s4 + $0x40] sm:$0xff]  ;;  %v11219_v24 = vand.u32 4294901760, %v8261_v18  ;;  %v8320_v38 = vld [vmem:[#allocation3] sm:$0xff]  ;;  %v972_v40 = vld [vmem:[%s11203_s4 + $0x38] sm:$0xff] }
  0x19   : > { %v8269_v19 = vsub.f32 %v975_v14, %v8253_v15  ;;  %v8281_v25 = vand.u32 4294901760, %v973_v21  ;;  %v8286_v27 = vsub.f32 %v974_v16, %v8271_v20  ;;  %6763 = vmatpush3.msra.mxu0 %v8253_v15  ;;  %v8327_v41 = vand.u32 4294901760, %v972_v40  ;;  %v971_v43 = vld [vmem:[%s11203_s4 + $0x30] sm:$0xff]  ;;  %v970_v46 = vld [vmem:[%s11203_s4 + $0x28] sm:$0xff]  ;;  %v969_v50 = vld [vmem:[%s11203_s4 + $0x20] sm:$0xff]  ;;  %s8131_s24 = smov 96  }
  0x1a   : > { %v8258_v17 = vld [vmem:[#allocation2 + $0x8] sm:$0x3f]  ;;  %v8276_v22 = vld [vmem:[#allocation2 + $0x18] sm:$0x3f]  ;;  %v1158_v28 = vsub.f32 %v8261_v18, %v11219_v24  ;;  %6764 = vmatprep.subr.mxu0 %v11220_v0  ;;  %v8340_v45 = vand.u32 4294901760, %v971_v43  ;;  %v8351_v49 = vand.u32 4294901760, %v970_v46 }
  0x1b   : > { %407 = vrot.lane.b32.xlu1 %v8258_v17, %s8129_s16  ;;  %389 = vrot.lane.b32.xlu0 %v8258_v17, %s8128_s15  ;;  %v8278_v23 = vld [vmem:[#allocation2 + $0x10] sm:$0x3f]  ;;  %v11218_v26 = vand.u32 4294901760, %v8269_v19  ;;  %v8293_v29 = vsub.f32 %v973_v21, %v8281_v25  ;;  %v11217_v31 = vand.u32 4294901760, %v8286_v27  ;;  %v8338_v44 = vsub.f32 %v972_v40, %v8327_v41  ;;  %v8371_v55 = vld [vmem:[#allocation2 + $0x20] sm:$0x3f] }
  0x1c   : > { %v1159_v32 = vand.u32 4294901760, %v1158_v28  ;;  %6765 = vmatpush3.msra.mxu0 %v8271_v20  ;;  %v8318_v37 = vld [vmem:[#allocation3 + $0x8] sm:$0xff]  ;;  %v8349_v48 = vsub.f32 %v971_v43, %v8340_v45  ;;  %v8367_v53 = vsub.f32 %v970_v46, %v8351_v49  ;;  %v8369_v54 = vand.u32 4294901760, %v969_v50  ;;  %v967_v62 = vld [vmem:[%s11203_s4 + $0x10] sm:$0xff]  ;;  %v8402_v5 = vld [vmem:[#allocation3 + $0x10] sm:$0xff]  ;;  %s8132_s20 = smov 80  }
  0x1d   : > { %11250 = vst [vmem:[#allocation5_spill] sm:$0xff] %v8293_v29  ;;  %v1165_v30 = vsub.f32 %v8269_v19, %v11218_v26  ;;  %v11216_v33 = vand.u32 4294901760, %v8293_v29  ;;  %v1172_v35 = vsub.f32 %v8286_v27, %v11217_v31  ;;  %6766 = vmatprep.subr.mxu0 %v11220_v0  ;;  %11251 = vst [vmem:[#allocation6_spill] sm:$0xff] %v8338_v44  ;;  %v11215_v47 = vand.u32 4294901760, %v8338_v44  ;;  %v968_v56 = vld [vmem:[%s11203_s4 + $0x18] sm:$0xff]  ;;  %v8423_v12 = vld [vmem:[#allocation3 + $0x18] sm:$0xff] }
  0x1e   : > { %6806 = vmatpush3.msra.mxu1 %v1159_v32  ;;  %6767 = vmatpush3.msra.mxu0 %v8281_v25  ;;  %11252 = vst [vmem:[#allocation7_spill] sm:$0xff] %v8349_v48  ;;  %v11214_v52 = vand.u32 4294901760, %v8349_v48  ;;  %11253 = vst [vmem:[#allocation8_spill] sm:$0xff] %v8367_v53  ;;  %v11213_v59 = vand.u32 4294901760, %v8367_v53  ;;  %v8383_v60 = vsub.f32 %v969_v50, %v8369_v54  ;;  %v8386_v61 = vand.u32 4294901760, %v968_v56  ;;  %v965_v40 = vld [vmem:[%s11203_s4] sm:$0xff] }
  0x1f   : > { %393 = vrot.lane.b32.xlu1 %v8276_v22, %s8128_s15  ;;  %391 = vrot.lane.b32.xlu0 %v8278_v23, %s8128_s15  ;;  %v1166_v34 = vand.u32 4294901760, %v1165_v30  ;;  %v1179_v36 = vsub.f32 %v8293_v29, %v11216_v33  ;;  %v1173_v39 = vand.u32 4294901760, %v1172_v35  ;;  %v1186_v51 = vsub.f32 %v8338_v44, %v11215_v47  ;;  %11254 = vst [vmem:[#allocation9_spill] sm:$0xff] %v8369_v54  ;;  %v8425_v14 = vld [vmem:[#allocation2 + $0x28] sm:$0x3f]  ;;  %v8449_v35 = vld [vmem:[#allocation3 + $0x20] sm:$0xff] }
  0x20   : > { %6807 = vmatprep.subr.mxu1 %v11220_v0  ;;  %6768 = vmatprep.subr.mxu0 %v11220_v0  ;;  %v1193_v58 = vsub.f32 %v8349_v48, %v11214_v52  ;;  %11255 = vst [vmem:[#allocation10_spill] sm:$0xff] %v8383_v60  ;;  %11256 = vst [vmem:[#allocation11_spill] sm:$0xff] %v8386_v61  ;;  %v1200_v1 = vsub.f32 %v8367_v53, %v11213_v59  ;;  %v11212_v2 = vand.u32 4294901760, %v8383_v60  ;;  %vm946_vm5 = vcmask 781312   ;;  %s8133_s21 = smov 112   ;;  %s8134_s14 = smov 48  }
  0x21   : > { %6808 = vmatpush3.msra.mxu1 %v1166_v34  ;;  %v1180_v42 = vand.u32 4294901760, %v1179_v36  ;;  %6769 = vmatpush3.msra.mxu0 %v8327_v41  ;;  %v1187_v57 = vand.u32 4294901760, %v1186_v51  ;;  %v8400_v3 = vand.u32 4294901760, %v967_v62  ;;  %v8405_v6 = vsub.f32 %v968_v56, %v8386_v61  ;;  %v8447_v34 = vld [vmem:[#allocation3 + $0x28] sm:$0xff]  ;;  %v966_v36 = vld [vmem:[%s11203_s4 + $0x8] sm:$0xff] }
  0x22   : > { %6809 = vmatprep.subr.mxu1 %v11220_v0  ;;  %6770 = vmatprep.subr.mxu0 %v11220_v0  ;;  %v1194_v63 = vand.u32 4294901760, %v1193_v58  ;;  %v1201_v7 = vand.u32 4294901760, %v1200_v1  ;;  %v1207_v8 = vsub.f32 %v8383_v60, %v11212_v2  ;;  %v8474_v46 = vand.u32 4294901760, %v965_v40  ;;  %v8487_v56 = vld [vmem:[#allocation3 + $0x38] sm:$0xff] }
  0x23   : > { %411 = vrot.lane.b32.xlu1 %v8276_v22, %s8129_s16  ;;  %409 = vrot.lane.b32.xlu0 %v8278_v23, %s8129_s16  ;;  %11257 = vst [vmem:[#allocation12_spill] sm:$0xff] %v8400_v3  ;;  %11258 = vst [vmem:[#allocation13_spill] sm:$0xff] %v8405_v6  ;;  %v8413_v9 = vsub.f32 %v967_v62, %v8400_v3  ;;  %v11211_v10 = vand.u32 4294901760, %v8405_v6  ;;  %vm951_vm6 = vcmask 783360   ;;  %vm977_vm7 = vcmask 785408  }
  0x24   : > { %6810 = vmatpush3.msra.mxu1 %v1173_v39  ;;  %6771 = vmatpush3.msra.mxu0 %v8340_v45  ;;  %v1208_v16 = vand.u32 4294901760, %v1207_v8  ;;  %v8460_v39 = vand.u32 4294901760, %v966_v36  ;;  %11262 = vst [vmem:[#allocation17_spill] sm:$0xff] %v8474_v46  ;;  %v8480_v51 = vsub.f32 %v965_v40, %v8474_v46  ;;  %v8510_v8 = vld [vmem:[%s11201_s2] ss:$0 sm:$0xff]  ;;  %vm1881_vm8 = vcmask 130048  }
  0x25   : > { %6811 = vmatprep.subr.mxu1 %v11220_v0  ;;  %6772 = vmatprep.subr.mxu0 %v11220_v0  ;;  %11259 = vst [vmem:[#allocation14_spill] sm:$0xff] %v8413_v9  ;;  %v11210_v11 = vand.u32 4294901760, %v8413_v9  ;;  %v1214_v21 = vsub.f32 %v8405_v6, %v11211_v10  ;;  %vm2692_vm9 = vcmask 424960   ;;  %vm2711_vm10 = vcmask 420864  }
  0x26   : > { %6812 = vmatpush3.msra.mxu1 %v1180_v42  ;;  %6773 = vmatpush3.msra.mxu0 %v8351_v49  ;;  %11260 = vst [vmem:[#allocation15_spill] sm:$0xff] %v8460_v39  ;;  %v8469_v42 = vld [vmem:[#allocation3 + $0x30] sm:$0xff]  ;;  %v8472_v43 = vsub.f32 %v966_v36, %v8460_v39  ;;  %11263 = vst [vmem:[#allocation18_spill] sm:$0xff] %v8480_v51  ;;  %v11208_v58 = vand.u32 4294901760, %v8480_v51  ;;  %vm2812_vm11 = vcmask 1043456  }
  0x27   : > { %662 = vrot.lane.b32.xlu1 %v8318_v37, %s8128_s15  ;;  %660 = vrot.lane.b32.xlu0 %v8320_v38, %s8128_s15  ;;  %v1221_v28 = vsub.f32 %v8413_v9, %v11210_v11  ;;  %v1215_v30 = vand.u32 4294901760, %v1214_v21  ;;  %v8520_v21 = vld [vmem:[%s11201_s2 + $0x2] ss:$0 sm:$0xff] }
  0x28   : > { %6813 = vmatprep.subr.mxu1 %v11220_v0  ;;  %6774 = vmatprep.subr.mxu0 %v11220_v0  ;;  %11261 = vst [vmem:[#allocation16_spill] sm:$0xff] %v8472_v43  ;;  %v11209_v50 = vand.u32 4294901760, %v8472_v43 }
  0x29   : > { %6814 = vmatpush3.msra.mxu1 %v1187_v57  ;;  %6775 = vmatpush3.msra.mxu0 %v8369_v54  ;;  %v1222_v32 = vand.u32 4294901760, %v1221_v28 }
  0x2a   : > { %6815 = vmatprep.subr.mxu1 %v11220_v0  ;;  %6776 = vmatprep.subr.mxu0 %v11220_v0  ;;  %v1228_v57 = vsub.f32 %v8472_v43, %v11209_v50  ;;  %v8531_v50 = vld [vmem:[%s11201_s2 + $0x3] ss:$0 sm:$0xff] }
  0x2b   : > { %686 = vrot.lane.b32.xlu1 %v8318_v37, %s8129_s16  ;;  %684 = vrot.lane.b32.xlu0 %v8320_v38, %s8129_s16 }
  0x2c   : > { %6816 = vmatpush3.msra.mxu1 %v1194_v63  ;;  %6777 = vmatpush3.msra.mxu0 %v8386_v61  ;;  %v1229_v62 = vand.u32 4294901760, %v1228_v57  ;;  %v1235_v63 = vsub.f32 %v8480_v51, %v11208_v58 }
  0x2d   : > { %6817 = vmatprep.subr.mxu1 %v11220_v0  ;;  %6778 = vmatprep.subr.mxu0 %v11220_v0 }
  0x2e   : > { %6818 = vmatpush3.msra.mxu1 %v1201_v7  ;;  %6779 = vmatpush3.msra.mxu0 %v8400_v3  ;;  %v1236_v1 = vand.u32 4294901760, %v1235_v63 }
  0x2f   : > { %413 = vrot.lane.b32.xlu1 %v8371_v55, %s8129_s16  ;;  %395 = vrot.lane.b32.xlu0 %v8371_v55, %s8128_s15 }
  0x30   : > { %6819 = vmatprep.subr.mxu1 %v11220_v0  ;;  %6780 = vmatprep.subr.mxu0 %v11220_v0 }
  0x31   : > { %6820 = vmatpush3.msra.mxu1 %v1208_v16  ;;  %6781 = vmatpush3.msra.mxu0 %v8460_v39  ;;  %v8515_v16 = vld [vmem:[%s11201_s2 + $0x1] ss:$0 sm:$0xff] }
  0x32   : > { %6821 = vmatprep.subr.mxu1 %v11220_v0  ;;  %6782 = vmatprep.subr.mxu0 %v11220_v0 }
  0x33   : > { %688 = vrot.lane.b32.xlu1 %v8402_v5, %s8129_s16  ;;  %664 = vrot.lane.b32.xlu0 %v8402_v5, %s8128_s15 }
  0x34   : > { %6822 = vmatpush3.msra.mxu1 %v1215_v30  ;;  %6783 = vmatpush3.msra.mxu0 %v8474_v46 }
  0x35   : > { %6823 = vmatprep.subr.mxu1 %v11220_v0  ;;  %6850 = vmatprep.subr.mxu0 %v11220_v0 }
  0x36   : > { %6824 = vmatpush3.msra.mxu1 %v1222_v32 }
  0x37   : > { %666 = vrot.lane.b32.xlu1 %v8423_v12, %s8128_s15  ;;  %397 = vrot.lane.b32.xlu0 %v8425_v14, %s8128_s15 }
  0x38   : > { %6825 = vmatprep.subr.mxu1 %v11220_v0 }
  0x39   : > { %6826 = vmatpush3.msra.mxu1 %v1229_v62 }
  0x3a   : > { %6827 = vmatprep.subr.mxu1 %v11220_v0 }
  0x3b   : > { %690 = vrot.lane.b32.xlu1 %v8423_v12, %s8129_s16  ;;  %415 = vrot.lane.b32.xlu0 %v8425_v14, %s8129_s16 }
  0x3c   : > { %6828 = vmatpush3.msra.mxu1 %v1236_v1 }
  0x3d   : > { %6895 = vmatprep.subr.mxu1 %v11220_v0 }
  0x3f   : > { %670 = vrot.lane.b32.xlu1 %v8447_v34, %s8128_s15  ;;  %668 = vrot.lane.b32.xlu0 %v8449_v35, %s8128_s15 }
  0x43   : > { %694 = vrot.lane.b32.xlu1 %v8447_v34, %s8129_s16  ;;  %692 = vrot.lane.b32.xlu0 %v8449_v35, %s8129_s16 }
  0x47   : > { %672 = vrot.lane.b32.xlu0 %v8469_v42, %s8128_s15  ;;  %696 = vrot.lane.b32.xlu1 %v8469_v42, %s8129_s16 }
  0x4b   : > { %674 = vrot.lane.b32.xlu0 %v8487_v56, %s8128_s15  ;;  %698 = vrot.lane.b32.xlu1 %v8487_v56, %s8129_s16  ;;  %s8045_s15 = smul.u32 56, %s11296_s28 }
  0x4d   : > { %s11169_s9 = scalar_lea.vmem %s11207_s8, %s8045_s15 }
  0x86   : > { %v388_v7 = vpop.permute.xlu0 %387  ;;  %v406_v28 = vpop.permute.xlu1 %405 }
  0x87   : > { %v423_v30 = vsel %vm333_vm1, %v8229_v4, %v388_v7  ;;  %v8536_v4 = vld [vmem:[%s11201_s2 + $0x4] ss:$0 sm:$0xff] }
  0x88   : > { %v430_v32 = vsel %vm429_vm4, %v423_v30, %v406_v28  ;;  %v8543_v30 = vld [vmem:[%s11201_s2 + $0x5] ss:$0 sm:$0xff] }
  0x89   : > { %v442_v36 = vmul.f32 %v8510_v8, %v430_v32  ;;  %v456_v40 = vmul.f32 %v8515_v16, %v430_v32  ;;  %v482_v57 = vmul.f32 %v8520_v21, %v430_v32 }
  0x8b   : > { %v464_v62 = vrot.slane %v456_v40, 1  ;;  %v490_v63 = vrot.slane %v482_v57, 2 }
  0x8d   : > { %v472_v1 = vadd.f32 %v464_v62, %v442_v36  ;;  %v408_v58 = vpop.permute.xlu1 %407  ;;  %v390_v11 = vpop.permute.xlu0 %389 }
  0x8e   : > { %v424_v7 = vsel %vm333_vm1, %v8258_v17, %v390_v11 }
  0x8f   : > { %v498_v28 = vadd.f32 %v490_v63, %v472_v1  ;;  %v431_v32 = vsel %vm429_vm4, %v424_v7, %v408_v58  ;;  %v8555_v58 = vld [vmem:[%s11201_s2 + $0x7] ss:$0 sm:$0xff] }
  0x90   : > { %v457_v36 = vmul.f32 %v8515_v16, %v431_v32  ;;  %v508_v40 = vmul.f32 %v8531_v50, %v431_v32  ;;  %v483_v57 = vmul.f32 %v8520_v21, %v431_v32  ;;  %v522_v62 = vmul.f32 %v8536_v4, %v431_v32 }
  0x91   : > { %v394_v10 = vpop.permute.xlu1 %393  ;;  %v392_v2 = vpop.permute.xlu0 %391  ;;  %v443_v17 = vmul.f32 %v8510_v8, %v431_v32  ;;  %v548_v1 = vmul.f32 %v8543_v30, %v431_v32 }
  0x92   : > { %v465_v11 = vrot.slane %v457_v36, 1  ;;  %v512_v63 = vadd.f32 %v508_v40, %v498_v28  ;;  %v530_v59 = vrot.slane %v522_v62, 1  ;;  %v491_v7 = vrot.slane %v483_v57, 2  ;;  %v8564_v28 = vld [vmem:[%s11201_s2 + $0x8] ss:$0 sm:$0xff] }
  0x93   : > { %v426_v33 = vsel %vm333_vm1, %v8276_v22, %v394_v10  ;;  %v425_v31 = vsel %vm333_vm1, %v8278_v23, %v392_v2  ;;  %v556_v40 = vrot.slane %v548_v1, 2  ;;  %v8573_v22 = vld [vmem:[%s11201_s2 + $0x6] ss:$0 sm:$0xff] }
  0x94   : > { %v473_v52 = vadd.f32 %v465_v11, %v443_v17  ;;  %v538_v47 = vadd.f32 %v530_v59, %v512_v63 }
  0x95   : > { %v412_v32 = vpop.permute.xlu1 %411  ;;  %v410_v36 = vpop.permute.xlu0 %409 }
  0x96   : > { %v8567_v62 = vsel %vm429_vm4, %v426_v33, %v412_v32  ;;  %v432_v57 = vsel %vm429_vm4, %v425_v31, %v410_v36  ;;  %v499_v59 = vadd.f32 %v491_v7, %v473_v52  ;;  %v564_v2 = vadd.f32 %v556_v40, %v538_v47 }
  0x97   : > { %v8577_v23 = vmul.f32 %v8555_v58, %v8567_v62  ;;  %v8581_v10 = vmul.f32 %v8564_v28, %v8567_v62  ;;  %v458_v33 = vmul.f32 %v8515_v16, %v432_v57  ;;  %v484_v17 = vmul.f32 %v8520_v21, %v432_v57 }
  0x98   : > { %v510_v31 = vmul.f32 %v8531_v50, %v8567_v62  ;;  %v509_v52 = vmul.f32 %v8531_v50, %v432_v57  ;;  %v523_v11 = vmul.f32 %v8536_v4, %v432_v57  ;;  %v549_v63 = vmul.f32 %v8543_v30, %v432_v57 }
  0x99   : > { %v663_v1 = vpop.permute.xlu1 %662  ;;  %v661_v7 = vpop.permute.xlu0 %660  ;;  %v8592_v47 = vmul.f32 %v8573_v22, %v8567_v62  ;;  %v444_v36 = vmul.f32 %v8510_v8, %v432_v57  ;;  %v466_v40 = vrot.slane %v458_v33, 1  ;;  %v574_v0 = vmul.f32 %v8573_v22, %v432_v57 }
  0x9a   : > { %v513_v26 = vadd.f32 %v509_v52, %v499_v59  ;;  %v531_v24 = vrot.slane %v523_v11, 1  ;;  %v8598_v51 = vmul.f32 %v8555_v58, %v432_v57  ;;  %v492_v6 = vrot.slane %v484_v17, 2 }
  0x9b   : > { %v474_v9 = vadd.f32 %v466_v40, %v444_v36  ;;  %v8602_v46 = vmul.f32 %v8564_v28, %v432_v57  ;;  %v557_v39 = vrot.slane %v549_v63, 2  ;;  %v709_v32 = vsel %vm333_vm1, %v8318_v37, %v663_v1 }
  0x9c   : > { %v539_v60 = vadd.f32 %v531_v24, %v513_v26  ;;  %v708_v59 = vsel %vm333_vm1, %v8320_v38, %v661_v7  ;;  %v524_v17 = vmul.f32 %v8536_v4, %v8567_v62  ;;  %v8612_v57 = vadd.f32 %v574_v0, %v564_v2 }
  0x9d   : > { %v687_v33 = vpop.permute.xlu1 %686  ;;  %v685_v52 = vpop.permute.xlu0 %684  ;;  %v500_v43 = vadd.f32 %v492_v6, %v474_v9 }
  0x9e   : > { %v717_v11 = vsel %vm429_vm4, %v709_v32, %v687_v33  ;;  %v716_v53 = vsel %vm429_vm4, %v708_v59, %v685_v52  ;;  %v8617_v63 = vadd.f32 %v557_v39, %v539_v60  ;;  %v532_v59 = vrot.slane %v524_v17, 1 }
  0x9f   : > { %v737_v26 = vmul.f32 %v8515_v16, %v717_v11  ;;  %v767_v37 = vmul.f32 %v8520_v21, %v717_v11  ;;  %v725_v1 = vmul.f32 %v8510_v8, %v717_v11  ;;  %v808_v7 = vmul.f32 %v8536_v4, %v717_v11 }
  0xa0   : > { %v838_v9 = vmul.f32 %v8543_v30, %v717_v11  ;;  %v736_v0 = vmul.f32 %v8515_v16, %v716_v53  ;;  %v766_v2 = vmul.f32 %v8520_v21, %v716_v53  ;;  %v796_v40 = vmul.f32 %v8531_v50, %v717_v11 }
  0xa1   : > { %v749_v6 = vrot.slane %v737_v26, 1  ;;  %v414_v32 = vpop.permute.xlu1 %413  ;;  %v396_v36 = vpop.permute.xlu0 %395  ;;  %v724_v60 = vmul.f32 %v8510_v8, %v716_v53  ;;  %v514_v39 = vadd.f32 %v510_v31, %v500_v43  ;;  %v779_v33 = vrot.slane %v767_v37, 2 }
  0xa2   : > { %v820_v52 = vrot.slane %v808_v7, 1  ;;  %v748_v38 = vrot.slane %v736_v0, 1  ;;  %v550_v26 = vmul.f32 %v8543_v30, %v8567_v62  ;;  %v778_v3 = vrot.slane %v766_v2, 2 }
  0xa3   : > { %v761_v24 = vadd.f32 %v749_v6, %v725_v1  ;;  %v540_v48 = vadd.f32 %v532_v59, %v514_v39  ;;  %v427_v61 = vsel %vm333_vm1, %v8371_v55, %v396_v36  ;;  %v8636_v31 = vmul.f32 %v8515_v16, %v8567_v62 }
  0xa4   : > { %v760_v44 = vadd.f32 %v748_v38, %v724_v60  ;;  %v558_v54 = vrot.slane %v550_v26, 2  ;;  %v8632_v11 = vsel %vm429_vm4, %v427_v61, %v414_v32  ;;  %v850_v17 = vrot.slane %v838_v9, 2 }
  0xa5   : > { %v689_v53 = vpop.permute.xlu1 %688  ;;  %v665_v43 = vpop.permute.xlu0 %664  ;;  %v576_v37 = vmul.f32 %v8573_v22, %v8632_v11  ;;  %v590_v1 = vmul.f32 %v8555_v58, %v8632_v11  ;;  %v616_v55 = vmul.f32 %v8564_v28, %v8632_v11  ;;  %v8648_v6 = vmul.f32 %v8510_v8, %v8567_v62 }
  0xa6   : > { %v790_v38 = vadd.f32 %v778_v3, %v760_v44  ;;  %v566_v7 = vadd.f32 %v558_v54, %v540_v48  ;;  %v710_v61 = vsel %vm333_vm1, %v8402_v5, %v665_v43  ;;  %v791_v0 = vadd.f32 %v779_v33, %v761_v24 }
  0xa7   : > { %v8652_v9 = vmul.f32 %v8531_v50, %v8632_v11  ;;  %v598_v2 = vrot.slane %v590_v1, 1  ;;  %v718_v32 = vsel %vm429_vm4, %v710_v61, %v689_v53  ;;  %v467_v3 = vrot.slane %v8636_v31, 1 }
  0xa8   : > { %v802_v36 = vadd.f32 %v796_v40, %v790_v38  ;;  %v580_v60 = vadd.f32 %v576_v37, %v566_v7  ;;  %v738_v44 = vmul.f32 %v8515_v16, %v718_v32  ;;  %v624_v5 = vrot.slane %v616_v55, 2 }
  0xa9   : > { %v667_v48 = vpop.permute.xlu1 %666  ;;  %v398_v54 = vpop.permute.xlu0 %397  ;;  %v768_v39 = vmul.f32 %v8520_v21, %v718_v32  ;;  %v797_v24 = vmul.f32 %v8531_v50, %v718_v32  ;;  %v809_v59 = vmul.f32 %v8536_v4, %v718_v32  ;;  %v726_v53 = vmul.f32 %v8510_v8, %v718_v32 }
  0xaa   : > { %v832_v33 = vadd.f32 %v820_v52, %v802_v36  ;;  %v606_v26 = vadd.f32 %v598_v2, %v580_v60  ;;  %v750_v43 = vrot.slane %v738_v44, 1  ;;  %v839_v1 = vmul.f32 %v8543_v30, %v718_v32  ;;  %v8667_v52 = vld [vmem:[%s11202_s3] ss:$0 sm:$0xff] }
  0xab   : > { %v803_v40 = vadd.f32 %v797_v24, %v791_v0  ;;  %v821_v37 = vrot.slane %v809_v59, 1  ;;  %v868_v38 = vmul.f32 %v8573_v22, %v718_v32  ;;  %v880_v61 = vmul.f32 %v8555_v58, %v718_v32 }
  0xac   : > { %v862_v31 = vadd.f32 %v850_v17, %v832_v33  ;;  %v632_v55 = vadd.f32 %v624_v5, %v606_v26  ;;  %v762_v7 = vadd.f32 %v750_v43, %v726_v53  ;;  %v780_v2 = vrot.slane %v768_v39, 2 }
  0xad   : > { %v691_v29 = vpop.permute.xlu1 %690  ;;  %v833_v36 = vadd.f32 %v821_v37, %v803_v40  ;;  %v910_v0 = vmul.f32 %v8564_v28, %v718_v32  ;;  %v711_v60 = vsel %vm333_vm1, %v8423_v12, %v667_v48  ;;  %v416_v44 = vpop.permute.xlu0 %415  ;;  %v892_v24 = vrot.slane %v880_v61, 1 }
  0xae   : > { %v642_v17 = vadd.f32 %v8667_v52, %v632_v55  ;;  %v874_v5 = vadd.f32 %v868_v38, %v862_v31  ;;  %v719_v59 = vsel %vm429_vm4, %v711_v60, %v691_v29  ;;  %v851_v33 = vrot.slane %v839_v1, 2 }
  0xaf   : > { %v922_v26 = vrot.slane %v910_v0, 2  ;;  %v739_v53 = vmul.f32 %v8515_v16, %v719_v59  ;;  %v769_v43 = vmul.f32 %v8520_v21, %v719_v59  ;;  %v792_v40 = vadd.f32 %v780_v2, %v762_v7 }
  0xb0   : > { %v904_v39 = vadd.f32 %v892_v24, %v874_v5  ;;  %v798_v32 = vmul.f32 %v8531_v50, %v719_v59  ;;  %v810_v37 = vmul.f32 %v8536_v4, %v719_v59  ;;  %949 = vst.msk [vmem:[#allocation4 + $0x8] sm:$0xf] %vm946_vm5, %v642_v17  ;;  %v840_v48 = vmul.f32 %v8543_v30, %v719_v59 }
  0xb1   : > { %v751_v12 = vrot.slane %v739_v53, 1  ;;  %v863_v38 = vadd.f32 %v851_v33, %v833_v36  ;;  %v485_v29 = vmul.f32 %v8520_v21, %v8567_v62  ;;  %v428_v31 = vsel %vm333_vm1, %v8425_v14, %v398_v54  ;;  %v671_v17 = vpop.permute.xlu1 %670  ;;  %v669_v5 = vpop.permute.xlu0 %668 }
  0xb2   : > { %v934_v1 = vadd.f32 %v922_v26, %v904_v39  ;;  %v727_v55 = vmul.f32 %v8510_v8, %v719_v59  ;;  %v869_v7 = vmul.f32 %v8573_v22, %v719_v59  ;;  %v781_v61 = vrot.slane %v769_v43, 2 }
  0xb3   : > { %v804_v2 = vadd.f32 %v798_v32, %v792_v40  ;;  %v881_v0 = vmul.f32 %v8555_v58, %v719_v59  ;;  %v911_v60 = vmul.f32 %v8564_v28, %v719_v59  ;;  %v822_v24 = vrot.slane %v810_v37, 1 }
  0xb4   : > { %v940_v36 = vadd.f32 %v8667_v52, %v934_v1  ;;  %v875_v62 = vadd.f32 %v869_v7, %v863_v38  ;;  %v475_v33 = vadd.f32 %v467_v3, %v8648_v6  ;;  %v763_v26 = vadd.f32 %v751_v12, %v727_v55 }
  0xb5   : > { %v852_v14 = vrot.slane %v840_v48, 2  ;;  %v893_v54 = vrot.slane %v881_v0, 1  ;;  %v493_v53 = vrot.slane %v485_v29, 2  ;;  %v923_v39 = vrot.slane %v911_v60, 2  ;;  %v695_v60 = vpop.permute.xlu1 %694 }
  0xb6   : > { %v525_v43 = vmul.f32 %v8536_v4, %v8632_v11  ;;  %v551_v40 = vmul.f32 %v8543_v30, %v8632_v11  ;;  %v579_v59 = vadd.f32 %v8592_v47, %v8617_v63  ;;  %952 = vst.msk [vmem:[#allocation4 + $0x10] sm:$0x3f] %vm951_vm6, %v940_v36  ;;  %v11264_v6 = vrot.slane %v8598_v51, 1  ;;  %v693_v36 = vpop.permute.xlu0 %692 }
  0xb7   : > { %v905_v32 = vadd.f32 %v893_v54, %v875_v62  ;;  %v501_v37 = vadd.f32 %v493_v53, %v475_v33  ;;  %v435_v12 = vsel %vm429_vm4, %v428_v31, %v416_v44  ;;  %v834_v48 = vadd.f32 %v822_v24, %v804_v2 }
  0xb8   : > { %v604_v3 = vadd.f32 %v11264_v6, %v8612_v57  ;;  %v533_v38 = vrot.slane %v525_v43, 1  ;;  %v559_v29 = vrot.slane %v551_v40, 2  ;;  %v11265_v1 = vrot.slane %v8577_v23, 1 }
  0xb9   : > { %v935_v11 = vadd.f32 %v923_v39, %v905_v32  ;;  %v515_v7 = vadd.f32 %v8652_v9, %v501_v37  ;;  %v11266_v47 = vrot.slane %v8602_v46, 2  ;;  %v591_v0 = vmul.f32 %v8555_v58, %v435_v12 }
  0xba   : > { %v605_v55 = vadd.f32 %v11265_v1, %v579_v59  ;;  %v11267_v51 = vrot.slane %v8581_v10, 2  ;;  %v577_v44 = vmul.f32 %v8573_v22, %v435_v12  ;;  %v617_v31 = vmul.f32 %v8564_v28, %v435_v12  ;;  %v673_v59 = vpop.permute.xlu0 %672 }
  0xbb   : > { %v630_v63 = vadd.f32 %v11266_v47, %v604_v3  ;;  %v713_v23 = vsel %vm333_vm1, %v8447_v34, %v671_v17  ;;  %v941_v2 = vadd.f32 %v8667_v52, %v935_v11  ;;  %v541_v9 = vadd.f32 %v533_v38, %v515_v7 }
  0xbc   : > { %v631_v57 = vadd.f32 %v11267_v51, %v605_v55  ;;  %v712_v24 = vsel %vm333_vm1, %v8449_v35, %v669_v5  ;;  %v8719_v10 = vsel %vm429_vm4, %v713_v23, %v695_v60  ;;  %v793_v54 = vadd.f32 %v781_v61, %v763_v26 }
  0xbd   : > { %v640_v46 = vadd.f32 %v8667_v52, %v630_v63  ;;  %v720_v33 = vsel %vm429_vm4, %v712_v24, %v693_v36  ;;  %v864_v53 = vadd.f32 %v852_v14, %v834_v48  ;;  %v567_v39 = vadd.f32 %v559_v29, %v541_v9  ;;  %953 = vst.msk [vmem:[#allocation4 + $0x16] sm:$0x3f] %vm951_vm6, %v941_v2  ;;  %v697_v36 = vpop.permute.xlu1 %696 }
  0xbe   : > { %v641_v62 = vadd.f32 %v8667_v52, %v631_v57  ;;  %v599_v34 = vrot.slane %v591_v0, 1  ;;  %v625_v17 = vrot.slane %v617_v31, 2  ;;  %v871_v35 = vmul.f32 %v8573_v22, %v8719_v10 }
  0xbf   : > { %947 = vst.msk [vmem:[#allocation4] sm:$0xf] %vm946_vm5, %v640_v46  ;;  %v740_v5 = vmul.f32 %v8515_v16, %v720_v33  ;;  %v799_v43 = vmul.f32 %v8531_v50, %v720_v33  ;;  %v581_v40 = vadd.f32 %v577_v44, %v567_v39  ;;  %v883_v61 = vmul.f32 %v8555_v58, %v8719_v10 }
  0xc0   : > { %948 = vst.msk [vmem:[#allocation4 + $0x4] sm:$0xf] %vm946_vm5, %v641_v62  ;;  %v913_v26 = vmul.f32 %v8564_v28, %v8719_v10  ;;  %v811_v14 = vmul.f32 %v8536_v4, %v720_v33  ;;  %v770_v37 = vmul.f32 %v8520_v21, %v720_v33  ;;  %v841_v3 = vmul.f32 %v8543_v30, %v720_v33 }
  0xc1   : > { %v752_v32 = vrot.slane %v740_v5, 1  ;;  %v805_v6 = vadd.f32 %v799_v43, %v793_v54  ;;  %v607_v12 = vadd.f32 %v599_v34, %v581_v40  ;;  %v870_v38 = vmul.f32 %v8573_v22, %v720_v33 }
  0xc2   : > { %v823_v48 = vrot.slane %v811_v14, 1  ;;  %v882_v29 = vmul.f32 %v8555_v58, %v720_v33  ;;  %v728_v1 = vmul.f32 %v8510_v8, %v720_v33  ;;  %v853_v55 = vrot.slane %v841_v3, 2 }
  0xc3   : > { %v912_v11 = vmul.f32 %v8564_v28, %v720_v33  ;;  %v714_v7 = vsel %vm333_vm1, %v8469_v42, %v673_v59  ;;  %v633_v47 = vadd.f32 %v625_v17, %v607_v12  ;;  %v876_v0 = vadd.f32 %v870_v38, %v864_v53 }
  0xc4   : > { %v835_v63 = vadd.f32 %v823_v48, %v805_v6  ;;  %v894_v60 = vrot.slane %v882_v29, 1  ;;  %v895_v51 = vrot.slane %v883_v61, 1  ;;  %v782_v57 = vrot.slane %v770_v37, 2 }
  0xc5   : > { %v924_v44 = vrot.slane %v912_v11, 2  ;;  %v812_v31 = vmul.f32 %v8536_v4, %v8719_v10  ;;  %v643_v23 = vadd.f32 %v8667_v52, %v633_v47  ;;  %v764_v24 = vadd.f32 %v752_v32, %v728_v1  ;;  %v675_v32 = vpop.permute.xlu0 %674  ;;  %v699_v11 = vpop.permute.xlu1 %698 }
  0xc6   : > { %v865_v9 = vadd.f32 %v853_v55, %v835_v63  ;;  %v906_v46 = vadd.f32 %v894_v60, %v876_v0  ;;  %v800_v42 = vmul.f32 %v8531_v50, %v8719_v10  ;;  %v842_v33 = vmul.f32 %v8543_v30, %v8719_v10  ;;  %v960_v0 = vld [vmem:[#allocation4 + $0x10] sm:$0xff] }
  0xc7   : > { %v958_v2 = vld [vmem:[#allocation4] sm:$0xff]  ;;  %v722_v54 = vsel %vm429_vm4, %v714_v7, %v697_v36  ;;  %950 = vst.msk [vmem:[#allocation4 + $0xc] sm:$0xf] %vm946_vm5, %v643_v23  ;;  %v794_v17 = vadd.f32 %v782_v57, %v764_v24  ;;  %v925_v5 = vrot.slane %v913_v26, 2  ;;  %v824_v43 = vrot.slane %v812_v31, 1 }
  0xc8   : > { %v979_v62 = vsel %vm977_vm7, %v958_v2, 0  ;;  %v877_v39 = vadd.f32 %v871_v35, %v865_v9  ;;  %v936_v34 = vadd.f32 %v924_v44, %v906_v46  ;;  %v854_v37 = vrot.slane %v842_v33, 2 }
  0xc9   : > { %v8752_v53 = vand.u32 4294901760, %v979_v62  ;;  %v806_v59 = vadd.f32 %v800_v42, %v794_v17  ;;  %v884_v6 = vmul.f32 %v8555_v58, %v722_v54  ;;  %v11268_v3 = vmov 0.0  }
  0xca   : > { %v907_v40 = vadd.f32 %v895_v51, %v877_v39  ;;  %v942_v61 = vadd.f32 %v8667_v52, %v936_v34  ;;  %v801_v12 = vmul.f32 %v8531_v50, %v722_v54  ;;  %v872_v38 = vmul.f32 %v8573_v22, %v722_v54 }
  0xcb   : > { %6830 = vmatmul.mubr.f32.vlgmr.msra.gmra.mxu1 %v8752_v53  ;;  %v8757_v14 = vsub.f32 %v979_v62, %v8752_v53  ;;  %v836_v48 = vadd.f32 %v824_v43, %v806_v59  ;;  %v715_v29 = vsel %vm333_vm1, %v8487_v56, %v675_v32  ;;  %v741_v1 = vmul.f32 %v8515_v16, %v8719_v10 }
  0xcc   : > { %6832 = vmatprep.mubr.msk.f32.mxu1 %vm8130_vm3, %v11268_v3  ;;  %6896 = vmatpush3.msra.mxu1 %v8248_v13  ;;  %v937_v35 = vadd.f32 %v925_v5, %v907_v40  ;;  %954 = vst.msk [vmem:[#allocation4 + $0x1c] sm:$0x3f] %vm951_vm6, %v942_v61  ;;  %v771_v55 = vmul.f32 %v8520_v21, %v8719_v10  ;;  %v896_v16 = vrot.slane %v884_v6, 1 }
  0xcd   : > { %v1078_v26 = vand.u32 4294901760, %v8757_v14  ;;  %6897 = vmatprep.subr.mxu1 %v11268_v3  ;;  %v866_v47 = vadd.f32 %v854_v37, %v836_v48  ;;  %v914_v63 = vmul.f32 %v8564_v28, %v722_v54  ;;  %v813_v56 = vmul.f32 %v8536_v4, %v722_v54 }
  0xce   : > { %6898 = vmatpush3.msra.mxu1 %v8253_v15  ;;  %v943_v50 = vadd.f32 %v8667_v52, %v937_v35  ;;  %v729_v21 = vmul.f32 %v8510_v8, %v8719_v10  ;;  %v753_v60 = vrot.slane %v741_v1, 1  ;;  %v959_v36 = vld [vmem:[#allocation4 + $0x8] sm:$0xff]  ;;  %v723_v44 = vsel %vm429_vm4, %v715_v29, %v699_v11 }
  0xcf   : > { %v1079_v7 = vsub.f32 %v8757_v14, %v1078_v26  ;;  %6899 = vmatprep.subr.mxu1 %v11268_v3  ;;  %v878_v57 = vadd.f32 %v872_v38, %v866_v47  ;;  %v982_v31 = vsel %vm977_vm7, %v959_v36, 0  ;;  %v783_v4 = vrot.slane %v771_v55, 2 }
  0xd0   : > { %6900 = vmatpush3.msra.mxu1 %v8271_v20  ;;  %955 = vst.msk [vmem:[#allocation4 + $0x22] sm:$0x3f] %vm951_vm6, %v943_v50  ;;  %v765_v23 = vadd.f32 %v753_v60, %v729_v21  ;;  %v8789_v2 = vand.u32 4294901760, %v982_v31  ;;  %v985_v8 = vsel %vm977_vm7, %v960_v0, 0  ;;  %v926_v9 = vrot.slane %v914_v63, 2  ;;  %v11270_v60 = vld [vmem:[#allocation9_spill] sm:$0xff] }
  0xd1   : > { %v1080_v51 = vand.u32 4294901760, %v1079_v7  ;;  %6901 = vmatprep.subr.mxu1 %v11268_v3  ;;  %v908_v10 = vadd.f32 %v896_v16, %v878_v57  ;;  %v8793_v46 = vand.u32 4294901760, %v985_v8  ;;  %v825_v24 = vrot.slane %v813_v56, 1  ;;  %v11269_v16 = vld [vmem:[#allocation5_spill] sm:$0xff] }
  0xd2   : > { %6902 = vmatpush3.msra.mxu1 %v8281_v25  ;;  %v795_v62 = vadd.f32 %v783_v4, %v765_v23  ;;  %v843_v42 = vmul.f32 %v8543_v30, %v722_v54  ;;  %v8801_v33 = vsub.f32 %v982_v31, %v8789_v2  ;;  %v885_v17 = vmul.f32 %v8555_v58, %v723_v44  ;;  %v11271_v31 = vld [vmem:[#allocation6_spill] sm:$0xff]  ;;  %v11272_v23 = vld [vmem:[#allocation11_spill] sm:$0xff] }
  0xd3   : > { %6785 = vmatmul.mubr.f32.vlgmr.msra.gmra.mxu0 %v1080_v51  ;;  %6903 = vmatprep.subr.mxu1 %v11268_v3  ;;  %v961_v39 = vld [vmem:[#allocation4 + $0x18] sm:$0xff]  ;;  %v938_v34 = vadd.f32 %v926_v9, %v908_v10  ;;  %v8809_v30 = vsub.f32 %v985_v8, %v8793_v46  ;;  %v873_v61 = vmul.f32 %v8573_v22, %v723_v44  ;;  %v11273_v8 = vld [vmem:[#allocation7_spill] sm:$0xff]  ;;  %v11275_v10 = vld [vmem:[#allocation8_spill] sm:$0xff] }
  0xd4   : > { %6833 = vmatmul.mubr.f32.gmra.mxu1 %v8789_v2  ;;  %6787 = vmatprep.mubr.msk.f32.mxu0 %vm8130_vm3, %v11268_v3  ;;  %v988_v5 = vsel %vm977_vm7, %v961_v39, 0  ;;  %v807_v54 = vadd.f32 %v801_v12, %v795_v62  ;;  %v1088_v43 = vand.u32 4294901760, %v8801_v33  ;;  %v855_v37 = vrot.slane %v843_v42, 2  ;;  %v11276_v9 = vld [vmem:[#allocation15_spill] sm:$0xff]  ;;  %v11278_v39 = vld [vmem:[#allocation17_spill] sm:$0xff] }
  0xd5   : > { %6835 = vmatprep.mubr.msk.f32.mxu1 %vm8130_vm3, %v11268_v3  ;;  %6851 = vmatpush3.msra.mxu0 %v8261_v18  ;;  %v8812_v40 = vand.u32 4294901760, %v988_v5  ;;  %v944_v58 = vadd.f32 %v8667_v52, %v938_v34  ;;  %v1098_v59 = vand.u32 4294901760, %v8809_v30  ;;  %v897_v22 = vrot.slane %v885_v17, 1 }
  0xd6   : > { %6852 = vmatprep.subr.mxu0 %v11268_v3  ;;  %6904 = vmatpush3.msra.mxu1 %v8327_v41  ;;  %v837_v32 = vadd.f32 %v825_v24, %v807_v54  ;;  %v1089_v6 = vsub.f32 %v8801_v33, %v1088_v43  ;;  %v915_v48 = vmul.f32 %v8564_v28, %v723_v44  ;;  %v11277_v24 = vld [vmem:[#allocation10_spill] sm:$0xff] }
  0xd7   : > { %6853 = vmatpush3.msra.mxu0 %v8269_v19  ;;  %6905 = vmatprep.subr.mxu1 %v11268_v3  ;;  %v962_v35 = vld [vmem:[#allocation4 + $0x20] sm:$0xff]  ;;  %v8827_v12 = vsub.f32 %v988_v5, %v8812_v40  ;;  %956 = vst.msk [vmem:[#allocation4 + $0x28] sm:$0x3f] %vm951_vm6, %v944_v58  ;;  %v1099_v38 = vsub.f32 %v8809_v30, %v1098_v59  ;;  %v11279_v5 = vld [vmem:[#allocation13_spill] sm:$0xff] }
  0xd8   : > { %6836 = vmatmul.mubr.f32.gmra.mxu1 %v8793_v46  ;;  %6854 = vmatprep.subr.mxu0 %v11268_v3  ;;  %v991_v29 = vsel %vm977_vm7, %v962_v35, 0  ;;  %v867_v1 = vadd.f32 %v855_v37, %v837_v32  ;;  %v1090_v55 = vand.u32 4294901760, %v1089_v6  ;;  %v927_v0 = vrot.slane %v915_v48, 2  ;;  %v11281_v6 = vld [vmem:[#allocation16_spill] sm:$0xff]  ;;  %v11282_v48 = vld [vmem:[#allocation18_spill] sm:$0xff] }
  0xd9   : > { %6838 = vmatprep.mubr.msk.f32.mxu1 %vm8130_vm3, %v11268_v3  ;;  %6906 = vmatpush3.msra.mxu1 %v8340_v45  ;;  %v8838_v11 = vand.u32 4294901760, %v991_v29  ;;  %v1108_v50 = vand.u32 4294901760, %v8827_v12  ;;  %v1100_v56 = vand.u32 4294901760, %v1099_v38 }
  0xda   : > { %6855 = vmatpush3.msra.mxu0 %v8286_v27  ;;  %6907 = vmatprep.subr.mxu1 %v11268_v3  ;;  %v879_v28 = vadd.f32 %v873_v61, %v867_v1  ;;  %v11280_v61 = vld [vmem:[#allocation14_spill] sm:$0xff] }
  0xdb   : > { %6856 = vmatprep.subr.mxu0 %v11268_v3  ;;  %6908 = vmatpush3.msra.mxu1 %v8351_v49  ;;  %v1109_v7 = vsub.f32 %v8827_v12, %v1108_v50  ;;  %v8850_v47 = vsub.f32 %v991_v29, %v8838_v11 }
  0xdc   : > { %6788 = vmatmul.mubr.f32.gmra.mxu0 %v1090_v55  ;;  %6839 = vmatmul.mubr.f32.gmra.mxu1 %v8812_v40  ;;  %v909_v63 = vadd.f32 %v897_v22, %v879_v28 }
  0xdd   : > { %6790 = vmatprep.mubr.msk.f32.mxu0 %vm8130_vm3, %v11268_v3  ;;  %6841 = vmatprep.mubr.msk.f32.mxu1 %vm8130_vm3, %v11268_v3  ;;  %v1118_v21 = vand.u32 4294901760, %v8850_v47  ;;  %v1110_v51 = vand.u32 4294901760, %v1109_v7 }
  0xde   : > { %6857 = vmatpush3.msra.mxu0 %v11269_v16  ;;  %6909 = vmatprep.subr.mxu1 %v11268_v3  ;;  %v939_v36 = vadd.f32 %v927_v0, %v909_v63 }
  0xdf   : > { %6910 = vmatpush3.msra.mxu1 %v11270_v60  ;;  %6858 = vmatprep.subr.mxu0 %v11268_v3  ;;  %v1119_v57 = vsub.f32 %v8850_v47, %v1118_v21 }
  0xe0   : > { %6791 = vmatmul.mubr.f32.gmra.mxu0 %v1100_v56  ;;  %6842 = vmatmul.mubr.f32.gmra.mxu1 %v8838_v11  ;;  %v945_v44 = vadd.f32 %v8667_v52, %v939_v36  ;;  %v11274_v52 = vld [vmem:[#allocation12_spill] sm:$0xff] }
  0xe1   : > { %6793 = vmatprep.mubr.msk.f32.mxu0 %vm8130_vm3, %v11268_v3  ;;  %6844 = vmatprep.mubr.msk.f32.mxu1 %vm8130_vm3, %v11268_v3  ;;  %v1120_v4 = vand.u32 4294901760, %v1119_v57 }
  0xe2   : > { %6911 = vmatprep.subr.mxu1 %v11268_v3  ;;  %6859 = vmatpush3.msra.mxu0 %v11271_v31  ;;  %957 = vst.msk [vmem:[#allocation4 + $0x2e] sm:$0x3f] %vm951_vm6, %v945_v44 }
  0xe3   : > { %6912 = vmatpush3.msra.mxu1 %v11272_v23  ;;  %6860 = vmatprep.subr.mxu0 %v11268_v3 }
  0xe4   : > { %6794 = vmatmul.mubr.f32.gmra.mxu0 %v1110_v51  ;;  %6913 = vmatprep.subr.mxu1 %v11268_v3 }
  0xe5   : > { %6796 = vmatprep.mubr.msk.f32.mxu0 %vm8130_vm3, %v11268_v3  ;;  %6861 = vmatpush3.msra.mxu0 %v11273_v8 }
  0xe6   : > { %6914 = vmatpush3.msra.mxu1 %v11274_v52  ;;  %6862 = vmatprep.subr.mxu0 %v11268_v3 }
  0xe7   : > { %6915 = vmatprep.subr.mxu1 %v11268_v3  ;;  %6863 = vmatpush3.msra.mxu0 %v11275_v10 }
  0xe8   : > { %6797 = vmatmul.mubr.f32.gmra.mxu0 %v1120_v4  ;;  %6916 = vmatpush3.msra.mxu1 %v11276_v9 }
  0xe9   : > { %6864 = vmatprep.subr.mxu0 %v11268_v3  ;;  %6917 = vmatprep.subr.mxu1 %v11268_v3  ;;  %v963_v62 = vld [vmem:[#allocation4 + $0x28] sm:$0xff]  ;;  %v964_v42 = vld [vmem:[#allocation4 + $0x30] sm:$0xf] }
  0xea   : > { %6799 = vmatprep.mubr.msk.f32.mxu0 %vm8130_vm3, %v11268_v3  ;;  %6865 = vmatpush3.msra.mxu0 %v11277_v24  ;;  %v994_v34 = vsel %vm977_vm7, %v963_v62, 0  ;;  %v997_v17 = vsel %vm977_vm7, %v964_v42, 0 }
  0xeb   : > { %6918 = vmatpush3.msra.mxu1 %v11278_v39  ;;  %6866 = vmatprep.subr.mxu0 %v11268_v3  ;;  %v8895_v54 = vand.u32 4294901760, %v994_v34  ;;  %v8897_v58 = vand.u32 4294901760, %v997_v17 }
  0xec   : > { %6867 = vmatpush3.msra.mxu0 %v11279_v5  ;;  %6985 = vmatprep.subr.mxu1 %v11268_v3 }
  0xed   : > { %6868 = vmatprep.subr.mxu0 %v11268_v3  ;;  %6845 = vmatmul.mubr.f32.gmra.mxu1 %v8895_v54  ;;  %v8903_v32 = vsub.f32 %v994_v34, %v8895_v54  ;;  %v8906_v37 = vsub.f32 %v997_v17, %v8897_v58 }
  0xee   : > { %6869 = vmatpush3.msra.mxu0 %v11280_v61  ;;  %6847 = vmatprep.mubr.msk.f32.mxu1 %vm8130_vm3, %v11268_v3 }
  0xef   : > { %6870 = vmatprep.subr.mxu0 %v11268_v3  ;;  %v1128_v35 = vand.u32 4294901760, %v8903_v32  ;;  %v1138_v22 = vand.u32 4294901760, %v8906_v37 }
  0xf0   : > { %6871 = vmatpush3.msra.mxu0 %v11281_v6 }
  0xf1   : > { %6872 = vmatprep.subr.mxu0 %v11268_v3  ;;  %6848 = vmatmul.mubr.f32.gmra.mxu1 %v8897_v58  ;;  %v1129_v38 = vsub.f32 %v8903_v32, %v1128_v35  ;;  %v1139_v1 = vsub.f32 %v8906_v37, %v1138_v22 }
  0xf2   : > { %6873 = vmatpush3.msra.mxu0 %v11282_v48  ;;  %6919 = vmatprep.mubr.msk.f32.mxu1 %vm8130_vm3, %v11268_v3 }
  0xf3   : > { %6940 = vmatprep.subr.mxu0 %v11268_v3  ;;  %v1130_v29 = vand.u32 4294901760, %v1129_v38  ;;  %v1140_v55 = vand.u32 4294901760, %v1139_v1 }
  0xf5   : > { %6800 = vmatmul.mubr.f32.gmra.mxu0 %v1130_v29  ;;  %6920 = vmatmul.mubr.f32.vlgmr.msra.gmra.mxu1 %v1078_v26  ;;  %v11294_v26 = vand.u32 4294901760, %v11282_v48 }
  0xf6   : > { %6802 = vmatprep.mubr.msk.f32.mxu0 %vm8130_vm3, %v11268_v3  ;;  %6922 = vmatprep.mubr.msk.f32.mxu1 %vm8130_vm3, %v11268_v3 }
  0xf7   : > { %6986 = vmatpush3.msra.mxu1 %v8248_v13  ;;  %v11283_v13 = vand.u32 4294901760, %v8261_v18  ;;  %v11285_v18 = vand.u32 4294901760, %v8286_v27  ;;  %v11289_v27 = vand.u32 4294901760, %v11275_v10 }
  0xf8   : > { %6987 = vmatprep.subr.mxu1 %v11268_v3 }
  0xf9   : > { %6803 = vmatmul.mubr.f32.gmra.mxu0 %v1140_v55  ;;  %6923 = vmatmul.mubr.f32.gmra.mxu1 %v1088_v43 }
  0xfa   : > { %6874 = vmatprep.mubr.msk.f32.mxu0 %vm8130_vm3, %v11268_v3  ;;  %6925 = vmatprep.mubr.msk.f32.mxu1 %vm8130_vm3, %v11268_v3 }
  0xfb   : > { %6988 = vmatpush3.msra.mxu1 %v8253_v15  ;;  %v11284_v15 = vand.u32 4294901760, %v8269_v19  ;;  %v11286_v19 = vand.u32 4294901760, %v11269_v16 }
  0xfc   : > { %6989 = vmatprep.subr.mxu1 %v11268_v3 }
  0xfd   : > { %6875 = vmatmul.mubr.f32.vlgmr.msra.gmra.mxu0 %v8757_v14  ;;  %6926 = vmatmul.mubr.f32.gmra.mxu1 %v1098_v59  ;;  %v11293_v14 = vand.u32 4294901760, %v11281_v6 }
  0xfe   : > { %6990 = vmatpush3.msra.mxu1 %v8271_v20  ;;  %6877 = vmatprep.mubr.msk.f32.mxu0 %vm8130_vm3, %v11268_v3  ;;  %v11287_v20 = vand.u32 4294901760, %v11271_v31 }
  0xff   : > { %6991 = vmatprep.subr.mxu1 %v11268_v3  ;;  %6928 = vmatprep.mubr.msk.f32.mxu1 %vm8130_vm3, %v11268_v3 }
 0x100   : > { %6941 = vmatpush3.msra.mxu0 %v11283_v13  ;;  %6992 = vmatpush3.msra.mxu1 %v8281_v25  ;;  %v11288_v25 = vand.u32 4294901760, %v11273_v8 }
 0x101   : > { %6878 = vmatmul.mubr.f32.gmra.mxu0 %v8801_v33  ;;  %6929 = vmatmul.mubr.f32.gmra.mxu1 %v1108_v50 }
 0x102   : > { %6993 = vmatprep.subr.mxu1 %v11268_v3  ;;  %6942 = vmatprep.subr.mxu0 %v11268_v3 }
 0x103   : > { %6994 = vmatpush3.msra.mxu1 %v8327_v41  ;;  %6943 = vmatpush3.msra.mxu0 %v11284_v15  ;;  %v11290_v41 = vand.u32 4294901760, %v11277_v24 }
 0x104   : > { %6995 = vmatprep.subr.mxu1 %v11268_v3  ;;  %6880 = vmatprep.mubr.msk.f32.mxu0 %vm8130_vm3, %v11268_v3 }
 0x105   : > { %6931 = vmatprep.mubr.msk.f32.mxu1 %vm8130_vm3, %v11268_v3  ;;  %6944 = vmatprep.subr.mxu0 %v11268_v3 }
 0x106   : > { %6996 = vmatpush3.msra.mxu1 %v8340_v45  ;;  %6881 = vmatmul.mubr.f32.gmra.mxu0 %v8809_v30  ;;  %v11291_v45 = vand.u32 4294901760, %v11279_v5 }
 0x107   : > { %6932 = vmatmul.mubr.f32.gmra.mxu1 %v1118_v21  ;;  %6945 = vmatpush3.msra.mxu0 %v11285_v18 }
 0x108   : > { %6997 = vmatprep.subr.mxu1 %v11268_v3  ;;  %6946 = vmatprep.subr.mxu0 %v11268_v3 }
 0x109   : > { %6998 = vmatpush3.msra.mxu1 %v8351_v49  ;;  %6947 = vmatpush3.msra.mxu0 %v11286_v19  ;;  %v11292_v49 = vand.u32 4294901760, %v11280_v61 }
 0x10a   : > { %6999 = vmatprep.subr.mxu1 %v11268_v3  ;;  %6883 = vmatprep.mubr.msk.f32.mxu0 %vm8130_vm3, %v11268_v3 }
 0x10b   : > { %6934 = vmatprep.mubr.msk.f32.mxu1 %vm8130_vm3, %v11268_v3  ;;  %7000 = vmatpush3.msra.mxu1 %v11270_v60 }
 0x10c   : > { %6884 = vmatmul.mubr.f32.gmra.mxu0 %v8827_v12  ;;  %6935 = vmatmul.mubr.f32.gmra.mxu1 %v1128_v35 }
 0x10d   : > { %6948 = vmatprep.subr.mxu0 %v11268_v3  ;;  %7001 = vmatprep.subr.mxu1 %v11268_v3 }
 0x10e   : > { %6949 = vmatpush3.msra.mxu0 %v11287_v20  ;;  %7002 = vmatpush3.msra.mxu1 %v11272_v23 }
 0x10f   : > { %6950 = vmatprep.subr.mxu0 %v11268_v3  ;;  %7003 = vmatprep.subr.mxu1 %v11268_v3 }
 0x110   : > { %6886 = vmatprep.mubr.msk.f32.mxu0 %vm8130_vm3, %v11268_v3  ;;  %6937 = vmatprep.mubr.msk.f32.mxu1 %vm8130_vm3, %v11268_v3 }
 0x111   : > { %6951 = vmatpush3.msra.mxu0 %v11288_v25  ;;  %7004 = vmatpush3.msra.mxu1 %v11274_v52 }
 0x112   : > { %6887 = vmatmul.mubr.f32.gmra.mxu0 %v8850_v47  ;;  %6938 = vmatmul.mubr.f32.gmra.mxu1 %v1138_v22 }
 0x113   : > { %6952 = vmatprep.subr.mxu0 %v11268_v3  ;;  %7005 = vmatprep.subr.mxu1 %v11268_v3 }
 0x114   : > { %6953 = vmatpush3.msra.mxu0 %v11289_v27  ;;  %7006 = vmatpush3.msra.mxu1 %v11276_v9 }
 0x115   : > { %6954 = vmatprep.subr.mxu0 %v11268_v3  ;;  %7007 = vmatprep.subr.mxu1 %v11268_v3 }
 0x116   : > { %6889 = vmatprep.mubr.msk.f32.mxu0 %vm8130_vm3, %v11268_v3  ;;  %6955 = vmatpush3.msra.mxu0 %v11290_v41 }
 0x117   : > { %7008 = vmatpush3.msra.mxu1 %v11278_v39  ;;  %7009 = vmatprep.mubr.msk.f32.mxu1 %vm8130_vm3, %v11268_v3 }
 0x118   : > { %6890 = vmatmul.mubr.f32.gmra.mxu0 %v8903_v32  ;;  %6956 = vmatprep.subr.mxu0 %v11268_v3 }
 0x119   : > { %7010 = vmatmul.mubr.f32.vlgmr.msra.gmra.mxu1 %v8752_v53  ;;  %6957 = vmatpush3.msra.mxu0 %v11291_v45 }
 0x11a   : > { %6958 = vmatprep.subr.mxu0 %v11268_v3  ;;  %6892 = vmatprep.mubr.msk.f32.mxu0 %vm8130_vm3, %v11268_v3 }
 0x11b   : > { %6959 = vmatpush3.msra.mxu0 %v11292_v49  ;;  %7012 = vmatprep.mubr.msk.f32.mxu1 %vm8130_vm3, %v11268_v3 }
 0x11c   : > { %6893 = vmatmul.mubr.f32.gmra.mxu0 %v8906_v37  ;;  %6960 = vmatprep.subr.mxu0 %v11268_v3 }
 0x11d   : > { %7013 = vmatmul.mubr.f32.gmra.mxu1 %v8789_v2  ;;  %6961 = vmatpush3.msra.mxu0 %v11293_v14 }
 0x11e   : > { %6962 = vmatprep.subr.mxu0 %v11268_v3  ;;  %6964 = vmatprep.mubr.msk.f32.mxu0 %vm8130_vm3, %v11268_v3 }
 0x11f   : > { %6963 = vmatpush3.msra.mxu0 %v11294_v26  ;;  %7015 = vmatprep.mubr.msk.f32.mxu1 %vm8130_vm3, %v11268_v3 }
 0x120   : > { %6965 = vmatmul.mubr.f32.vlgmr.msra.gmra.mxu0 %v8752_v53  ;;  %7030 = vmatprep.subr.mxu0 %v11268_v3 }
 0x121   : > { %7016 = vmatmul.mubr.f32.gmra.mxu1 %v8793_v46  ;;  %6967 = vmatprep.mubr.msk.f32.mxu0 %vm8130_vm3, %v11268_v3 }
 0x122   : > { %7018 = vmatprep.mubr.msk.f32.mxu1 %vm8130_vm3, %v11268_v3  ;;  %7065 = vmatprep.subr.mxu1 %v11268_v3 }
 0x124   : > { %6968 = vmatmul.mubr.f32.gmra.mxu0 %v8789_v2 }
 0x125   : > { %7019 = vmatmul.mubr.f32.gmra.mxu1 %v8812_v40  ;;  %6970 = vmatprep.mubr.msk.f32.mxu0 %vm8130_vm3, %v11268_v3 }
 0x126   : > { %7021 = vmatprep.mubr.msk.f32.mxu1 %vm8130_vm3, %v11268_v3 }
 0x128   : > { %6971 = vmatmul.mubr.f32.gmra.mxu0 %v8793_v46 }
 0x129   : > { %7022 = vmatmul.mubr.f32.gmra.mxu1 %v8838_v11  ;;  %6973 = vmatprep.mubr.msk.f32.mxu0 %vm8130_vm3, %v11268_v3 }
 0x12a   : > { %7024 = vmatprep.mubr.msk.f32.mxu1 %vm8130_vm3, %v11268_v3 }
 0x12c   : > { %6974 = vmatmul.mubr.f32.gmra.mxu0 %v8812_v40 }
 0x12d   : > { %7025 = vmatmul.mubr.f32.gmra.mxu1 %v8895_v54  ;;  %6976 = vmatprep.mubr.msk.f32.mxu0 %vm8130_vm3, %v11268_v3 }
 0x12e   : > { %7027 = vmatprep.mubr.msk.f32.mxu1 %vm8130_vm3, %v11268_v3 }
 0x130   : > { %6977 = vmatmul.mubr.f32.gmra.mxu0 %v8838_v11 }
 0x131   : > { %7028 = vmatmul.mubr.f32.gmra.mxu1 %v8897_v58  ;;  %6979 = vmatprep.mubr.msk.f32.mxu0 %vm8130_vm3, %v11268_v3 }
 0x132   : > { %7079 = vmatprep.mubr.msk.f32.mxu1 %vm8130_vm3, %v11268_v3 }
 0x134   : > { %6980 = vmatmul.mubr.f32.gmra.mxu0 %v8895_v54 }
 0x135   : > { %6982 = vmatprep.mubr.msk.f32.mxu0 %vm8130_vm3, %v11268_v3 }
 0x138   : > { %6983 = vmatmul.mubr.f32.gmra.mxu0 %v8897_v58 }
 0x139   : > { %7044 = vmatprep.mubr.msk.f32.mxu0 %vm8130_vm3, %v11268_v3 }
 0x18b   : > { %v1273_v53 = vpop.f32.mrf.mxu1 }
 0x18d   : > { %v6831_v2 = vpop.f32.mrf.mxu1 }
 0x193   : > { %v1082_v46 = vpop.f32.mrf.mxu0 }
 0x194   : > { %v1274_v33 = vadd.f32 %v1273_v53, %v1082_v46  ;;  %v1279_v30 = vpop.f32.mrf.mxu1 }
 0x195   : > { %v6786_v43 = vpop.f32.mrf.mxu0 }
 0x196   : > { %v6834_v40 = vpop.f32.mrf.mxu1 }
 0x198   : > { %v1285_v59 = vpop.f32.mrf.mxu1 }
 0x19a   : > { %v6837_v12 = vpop.f32.mrf.mxu1 }
 0x19c   : > { %v1092_v11 = vpop.f32.mrf.mxu0  ;;  %v1291_v50 = vpop.f32.mrf.mxu1 }
 0x19d   : > { %v1280_v28 = vadd.f32 %v1279_v30, %v1092_v11 }
 0x19e   : > { %v6789_v7 = vpop.f32.mrf.mxu0  ;;  %v6840_v47 = vpop.f32.mrf.mxu1 }
 0x1a0   : > { %v1102_v63 = vpop.f32.mrf.mxu0  ;;  %v1297_v0 = vpop.f32.mrf.mxu1 }
 0x1a1   : > { %v1286_v56 = vadd.f32 %v1285_v59, %v1102_v63 }
 0x1a2   : > { %v6792_v16 = vpop.f32.mrf.mxu0  ;;  %v6843_v21 = vpop.f32.mrf.mxu1 }
 0x1a4   : > { %v1112_v60 = vpop.f32.mrf.mxu0 }
 0x1a5   : > { %v9077_v36 = vadd.f32 %v1291_v50, %v1112_v60 }
 0x1a6   : > { %v6795_v51 = vpop.f32.mrf.mxu0 }
 0x1a8   : > { %v1122_v57 = vpop.f32.mrf.mxu0 }
 0x1a9   : > { %v9079_v44 = vadd.f32 %v1297_v0, %v1122_v57 }
 0x1aa   : > { %v6798_v31 = vpop.f32.mrf.mxu0 }
 0x1ad   : > { %v1303_v23 = vpop.f32.mrf.mxu1 }
 0x1af   : > { %v6846_v4 = vpop.f32.mrf.mxu1 }
 0x1b1   : > { %v9081_v8 = vpop.f32.mrf.mxu1 }
 0x1b3   : > { %v6849_v52 = vpop.f32.mrf.mxu1 }
 0x1b5   : > { %v1132_v10 = vpop.f32.mrf.mxu0  ;;  %v1532_v9 = vpop.f32.mrf.mxu1 }
 0x1b6   : > { %v1304_v57 = vadd.f32 %v1303_v23, %v1132_v10 }
 0x1b7   : > { %v6801_v24 = vpop.f32.mrf.mxu0  ;;  %v6921_v62 = vpop.f32.mrf.mxu1 }
 0x1b9   : > { %v1142_v42 = vpop.f32.mrf.mxu0  ;;  %v1540_v39 = vpop.f32.mrf.mxu1 }
 0x1ba   : > { %v1310_v62 = vadd.f32 %v9081_v8, %v1142_v42 }
 0x1bb   : > { %v6804_v34 = vpop.f32.mrf.mxu0  ;;  %v6924_v17 = vpop.f32.mrf.mxu1 }
 0x1bd   : > { %v1405_v5 = vpop.f32.mrf.mxu0  ;;  %v1548_v54 = vpop.f32.mrf.mxu1 }
 0x1be   : > { %v1406_v58 = vadd.f32 %v1405_v5, %v1274_v33 }
 0x1bf   : > { %v6876_v61 = vpop.f32.mrf.mxu0  ;;  %v6927_v32 = vpop.f32.mrf.mxu1 }
 0x1c0   : > { %v9083_v37 = vadd.f32 %v1532_v9, %v1406_v58 }
 0x1c1   : > { %v1412_v6 = vpop.f32.mrf.mxu0  ;;  %v1556_v35 = vpop.f32.mrf.mxu1 }
 0x1c2   : > { %v1413_v22 = vadd.f32 %v1412_v6, %v1280_v28 }
 0x1c3   : > { %v6879_v48 = vpop.f32.mrf.mxu0  ;;  %v6930_v38 = vpop.f32.mrf.mxu1 }
 0x1c4   : > { %v9085_v29 = vadd.f32 %v1540_v39, %v1413_v22 }
 0x1c6   : > { %v1419_v1 = vpop.f32.mrf.mxu0 }
 0x1c7   : > { %v1420_v55 = vadd.f32 %v1419_v1, %v1286_v56  ;;  %v1564_v13 = vpop.f32.mrf.mxu1 }
 0x1c8   : > { %v6882_v15 = vpop.f32.mrf.mxu0 }
 0x1c9   : > { %v6933_v18 = vpop.f32.mrf.mxu1  ;;  %v9087_v19 = vadd.f32 %v1548_v54, %v1420_v55 }
 0x1cc   : > { %v1426_v20 = vpop.f32.mrf.mxu0  ;;  %v1572_v25 = vpop.f32.mrf.mxu1 }
 0x1cd   : > { %v1427_v39 = vadd.f32 %v1426_v20, %v9077_v36 }
 0x1ce   : > { %v6885_v27 = vpop.f32.mrf.mxu0  ;;  %v6936_v41 = vpop.f32.mrf.mxu1 }
 0x1cf   : > { %v1557_v6 = vadd.f32 %v1556_v35, %v1427_v39 }
 0x1d2   : > { %v1433_v45 = vpop.f32.mrf.mxu0  ;;  %v1580_v49 = vpop.f32.mrf.mxu1 }
 0x1d3   : > { %v1434_v32 = vadd.f32 %v1433_v45, %v9079_v44 }
 0x1d4   : > { %v6888_v14 = vpop.f32.mrf.mxu0  ;;  %v6939_v26 = vpop.f32.mrf.mxu1 }
 0x1d5   : > { %v1565_v55 = vadd.f32 %v1564_v13, %v1434_v32 }
 0x1d8   : > { %v1440_v53 = vpop.f32.mrf.mxu0 }
 0x1d9   : > { %v1806_v2 = vpop.f32.mrf.mxu1  ;;  %v1441_v52 = vadd.f32 %v1440_v53, %v1304_v57 }
 0x1da   : > { %v6891_v46 = vpop.f32.mrf.mxu0 }
 0x1db   : > { %v7011_v33 = vpop.f32.mrf.mxu1  ;;  %v1573_v58 = vadd.f32 %v1572_v25, %v1441_v52 }
 0x1dc   : > { %v1447_v30 = vpop.f32.mrf.mxu0 }
 0x1dd   : > { %v1812_v43 = vpop.f32.mrf.mxu1  ;;  %v1448_v5 = vadd.f32 %v1447_v30, %v1310_v62 }
 0x1de   : > { %v6894_v40 = vpop.f32.mrf.mxu0 }
 0x1df   : > { %v7014_v59 = vpop.f32.mrf.mxu1  ;;  %v1581_v38 = vadd.f32 %v1580_v49, %v1448_v5 }
 0x1e0   : > { %v1687_v12 = vpop.f32.mrf.mxu0 }
 0x1e1   : > { %v1818_v11 = vpop.f32.mrf.mxu1 }
 0x1e2   : > { %v6966_v50 = vpop.f32.mrf.mxu0 }
 0x1e3   : > { %v7017_v28 = vpop.f32.mrf.mxu1 }
 0x1e4   : > { %v1693_v7 = vpop.f32.mrf.mxu0 }
 0x1e5   : > { %v1824_v47 = vpop.f32.mrf.mxu1  ;;  %v1694_v42 = vadd.f32 %v1693_v7, %v9085_v29  ;;  %v1688_v29 = vadd.f32 %v1687_v12, %v9083_v37 }
 0x1e6   : > { %v6969_v63 = vpop.f32.mrf.mxu0 }
 0x1e7   : > { %v7020_v0 = vpop.f32.mrf.mxu1  ;;  %v9102_v35 = vadd.f32 %v1812_v43, %v1694_v42  ;;  %v9113_v27 = vadd.f32 %v1806_v2, %v1688_v29 }
 0x1e8   : > { %v1699_v56 = vpop.f32.mrf.mxu0 }
 0x1e9   : > { %v1830_v16 = vpop.f32.mrf.mxu1  ;;  %v1700_v13 = vadd.f32 %v1699_v56, %v9087_v19  ;;  %v1884_v52 = vsel %vm1881_vm8, %v9102_v35, 0 }
 0x1ea   : > { %v6972_v21 = vpop.f32.mrf.mxu0 }
 0x1eb   : > { %v7023_v60 = vpop.f32.mrf.mxu1  ;;  %v9110_v25 = vadd.f32 %v1818_v11, %v1700_v13  ;;  %v1882_v21 = vsel %vm1881_vm8, %v9113_v27, 0 }
 0x1ec   : > { %v1705_v51 = vpop.f32.mrf.mxu0 }
 0x1ed   : > { %v1836_v31 = vpop.f32.mrf.mxu1  ;;  %v1706_v10 = vadd.f32 %v1705_v51, %v1557_v6 }
 0x1ee   : > { %v6975_v4 = vpop.f32.mrf.mxu0 }
 0x1ef   : > { %v7026_v9 = vpop.f32.mrf.mxu1  ;;  %v9096_v15 = vadd.f32 %v1824_v47, %v1706_v10  ;;  %v9163_v4 = vand.u32 4294901760, %v1882_v21 }
 0x1f0   : > { %v1711_v24 = vpop.f32.mrf.mxu0 }
 0x1f1   : > { %v1842_v34 = vpop.f32.mrf.mxu1  ;;  %v1712_v18 = vadd.f32 %v1711_v24, %v1565_v55  ;;  %v9183_v5 = vsub.f32 %v1882_v21, %v9163_v4 }
 0x1f2   : > { %v6978_v17 = vpop.f32.mrf.mxu0 }
 0x1f3   : > { %v7029_v54 = vpop.f32.mrf.mxu1  ;;  %v9105_v20 = vadd.f32 %v1830_v16, %v1712_v18  ;;  %v1984_v10 = vand.u32 4294901760, %v9183_v5 }
 0x1f4   : > { %v1717_v61 = vpop.f32.mrf.mxu0  ;;  %v9185_v54 = vand.u32 4294901760, %v1884_v52 }
 0x1f5   : > { %v1718_v22 = vadd.f32 %v1717_v61, %v1573_v58  ;;  %v1886_v58 = vsel %vm1881_vm8, %v9110_v25, 0  ;;  %v1985_v13 = vsub.f32 %v9183_v5, %v1984_v10 }
 0x1f6   : > { %v6981_v23 = vpop.f32.mrf.mxu0 }
 0x1f7   : > { %v9092_v48 = vadd.f32 %v1836_v31, %v1718_v22  ;;  %v9196_v23 = vand.u32 4294901760, %v1886_v58 }
 0x1f8   : > { %v1723_v1 = vpop.f32.mrf.mxu0 }
 0x1f9   : > { %v1724_v8 = vadd.f32 %v1723_v1, %v1581_v38  ;;  %1877 = vrot.lane.b32.xlu1 %v9092_v48, %s8131_s24  ;;  %v9202_v38 = vsub.f32 %v1884_v52, %v9185_v54  ;;  %v1888_v1 = vsel %vm1881_vm8, %v9096_v15, 0  ;;  %v9215_v18 = vsub.f32 %v1886_v58, %v9196_v23 }
 0x1fa   : > { %v6984_v36 = vpop.f32.mrf.mxu0 }
 0x1fb   : > { %v9098_v44 = vadd.f32 %v1842_v34, %v1724_v8  ;;  %v1994_v29 = vand.u32 4294901760, %v9202_v38 }
 0x1fd   : > { %1873 = vrot.lane.b32.xlu1 %v9096_v15, %s8131_s24  ;;  %1879 = vrot.lane.b32.xlu0 %v9098_v44, %s8131_s24 }
 0x201   : > { %1869 = vrot.lane.b32.xlu1 %v9102_v35, %s8131_s24  ;;  %1875 = vrot.lane.b32.xlu0 %v9105_v20, %s8131_s24 }
 0x205   : > { %1871 = vrot.lane.b32.xlu0 %v9110_v25, %s8131_s24 }
 0x209   : > { %1867 = vrot.lane.b32.xlu0 %v9113_v27, %s8131_s24  ;;  %s8135_s24 = smov 16  }
 0x26b   : > { %v1878_v41 = vpop.permute.xlu1 %1877 }
 0x26c   : > { %v1906_v19 = vsel %vm1881_vm8, %v1878_v41, 0  ;;  %v9223_v41 = vand.u32 4294901760, %v1888_v1 }
 0x26d   : > { %v9117_v45 = vand.u32 4294901760, %v1906_v19 }
 0x26f   : > { %v1874_v49 = vpop.permute.xlu1 %1873  ;;  %v1880_v14 = vpop.permute.xlu0 %1879  ;;  %v9121_v37 = vsub.f32 %v1906_v19, %v9117_v45 }
 0x270   : > { %v1908_v26 = vsel %vm1881_vm8, %v1880_v14, 0  ;;  %v1902_v53 = vsel %vm1881_vm8, %v1874_v49, 0 }
 0x271   : > { %v9124_v46 = vand.u32 4294901760, %v1908_v26  ;;  %v9130_v30 = vand.u32 4294901760, %v1902_v53  ;;  %v2080_v40 = vand.u32 4294901760, %v9121_v37 }
 0x273   : > { %v9127_v2 = vsub.f32 %v1908_v26, %v9124_v46  ;;  %7031 = vmatpush3.xpose.msra.mxu0 %v9124_v46  ;;  %v1876_v33 = vpop.permute.xlu0 %1875  ;;  %v1870_v50 = vpop.permute.xlu1 %1869  ;;  %v9143_v7 = vsub.f32 %v1902_v53, %v9130_v30  ;;  %v2081_v0 = vsub.f32 %v9121_v37, %v2080_v40  ;;  %v1890_v26 = vsel %vm1881_vm8, %v9105_v20, 0 }
 0x274   : > { %v1904_v43 = vsel %vm1881_vm8, %v1876_v33, 0  ;;  %7032 = vmatprep.subr.mxu0 %v11268_v3  ;;  %v1898_v60 = vsel %vm1881_vm8, %v1870_v50, 0  ;;  %v2004_v53 = vand.u32 4294901760, %v9215_v18  ;;  %v1986_v33 = vand.u32 4294901760, %v1985_v13 }
 0x275   : > { %v2073_v59 = vand.u32 4294901760, %v9127_v2  ;;  %v9136_v12 = vand.u32 4294901760, %v1904_v43  ;;  %v2094_v31 = vand.u32 4294901760, %v9143_v7  ;;  %v2082_v9 = vand.u32 4294901760, %v2081_v0 }
 0x276   : > { %v9167_v24 = vand.u32 4294901760, %v1898_v60  ;;  %v9241_v50 = vand.u32 4294901760, %v1890_v26  ;;  %v1892_v0 = vsel %vm1881_vm8, %v9092_v48, 0 }
 0x277   : > { %v2074_v11 = vsub.f32 %v9127_v2, %v2073_v59  ;;  %7033 = vmatpush3.xpose.msra.mxu0 %v9117_v45  ;;  %v1872_v28 = vpop.permute.xlu0 %1871  ;;  %v9146_v47 = vsub.f32 %v1904_v43, %v9136_v12  ;;  %v2095_v17 = vsub.f32 %v9143_v7, %v2094_v31  ;;  %v1995_v43 = vsub.f32 %v9202_v38, %v1994_v29 }
 0x278   : > { %v1900_v63 = vsel %vm1881_vm8, %v1872_v28, 0  ;;  %7034 = vmatprep.subr.mxu0 %v11268_v3  ;;  %v9190_v61 = vsub.f32 %v1898_v60, %v9167_v24  ;;  %v9259_v52 = vand.u32 4294901760, %v1892_v0 }
 0x279   : > { %v2075_v56 = vand.u32 4294901760, %v2074_v11  ;;  %v9153_v16 = vand.u32 4294901760, %v1900_v63  ;;  %v2087_v51 = vand.u32 4294901760, %v9146_v47  ;;  %v2096_v55 = vand.u32 4294901760, %v2095_v17 }
 0x27a   : > { %v2108_v8 = vand.u32 4294901760, %v9190_v61  ;;  %v9239_v11 = vsub.f32 %v1888_v1, %v9223_v41  ;;  %v1996_v21 = vand.u32 4294901760, %v1995_v43 }
 0x27b   : > { %7035 = vmatpush3.xpose.msra.mxu0 %v9136_v12  ;;  %7066 = vmatpush3.xpose.msra.mxu1 %v2075_v56  ;;  %v1868_v57 = vpop.permute.xlu0 %1867  ;;  %v2088_v62 = vsub.f32 %v9146_v47, %v2087_v51  ;;  %v9173_v39 = vsub.f32 %v1900_v63, %v9153_v16  ;;  %v2005_v56 = vsub.f32 %v9215_v18, %v2004_v53 }
 0x27c   : > { %7036 = vmatprep.subr.mxu0 %v11268_v3  ;;  %7067 = vmatprep.subr.mxu1 %v11268_v3  ;;  %v1896_v34 = vsel %vm1881_vm8, %v1868_v57, 0  ;;  %v2109_v19 = vsub.f32 %v9190_v61, %v2108_v8  ;;  %v2014_v60 = vand.u32 4294901760, %v9239_v11  ;;  %v9257_v57 = vsub.f32 %v1890_v26, %v9241_v50 }
 0x27d   : > { %v2089_v32 = vand.u32 4294901760, %v2088_v62  ;;  %v2101_v6 = vand.u32 4294901760, %v9173_v39  ;;  %v9193_v22 = vand.u32 4294901760, %v1896_v34  ;;  %v1894_v62 = vsel %vm1881_vm8, %v9098_v44, 0 }
 0x27e   : > { %v2110_v28 = vand.u32 4294901760, %v2109_v19  ;;  %v2015_v17 = vsub.f32 %v9239_v11, %v2014_v60  ;;  %v2024_v58 = vand.u32 4294901760, %v9257_v57  ;;  %v9275_v1 = vand.u32 4294901760, %v1894_v62 }
 0x27f   : > { %7037 = vmatpush3.xpose.msra.mxu0 %v9130_v30  ;;  %7068 = vmatpush3.xpose.msra.mxu1 %v2082_v9  ;;  %v2102_v36 = vsub.f32 %v9173_v39, %v2101_v6  ;;  %v9211_v42 = vsub.f32 %v1896_v34, %v9193_v22  ;;  %v2006_v34 = vand.u32 4294901760, %v2005_v56 }
 0x280   : > { %7038 = vmatprep.subr.mxu0 %v11268_v3  ;;  %7069 = vmatprep.subr.mxu1 %v11268_v3  ;;  %v9290_v19 = vsub.f32 %v1894_v62, %v9275_v1 }
 0x281   : > { %v2103_v49 = vand.u32 4294901760, %v2102_v36  ;;  %v2115_v14 = vand.u32 4294901760, %v9211_v42  ;;  %v2025_v36 = vsub.f32 %v9257_v57, %v2024_v58 }
 0x283   : > { %7039 = vmatpush3.xpose.msra.mxu0 %v9153_v16  ;;  %7070 = vmatpush3.xpose.msra.mxu1 %v2089_v32  ;;  %v2116_v63 = vsub.f32 %v9211_v42, %v2115_v14  ;;  %v9273_v32 = vsub.f32 %v1892_v0, %v9259_v52 }
 0x284   : > { %7040 = vmatprep.subr.mxu0 %v11268_v3  ;;  %7071 = vmatprep.subr.mxu1 %v11268_v3 }
 0x285   : > { %v2117_v9 = vand.u32 4294901760, %v2116_v63  ;;  %v2034_v13 = vand.u32 4294901760, %v9273_v32 }
 0x287   : > { %7041 = vmatpush3.xpose.msra.mxu0 %v9167_v24  ;;  %7072 = vmatpush3.xpose.msra.mxu1 %v2096_v55  ;;  %v2016_v55 = vand.u32 4294901760, %v2015_v17  ;;  %v2035_v26 = vsub.f32 %v9273_v32, %v2034_v13 }
 0x288   : > { %7042 = vmatprep.subr.mxu0 %v11268_v3  ;;  %7073 = vmatprep.subr.mxu1 %v11268_v3 }
 0x289   : > { %v2036_v43 = vand.u32 4294901760, %v2035_v26  ;;  %v1846_v26 = vld [vmem:[%s11204_s5] sm:$0xff] }
 0x28b   : > { %7043 = vmatpush3.xpose.msra.mxu0 %v9193_v22  ;;  %7074 = vmatpush3.xpose.msra.mxu1 %v2103_v49  ;;  %v2026_v49 = vand.u32 4294901760, %v2025_v36 }
 0x28c   : > { %7075 = vmatprep.subr.mxu1 %v11268_v3  ;;  %7100 = vmatprep.subr.mxu0 %v11268_v3 }
 0x28e   : > { %7045 = vmatmul.mubr.f32.vlgmr.msra.gmra.mxu0 %v1986_v33  ;;  %v2044_v33 = vand.u32 4294901760, %v9290_v19 }
 0x28f   : > { %7076 = vmatpush3.xpose.msra.mxu1 %v2110_v28  ;;  %7101 = vmatpush3.xpose.msra.mxu0 %v9127_v2 }
 0x290   : > { %7047 = vmatprep.mubr.msk.f32.mxu0 %vm8130_vm3, %v11268_v3  ;;  %7077 = vmatprep.subr.mxu1 %v11268_v3  ;;  %v2045_v28 = vsub.f32 %v9290_v19, %v2044_v33 }
 0x291   : > { %7102 = vmatprep.subr.mxu0 %v11268_v3 }
 0x292   : > { %7048 = vmatmul.mubr.f32.gmra.mxu0 %v1996_v21  ;;  %v2046_v63 = vand.u32 4294901760, %v2045_v28 }
 0x293   : > { %7078 = vmatpush3.xpose.msra.mxu1 %v2117_v9  ;;  %7103 = vmatpush3.xpose.msra.mxu0 %v9121_v37 }
 0x294   : > { %7050 = vmatprep.mubr.msk.f32.mxu0 %vm8130_vm3, %v11268_v3  ;;  %7104 = vmatprep.subr.mxu0 %v11268_v3 }
 0x295   : > { %7135 = vmatprep.subr.mxu1 %v11268_v3 }
 0x296   : > { %7051 = vmatmul.mubr.f32.gmra.mxu0 %v2006_v34  ;;  %7080 = vmatmul.mubr.f32.vlgmr.msra.gmra.mxu1 %v9163_v4 }
 0x297   : > { %7105 = vmatpush3.xpose.msra.mxu0 %v9146_v47  ;;  %7136 = vmatpush3.xpose.msra.mxu1 %v9124_v46 }
 0x298   : > { %7053 = vmatprep.mubr.msk.f32.mxu0 %vm8130_vm3, %v11268_v3  ;;  %7082 = vmatprep.mubr.msk.f32.mxu1 %vm8130_vm3, %v11268_v3 }
 0x299   : > { %7106 = vmatprep.subr.mxu0 %v11268_v3  ;;  %7137 = vmatprep.subr.mxu1 %v11268_v3 }
 0x29a   : > { %7054 = vmatmul.mubr.f32.gmra.mxu0 %v2016_v55  ;;  %7083 = vmatmul.mubr.f32.gmra.mxu1 %v9185_v54 }
 0x29b   : > { %7107 = vmatpush3.xpose.msra.mxu0 %v9143_v7  ;;  %7138 = vmatpush3.xpose.msra.mxu1 %v9117_v45 }
 0x29c   : > { %7056 = vmatprep.mubr.msk.f32.mxu0 %vm8130_vm3, %v11268_v3  ;;  %7085 = vmatprep.mubr.msk.f32.mxu1 %vm8130_vm3, %v11268_v3 }
 0x29d   : > { %7108 = vmatprep.subr.mxu0 %v11268_v3  ;;  %7139 = vmatprep.subr.mxu1 %v11268_v3 }
 0x29e   : > { %7057 = vmatmul.mubr.f32.gmra.mxu0 %v2026_v49  ;;  %7086 = vmatmul.mubr.f32.gmra.mxu1 %v9196_v23 }
 0x29f   : > { %7109 = vmatpush3.xpose.msra.mxu0 %v9173_v39  ;;  %7140 = vmatpush3.xpose.msra.mxu1 %v9136_v12 }
 0x2a0   : > { %7059 = vmatprep.mubr.msk.f32.mxu0 %vm8130_vm3, %v11268_v3  ;;  %7088 = vmatprep.mubr.msk.f32.mxu1 %vm8130_vm3, %v11268_v3 }
 0x2a1   : > { %7110 = vmatprep.subr.mxu0 %v11268_v3  ;;  %7141 = vmatprep.subr.mxu1 %v11268_v3 }
 0x2a2   : > { %7060 = vmatmul.mubr.f32.gmra.mxu0 %v2036_v43  ;;  %7089 = vmatmul.mubr.f32.gmra.mxu1 %v9223_v41 }
 0x2a3   : > { %7111 = vmatpush3.xpose.msra.mxu0 %v9190_v61  ;;  %7142 = vmatpush3.xpose.msra.mxu1 %v9130_v30 }
 0x2a4   : > { %7062 = vmatprep.mubr.msk.f32.mxu0 %vm8130_vm3, %v11268_v3  ;;  %7091 = vmatprep.mubr.msk.f32.mxu1 %vm8130_vm3, %v11268_v3 }
 0x2a5   : > { %7112 = vmatprep.subr.mxu0 %v11268_v3  ;;  %7143 = vmatprep.subr.mxu1 %v11268_v3 }
 0x2a6   : > { %7063 = vmatmul.mubr.f32.gmra.mxu0 %v2046_v63  ;;  %7092 = vmatmul.mubr.f32.gmra.mxu1 %v9241_v50 }
 0x2a7   : > { %7113 = vmatpush3.xpose.msra.mxu0 %v9211_v42  ;;  %7144 = vmatpush3.xpose.msra.mxu1 %v9153_v16 }
 0x2a8   : > { %7094 = vmatprep.mubr.msk.f32.mxu1 %vm8130_vm3, %v11268_v3  ;;  %7114 = vmatprep.mubr.msk.f32.mxu0 %vm8130_vm3, %v11268_v3 }
 0x2a9   : > { %7145 = vmatprep.subr.mxu1 %v11268_v3  ;;  %7170 = vmatprep.subr.mxu0 %v11268_v3 }
 0x2aa   : > { %7095 = vmatmul.mubr.f32.gmra.mxu1 %v9259_v52  ;;  %7115 = vmatmul.mubr.f32.vlgmr.msra.gmra.mxu0 %v9183_v5 }
 0x2ab   : > { %7146 = vmatpush3.xpose.msra.mxu1 %v9167_v24  ;;  %7171 = vmatpush3.xpose.msra.mxu0 %v2073_v59 }
 0x2ac   : > { %7097 = vmatprep.mubr.msk.f32.mxu1 %vm8130_vm3, %v11268_v3  ;;  %7117 = vmatprep.mubr.msk.f32.mxu0 %vm8130_vm3, %v11268_v3 }
 0x2ad   : > { %7147 = vmatprep.subr.mxu1 %v11268_v3  ;;  %7172 = vmatprep.subr.mxu0 %v11268_v3 }
 0x2ae   : > { %7098 = vmatmul.mubr.f32.gmra.mxu1 %v9275_v1  ;;  %7118 = vmatmul.mubr.f32.gmra.mxu0 %v9202_v38 }
 0x2af   : > { %7148 = vmatpush3.xpose.msra.mxu1 %v9193_v22  ;;  %7173 = vmatpush3.xpose.msra.mxu0 %v2080_v40 }
 0x2b0   : > { %7120 = vmatprep.mubr.msk.f32.mxu0 %vm8130_vm3, %v11268_v3  ;;  %7149 = vmatprep.mubr.msk.f32.mxu1 %vm8130_vm3, %v11268_v3 }
 0x2b1   : > { %7174 = vmatprep.subr.mxu0 %v11268_v3  ;;  %7205 = vmatprep.subr.mxu1 %v11268_v3 }
 0x2b2   : > { %7121 = vmatmul.mubr.f32.gmra.mxu0 %v9215_v18  ;;  %7150 = vmatmul.mubr.f32.vlgmr.msra.gmra.mxu1 %v1984_v10 }
 0x2b3   : > { %7175 = vmatpush3.xpose.msra.mxu0 %v2087_v51  ;;  %7206 = vmatpush3.xpose.msra.mxu1 %v9124_v46 }
 0x2b4   : > { %7123 = vmatprep.mubr.msk.f32.mxu0 %vm8130_vm3, %v11268_v3  ;;  %7152 = vmatprep.mubr.msk.f32.mxu1 %vm8130_vm3, %v11268_v3 }
 0x2b5   : > { %7176 = vmatprep.subr.mxu0 %v11268_v3  ;;  %7207 = vmatprep.subr.mxu1 %v11268_v3 }
 0x2b6   : > { %7124 = vmatmul.mubr.f32.gmra.mxu0 %v9239_v11  ;;  %7153 = vmatmul.mubr.f32.gmra.mxu1 %v1994_v29 }
 0x2b7   : > { %7177 = vmatpush3.xpose.msra.mxu0 %v2094_v31  ;;  %7208 = vmatpush3.xpose.msra.mxu1 %v9117_v45 }
 0x2b8   : > { %7126 = vmatprep.mubr.msk.f32.mxu0 %vm8130_vm3, %v11268_v3  ;;  %7155 = vmatprep.mubr.msk.f32.mxu1 %vm8130_vm3, %v11268_v3 }
 0x2b9   : > { %7178 = vmatprep.subr.mxu0 %v11268_v3  ;;  %7209 = vmatprep.subr.mxu1 %v11268_v3 }
 0x2ba   : > { %7127 = vmatmul.mubr.f32.gmra.mxu0 %v9257_v57  ;;  %7156 = vmatmul.mubr.f32.gmra.mxu1 %v2004_v53 }
 0x2bb   : > { %7179 = vmatpush3.xpose.msra.mxu0 %v2101_v6  ;;  %7210 = vmatpush3.xpose.msra.mxu1 %v9136_v12 }
 0x2bc   : > { %7129 = vmatprep.mubr.msk.f32.mxu0 %vm8130_vm3, %v11268_v3  ;;  %7158 = vmatprep.mubr.msk.f32.mxu1 %vm8130_vm3, %v11268_v3 }
 0x2bd   : > { %7180 = vmatprep.subr.mxu0 %v11268_v3  ;;  %7211 = vmatprep.subr.mxu1 %v11268_v3 }
 0x2be   : > { %7130 = vmatmul.mubr.f32.gmra.mxu0 %v9273_v32  ;;  %7159 = vmatmul.mubr.f32.gmra.mxu1 %v2014_v60 }
 0x2bf   : > { %7181 = vmatpush3.xpose.msra.mxu0 %v2108_v8  ;;  %7212 = vmatpush3.xpose.msra.mxu1 %v9130_v30  ;;  %v1852_v8 = vld [vmem:[%s11204_s5 + $0x30] sm:$0xf] }
 0x2c0   : > { %7132 = vmatprep.mubr.msk.f32.mxu0 %vm8130_vm3, %v11268_v3  ;;  %7161 = vmatprep.mubr.msk.f32.mxu1 %vm8130_vm3, %v11268_v3 }
 0x2c1   : > { %7182 = vmatprep.subr.mxu0 %v11268_v3  ;;  %7213 = vmatprep.subr.mxu1 %v11268_v3 }
 0x2c2   : > { %7133 = vmatmul.mubr.f32.gmra.mxu0 %v9290_v19  ;;  %7162 = vmatmul.mubr.f32.gmra.mxu1 %v2024_v58 }
 0x2c3   : > { %7183 = vmatpush3.xpose.msra.mxu0 %v2115_v14  ;;  %7214 = vmatpush3.xpose.msra.mxu1 %v9153_v16 }
 0x2c4   : > { %7164 = vmatprep.mubr.msk.f32.mxu1 %vm8130_vm3, %v11268_v3  ;;  %7184 = vmatprep.mubr.msk.f32.mxu0 %vm8130_vm3, %v11268_v3 }
 0x2c5   : > { %7215 = vmatprep.subr.mxu1 %v11268_v3  ;;  %7240 = vmatprep.subr.mxu0 %v11268_v3 }
 0x2c6   : > { %7165 = vmatmul.mubr.f32.gmra.mxu1 %v2034_v13  ;;  %7185 = vmatmul.mubr.f32.vlgmr.msra.gmra.mxu0 %v9163_v4 }
 0x2c7   : > { %7216 = vmatpush3.xpose.msra.mxu1 %v9167_v24  ;;  %7167 = vmatprep.mubr.msk.f32.mxu1 %vm8130_vm3, %v11268_v3 }
 0x2c8   : > { %7187 = vmatprep.mubr.msk.f32.mxu0 %vm8130_vm3, %v11268_v3  ;;  %7217 = vmatprep.subr.mxu1 %v11268_v3 }
 0x2ca   : > { %7168 = vmatmul.mubr.f32.gmra.mxu1 %v2044_v33  ;;  %7188 = vmatmul.mubr.f32.gmra.mxu0 %v9185_v54 }
 0x2cb   : > { %7218 = vmatpush3.xpose.msra.mxu1 %v9193_v22  ;;  %7190 = vmatprep.mubr.msk.f32.mxu0 %vm8130_vm3, %v11268_v3 }
 0x2cc   : > { %7219 = vmatprep.mubr.msk.f32.mxu1 %vm8130_vm3, %v11268_v3  ;;  %7275 = vmatprep.subr.mxu1 %v11268_v3 }
 0x2ce   : > { %7191 = vmatmul.mubr.f32.gmra.mxu0 %v9196_v23  ;;  %7220 = vmatmul.mubr.f32.vlgmr.msra.gmra.mxu1 %v9163_v4 }
 0x2cf   : > { %7193 = vmatprep.mubr.msk.f32.mxu0 %vm8130_vm3, %v11268_v3  ;;  %7222 = vmatprep.mubr.msk.f32.mxu1 %vm8130_vm3, %v11268_v3 }
 0x2d2   : > { %7194 = vmatmul.mubr.f32.gmra.mxu0 %v9223_v41  ;;  %7223 = vmatmul.mubr.f32.gmra.mxu1 %v9185_v54 }
 0x2d3   : > { %7196 = vmatprep.mubr.msk.f32.mxu0 %vm8130_vm3, %v11268_v3  ;;  %7225 = vmatprep.mubr.msk.f32.mxu1 %vm8130_vm3, %v11268_v3 }
 0x2d6   : > { %7197 = vmatmul.mubr.f32.gmra.mxu0 %v9241_v50  ;;  %7226 = vmatmul.mubr.f32.gmra.mxu1 %v9196_v23 }
 0x2d7   : > { %7199 = vmatprep.mubr.msk.f32.mxu0 %vm8130_vm3, %v11268_v3  ;;  %7228 = vmatprep.mubr.msk.f32.mxu1 %vm8130_vm3, %v11268_v3 }
 0x2da   : > { %7200 = vmatmul.mubr.f32.gmra.mxu0 %v9259_v52  ;;  %7229 = vmatmul.mubr.f32.gmra.mxu1 %v9223_v41 }
 0x2db   : > { %7202 = vmatprep.mubr.msk.f32.mxu0 %vm8130_vm3, %v11268_v3  ;;  %7231 = vmatprep.mubr.msk.f32.mxu1 %vm8130_vm3, %v11268_v3 }
 0x2de   : > { %7203 = vmatmul.mubr.f32.gmra.mxu0 %v9275_v1  ;;  %7232 = vmatmul.mubr.f32.gmra.mxu1 %v9241_v50 }
 0x2df   : > { %7234 = vmatprep.mubr.msk.f32.mxu1 %vm8130_vm3, %v11268_v3  ;;  %7254 = vmatprep.mubr.msk.f32.mxu0 %vm8130_vm3, %v11268_v3 }
 0x2e2   : > { %7235 = vmatmul.mubr.f32.gmra.mxu1 %v9259_v52 }
 0x2e3   : > { %7237 = vmatprep.mubr.msk.f32.mxu1 %vm8130_vm3, %v11268_v3 }
 0x2e6   : > { %7238 = vmatmul.mubr.f32.gmra.mxu1 %v9275_v1 }
 0x2e7   : > { %7289 = vmatprep.mubr.msk.f32.mxu1 %vm8130_vm3, %v11268_v3 }
 0x34e   : > { %v1988_v45 = vpop.f32.mrf.mxu0 }
 0x350   : > { %v7046_v37 = vpop.f32.mrf.mxu0 }
 0x352   : > { %v1998_v46 = vpop.f32.mrf.mxu0 }
 0x354   : > { %v7049_v2 = vpop.f32.mrf.mxu0 }
 0x355   : > { %v1989_v2 = vadd.f32 %v1988_v45, %v1846_v26 }
 0x356   : > { %v9473_v30 = vpop.f32.mrf.mxu0  ;;  %v2154_v40 = vpop.f32.mrf.mxu1 }
 0x358   : > { %v7052_v59 = vpop.f32.mrf.mxu0  ;;  %v7081_v12 = vpop.f32.mrf.mxu1 }
 0x359   : > { %v1847_v59 = vld [vmem:[%s11204_s5 + $0x8] sm:$0xff] }
 0x35a   : > { %v9475_v7 = vpop.f32.mrf.mxu0  ;;  %v2160_v47 = vpop.f32.mrf.mxu1 }
 0x35c   : > { %v7055_v16 = vpop.f32.mrf.mxu0  ;;  %v7084_v51 = vpop.f32.mrf.mxu1 }
 0x35d   : > { %v2155_v51 = vadd.f32 %v2154_v40, %v1989_v2 }
 0x35e   : > { %v9477_v31 = vpop.f32.mrf.mxu0  ;;  %v9479_v4 = vpop.f32.mrf.mxu1 }
 0x360   : > { %v7058_v24 = vpop.f32.mrf.mxu0  ;;  %v7087_v39 = vpop.f32.mrf.mxu1 }
 0x362   : > { %v9481_v5 = vpop.f32.mrf.mxu0  ;;  %v9483_v54 = vpop.f32.mrf.mxu1 }
 0x364   : > { %v7061_v61 = vpop.f32.mrf.mxu0  ;;  %v7090_v6 = vpop.f32.mrf.mxu1 }
 0x365   : > { %v1999_v61 = vadd.f32 %v1998_v46, %v1847_v59  ;;  %v1849_v46 = vld [vmem:[%s11204_s5 + $0x18] sm:$0xff] }
 0x366   : > { %v2048_v22 = vpop.f32.mrf.mxu0  ;;  %v9485_v23 = vpop.f32.mrf.mxu1 }
 0x367   : > { %v2049_v14 = vadd.f32 %v2048_v22, %v1852_v8  ;;  %v1848_v22 = vld [vmem:[%s11204_s5 + $0x10] sm:$0xff]  ;;  %v2161_v8 = vadd.f32 %v2160_v47, %v1999_v61 }
 0x368   : > { %v7064_v10 = vpop.f32.mrf.mxu0  ;;  %v7093_v38 = vpop.f32.mrf.mxu1 }
 0x36a   : > { %v9490_v42 = vpop.f32.mrf.mxu1  ;;  %v2276_v18 = vpop.f32.mrf.mxu0 }
 0x36b   : > { %v2277_v6 = vadd.f32 %v2276_v18, %v2155_v51 }
 0x36c   : > { %v7096_v29 = vpop.f32.mrf.mxu1  ;;  %v7116_v41 = vpop.f32.mrf.mxu0 }
 0x36e   : > { %v2190_v53 = vpop.f32.mrf.mxu1  ;;  %v2283_v11 = vpop.f32.mrf.mxu0 }
 0x36f   : > { %v2191_v50 = vadd.f32 %v2190_v53, %v2049_v14  ;;  %v2009_v53 = vadd.f32 %v9473_v30, %v1848_v22 }
 0x370   : > { %v7099_v0 = vpop.f32.mrf.mxu1  ;;  %v7119_v56 = vpop.f32.mrf.mxu0 }
 0x371   : > { %v2167_v56 = vadd.f32 %v9479_v4, %v2009_v53 }
 0x372   : > { %v2290_v21 = vpop.f32.mrf.mxu0  ;;  %v2398_v60 = vpop.f32.mrf.mxu1 }
 0x373   : > { %v2399_v45 = vadd.f32 %v2398_v60, %v2277_v6 }
 0x374   : > { %v7122_v57 = vpop.f32.mrf.mxu0  ;;  %v7151_v52 = vpop.f32.mrf.mxu1 }
 0x376   : > { %v2297_v9 = vpop.f32.mrf.mxu0  ;;  %v2406_v62 = vpop.f32.mrf.mxu1 }
 0x378   : > { %v7125_v34 = vpop.f32.mrf.mxu0  ;;  %v7154_v17 = vpop.f32.mrf.mxu1 }
 0x379   : > { %v2019_v34 = vadd.f32 %v9475_v7, %v1849_v46  ;;  %v2291_v17 = vadd.f32 %v2290_v21, %v2167_v56 }
 0x37a   : > { %v9492_v58 = vpop.f32.mrf.mxu0  ;;  %v2414_v32 = vpop.f32.mrf.mxu1 }
 0x37b   : > { %v2173_v4 = vadd.f32 %v9483_v54, %v2019_v34 }
 0x37c   : > { %v7128_v1 = vpop.f32.mrf.mxu0  ;;  %v7157_v55 = vpop.f32.mrf.mxu1 }
 0x37d   : > { %v1850_v1 = vld [vmem:[%s11204_s5 + $0x20] sm:$0xff]  ;;  %v2298_v21 = vadd.f32 %v2297_v9, %v2173_v4 }
 0x37e   : > { %v9494_v36 = vpop.f32.mrf.mxu0  ;;  %v2422_v13 = vpop.f32.mrf.mxu1  ;;  %v2029_v7 = vadd.f32 %v9477_v31, %v1850_v1 }
 0x37f   : > { %v2423_v54 = vadd.f32 %v2422_v13, %v2298_v21 }
 0x380   : > { %v7131_v19 = vpop.f32.mrf.mxu0  ;;  %v7160_v49 = vpop.f32.mrf.mxu1 }
 0x382   : > { %v2318_v33 = vpop.f32.mrf.mxu0  ;;  %v9499_v43 = vpop.f32.mrf.mxu1 }
 0x383   : > { %v2319_v28 = vadd.f32 %v2318_v33, %v2191_v50  ;;  %v2284_v50 = vadd.f32 %v2283_v11, %v2161_v8 }
 0x384   : > { %v7134_v63 = vpop.f32.mrf.mxu0  ;;  %v7163_v37 = vpop.f32.mrf.mxu1 }
 0x385   : > { %v2407_v57 = vadd.f32 %v2406_v62, %v2284_v50  ;;  %v2415_v62 = vadd.f32 %v2414_v32, %v2291_v17  ;;  %v1851_v37 = vld [vmem:[%s11204_s5 + $0x28] sm:$0xff] }
 0x386   : > { %v9504_v12 = vpop.f32.mrf.mxu1  ;;  %v2538_v16 = vpop.f32.mrf.mxu0 }
 0x387   : > { %v2539_v40 = vadd.f32 %v2538_v16, %v2399_v45  ;;  %v2179_v16 = vadd.f32 %v9485_v23, %v2029_v7 }
 0x388   : > { %v7166_v24 = vpop.f32.mrf.mxu1  ;;  %v7186_v39 = vpop.f32.mrf.mxu0 }
 0x389   : > { %v2039_v39 = vadd.f32 %v9481_v5, %v1851_v37  ;;  %v2305_v31 = vadd.f32 %v9492_v58, %v2179_v16 }
 0x38a   : > { %v2446_v10 = vpop.f32.mrf.mxu1  ;;  %v2544_v38 = vpop.f32.mrf.mxu0 }
 0x38b   : > { %v9509_v29 = vadd.f32 %v2446_v10, %v2319_v28  ;;  %v2545_v30 = vadd.f32 %v2544_v38, %v2407_v57  ;;  %v2185_v10 = vadd.f32 %v9490_v42, %v2039_v39  ;;  %v2431_v38 = vadd.f32 %v9499_v43, %v2305_v31 }
 0x38c   : > { %v7169_v41 = vpop.f32.mrf.mxu1  ;;  %v7189_v14 = vpop.f32.mrf.mxu0 }
 0x38d   : > { %v2312_v45 = vadd.f32 %v9494_v36, %v2185_v10 }
 0x38e   : > { %v2550_v18 = vpop.f32.mrf.mxu0  ;;  %v2652_v0 = vpop.f32.mrf.mxu1 }
 0x38f   : > { %v9516_v47 = vadd.f32 %v2652_v0, %v2539_v40  ;;  %v2551_v28 = vadd.f32 %v2550_v18, %v2415_v62  ;;  %v2439_v53 = vadd.f32 %v9504_v12, %v2312_v45 }
 0x390   : > { %v7192_v60 = vpop.f32.mrf.mxu0  ;;  %v7221_v52 = vpop.f32.mrf.mxu1 }
 0x391   : > { %v2693_v11 = vsel %vm2692_vm9, %v9516_v47, -inf }
 0x392   : > { %v2658_v55 = vpop.f32.mrf.mxu1  ;;  %2694 = vmax.xlane.f32.xlu1 %v2693_v11  ;;  %v2556_v19 = vpop.f32.mrf.mxu0 }
 0x393   : > { %v2659_v49 = vadd.f32 %v2658_v55, %v2545_v30  ;;  %v2557_v9 = vadd.f32 %v2556_v19, %v2423_v54 }
 0x394   : > { %v7195_v26 = vpop.f32.mrf.mxu0  ;;  %v7224_v33 = vpop.f32.mrf.mxu1 }
 0x395   : > { %v2696_v63 = vsel %vm2692_vm9, %v2659_v49, -inf }
 0x396   : > { %v2664_v2 = vpop.f32.mrf.mxu1  ;;  %2697 = vmax.xlane.f32.xlu0 %v2696_v63  ;;  %v2562_v59 = vpop.f32.mrf.mxu0 }
 0x397   : > { %v2665_v32 = vadd.f32 %v2664_v2, %v2551_v28  ;;  %v2563_v41 = vadd.f32 %v2562_v59, %v2431_v38 }
 0x398   : > { %v7198_v51 = vpop.f32.mrf.mxu0  ;;  %v7227_v24 = vpop.f32.mrf.mxu1 }
 0x399   : > { %v2699_v61 = vsel %vm2692_vm9, %v2665_v32, -inf }
 0x39a   : > { %v2670_v6 = vpop.f32.mrf.mxu1  ;;  %2700 = vmax.xlane.f32.xlu0 %v2699_v61  ;;  %v2568_v22 = vpop.f32.mrf.mxu0 }
 0x39b   : > { %v9536_v8 = vadd.f32 %v2670_v6, %v2557_v9  ;;  %v2569_v46 = vadd.f32 %v2568_v22, %v2439_v53 }
 0x39c   : > { %v7201_v23 = vpop.f32.mrf.mxu0  ;;  %v7230_v13 = vpop.f32.mrf.mxu1 }
 0x39d   : > { %v2702_v5 = vsel %vm2692_vm9, %v9536_v8, -inf }
 0x39e   : > { %v2676_v58 = vpop.f32.mrf.mxu1  ;;  %2703 = vmax.xlane.f32.xlu1 %v2702_v5  ;;  %v2574_v14 = vpop.f32.mrf.mxu0 }
 0x39f   : > { %v2677_v50 = vadd.f32 %v2676_v58, %v2563_v41  ;;  %v2575_v12 = vadd.f32 %v2574_v14, %v9509_v29 }
 0x3a0   : > { %v7204_v40 = vpop.f32.mrf.mxu0  ;;  %v7233_v42 = vpop.f32.mrf.mxu1 }
 0x3a1   : > { %v2705_v43 = vsel %vm2692_vm9, %v2677_v50, -inf }
 0x3a2   : > { %v2682_v18 = vpop.f32.mrf.mxu1  ;;  %2706 = vmax.xlane.f32.xlu0 %v2705_v43 }
 0x3a3   : > { %v2683_v0 = vadd.f32 %v2682_v18, %v2569_v46 }
 0x3a4   : > { %v7236_v56 = vpop.f32.mrf.mxu1 }
 0x3a5   : > { %v2708_v36 = vsel %vm2692_vm9, %v2683_v0, -inf }
 0x3a6   : > { %v2688_v57 = vpop.f32.mrf.mxu1  ;;  %2709 = vmax.xlane.f32.xlu1 %v2708_v36 }
 0x3a7   : > { %v2689_v52 = vadd.f32 %v2688_v57, %v2575_v12 }
 0x3a8   : > { %v7239_v60 = vpop.f32.mrf.mxu1 }
 0x3a9   : > { %v2712_v34 = vsel %vm2711_vm10, %v2689_v52, -inf }
 0x3b8   : > { %2783 = vrot.lane.b32.xlu0 %v9098_v44, %s8129_s16 }
 0x3d7   : > { %2713 = vmax.xlane.f32.xlu0 %v2712_v34 }
 0x41b   : > { %v2695_v17 = vpop.xlane.xlu1 %2694 }
 0x41c   : > { %v2715_v30 = vsub.f32 %v9516_v47, %v2695_v17 }
 0x41e   : > { %v2722_v11 = vmul.f32 1.442695, %v2715_v30 }
 0x41f   : > { %v2698_v1 = vpop.xlane.xlu0 %2697 }
 0x420   : > { %8063 = vpow2.f32 %v2722_v11  ;;  %v2716_v55 = vsub.f32 %v2659_v49, %v2698_v1 }
 0x422   : > { %v2724_v19 = vmul.f32 1.442695, %v2716_v55 }
 0x423   : > { %v2701_v4 = vpop.xlane.xlu0 %2700 }
 0x424   : > { %8065 = vpow2.f32 %v2724_v19  ;;  %v2717_v62 = vsub.f32 %v2665_v32, %v2701_v4 }
 0x426   : > { %v2726_v26 = vmul.f32 1.442695, %v2717_v62 }
 0x427   : > { %v2704_v51 = vpop.xlane.xlu1 %2703 }
 0x428   : > { %8067 = vpow2.f32 %v2726_v26  ;;  %v2718_v24 = vsub.f32 %v9536_v8, %v2704_v51 }
 0x42a   : > { %v2728_v39 = vmul.f32 1.442695, %v2718_v24 }
 0x42b   : > { %v2707_v33 = vpop.xlane.xlu0 %2706 }
 0x42c   : > { %v2719_v31 = vsub.f32 %v2677_v50, %v2707_v33  ;;  %8069 = vpow2.f32 %v2728_v39 }
 0x42d   : > { %v9549_v29 = vpop.eup %8063 }
 0x42e   : > { %v2736_v7 = vsel %vm2692_vm9, %v9549_v29, 0.0  ;;  %v2730_v61 = vmul.f32 1.442695, %v2719_v31 }
 0x42f   : > { %v2784_v21 = vpop.permute.xlu0 %2783  ;;  %2737 = vadd.xlane.f32.xlu1 %v2736_v7  ;;  %v2710_v9 = vpop.xlane.xlu1 %2709 }
 0x430   : > { %v2813_v47 = vsel %vm2812_vm11, %v2784_v21, 0  ;;  %v2720_v6 = vsub.f32 %v2683_v0, %v2710_v9  ;;  %8071 = vpow2.f32 %v2730_v61 }
 0x431   : > { %v9554_v28 = vpop.eup %8065  ;;  %v9556_v49 = vand.u32 4294901760, %v2813_v47 }
 0x432   : > { %v2739_v63 = vsel %vm2692_vm9, %v9554_v28, 0.0  ;;  %v2732_v22 = vmul.f32 1.442695, %v2720_v6 }
 0x433   : > { %v9561_v37 = vsub.f32 %v2813_v47, %v9556_v49  ;;  %7241 = vmatpush3.msra.mxu0 %v9556_v49  ;;  %2740 = vadd.xlane.f32.xlu0 %v2739_v63 }
 0x434   : > { %7242 = vmatprep.subr.mxu0 %v11268_v3  ;;  %8073 = vpow2.f32 %v2732_v22 }
 0x435   : > { %v9565_v2 = vpop.eup %8067  ;;  %v2978_v59 = vand.u32 4294901760, %v9561_v37 }
 0x436   : > { %v2742_v16 = vsel %vm2692_vm9, %v9565_v2, 0.0 }
 0x437   : > { %v2979_v54 = vsub.f32 %v9561_v37, %v2978_v59  ;;  %2743 = vadd.xlane.f32.xlu1 %v2742_v16 }
 0x439   : > { %v2980_v32 = vand.u32 4294901760, %v2979_v54  ;;  %v9579_v13 = vpop.eup %8069 }
 0x43a   : > { %v2745_v45 = vsel %vm2692_vm9, %v9579_v13, 0.0 }
 0x43b   : > { %7276 = vmatpush3.msra.mxu1 %v2980_v32 }
 0x43c   : > { %7277 = vmatprep.subr.mxu1 %v11268_v3 }
 0x43d   : > { %v9583_v41 = vpop.eup %8071 }
 0x43e   : > { %v2748_v8 = vsel %vm2692_vm9, %v9583_v41, 0.0 }
 0x441   : > { %v9587_v5 = vpop.eup %8073 }
 0x442   : > { %v2751_v58 = vsel %vm2692_vm9, %v9587_v5, 0.0 }
 0x448   : > { %2781 = vrot.lane.b32.xlu1 %v9092_v48, %s8129_s16 }
 0x449   : > { %2779 = vrot.lane.b32.xlu0 %v9105_v20, %s8129_s16 }
 0x460   : > { %v2714_v10 = vpop.xlane.xlu0 %2713 }
 0x461   : > { %v2721_v38 = vsub.f32 %v2689_v52, %v2714_v10 }
 0x463   : > { %v2734_v23 = vmul.f32 1.442695, %v2721_v38 }
 0x465   : > { %8075 = vpow2.f32 %v2734_v23 }
 0x468   : > { %2746 = vadd.xlane.f32.xlu0 %v2745_v45 }
 0x46c   : > { %2749 = vadd.xlane.f32.xlu1 %v2748_v8 }
 0x470   : > { %2752 = vadd.xlane.f32.xlu1 %v2751_v58 }
 0x472   : > { %v9591_v14 = vpop.eup %8075 }
 0x473   : > { %v2754_v53 = vsel %vm2711_vm10, %v9591_v14, 0.0 }
 0x474   : > { %2755 = vadd.xlane.f32.xlu1 %v2754_v53 }
 0x47e   : > { %2777 = vrot.lane.b32.xlu0 %v9096_v15, %s8129_s16 }
 0x482   : > { %2775 = vrot.lane.b32.xlu0 %v9110_v25, %s8129_s16 }
 0x485   : > { %3613 = vrot.lane.b32.xlu1 %v9102_v35, %s8132_s20 }
 0x486   : > { %2773 = vrot.lane.b32.xlu0 %v9102_v35, %s8129_s16 }
 0x489   : > { %3603 = vrot.lane.b32.xlu1 %v9096_v15, %s8133_s21 }
 0x48a   : > { %2771 = vrot.lane.b32.xlu0 %v9113_v27, %s8129_s16 }
 0x48d   : > { %3607 = vrot.lane.b32.xlu1 %v9092_v48, %s8133_s21 }
 0x48e   : > { %3623 = vrot.lane.b32.xlu0 %v9098_v44, %s8132_s20 }
 0x492   : > { %3621 = vrot.lane.b32.xlu0 %v9092_v48, %s8132_s20 }
 0x496   : > { %3619 = vrot.lane.b32.xlu0 %v9105_v20, %s8132_s20 }
 0x49a   : > { %3617 = vrot.lane.b32.xlu0 %v9096_v15, %s8132_s20 }
 0x49e   : > { %3615 = vrot.lane.b32.xlu0 %v9110_v25, %s8132_s20 }
 0x4a2   : > { %3611 = vrot.lane.b32.xlu0 %v9113_v27, %s8132_s20 }
 0x4a6   : > { %3597 = vrot.lane.b32.xlu0 %v9113_v27, %s8133_s21 }
 0x4aa   : > { %3599 = vrot.lane.b32.xlu0 %v9102_v35, %s8133_s21 }
 0x4ae   : > { %3601 = vrot.lane.b32.xlu0 %v9110_v25, %s8133_s21 }
 0x4b2   : > { %3605 = vrot.lane.b32.xlu0 %v9105_v20, %s8133_s21 }
 0x4b6   : > { %3609 = vrot.lane.b32.xlu0 %v9098_v44, %s8133_s21 }
 0x4b8   : > { %v2738_v50 = vpop.xlane.xlu1 %2737 }
 0x4b9   : > { %8077 = vrcp.f32 %v2738_v50 }
 0x4bc   : > { %v2741_v40 = vpop.xlane.xlu0 %2740 }
 0x4bd   : > { %8079 = vrcp.f32 %v2741_v40 }
 0x4c0   : > { %v2744_v42 = vpop.xlane.xlu1 %2743  ;;  %v2780_v46 = vpop.permute.xlu0 %2779 }
 0x4c1   : > { %v9617_v43 = vand.u32 4294901760, %v2780_v46  ;;  %8081 = vrcp.f32 %v2744_v42 }
 0x4c3   : > { %v9620_v18 = vsub.f32 %v2780_v46, %v9617_v43 }
 0x4c4   : > { %v2782_v0 = vpop.permute.xlu1 %2781 }
 0x4c5   : > { %v9622_v56 = vand.u32 4294901760, %v2782_v0  ;;  %v2992_v36 = vand.u32 4294901760, %v9620_v18 }
 0x4c6   : > { %v8078_v30 = vpop.eup %8077 }
 0x4c7   : > { %v9626_v57 = vsub.f32 %v2782_v0, %v9622_v56  ;;  %7243 = vmatpush3.msra.mxu0 %v9622_v56  ;;  %v2993_v12 = vsub.f32 %v9620_v18, %v2992_v36  ;;  %v2764_v11 = vmul.f32 %v8078_v30, %v9549_v29 }
 0x4c8   : > { %7244 = vmatprep.subr.mxu0 %v11268_v3 }
 0x4c9   : > { %v2985_v60 = vand.u32 4294901760, %v9626_v57  ;;  %7245 = vmatpush3.msra.mxu0 %v9617_v43  ;;  %v2994_v17 = vand.u32 4294901760, %v2993_v12  ;;  %v2792_v55 = vsel %vm2692_vm9, %v2764_v11, 0 }
 0x4ca   : > { %7246 = vmatprep.subr.mxu0 %v11268_v3  ;;  %v8080_v1 = vpop.eup %8079  ;;  %v9644_v26 = vand.u32 4294901760, %v2792_v55 }
 0x4cb   : > { %v2986_v52 = vsub.f32 %v9626_v57, %v2985_v60  ;;  %v2765_v19 = vmul.f32 %v8080_v1, %v9554_v28 }
 0x4cc   : > { %v9651_v29 = vsub.f32 %v2792_v55, %v9644_v26 }
 0x4cd   : > { %v2987_v34 = vand.u32 4294901760, %v2986_v52  ;;  %v2795_v33 = vsel %vm2692_vm9, %v2765_v19, 0 }
 0x4ce   : > { %v8082_v4 = vpop.eup %8081  ;;  %v9653_v16 = vand.u32 4294901760, %v2795_v33  ;;  %v2889_v39 = vand.u32 4294901760, %v9651_v29 }
 0x4cf   : > { %7278 = vmatpush3.msra.mxu1 %v2987_v34  ;;  %v2766_v7 = vmul.f32 %v8082_v4, %v9565_v2 }
 0x4d0   : > { %7279 = vmatprep.subr.mxu1 %v11268_v3  ;;  %v9666_v31 = vsub.f32 %v2795_v33, %v9653_v16  ;;  %v2890_v58 = vsub.f32 %v9651_v29, %v2889_v39 }
 0x4d1   : > { %7280 = vmatpush3.msra.mxu1 %v2994_v17  ;;  %v2798_v54 = vsel %vm2692_vm9, %v2766_v7, 0 }
 0x4d2   : > { %7281 = vmatprep.subr.mxu1 %v11268_v3  ;;  %v9668_v9 = vand.u32 4294901760, %v2798_v54  ;;  %v2899_v53 = vand.u32 4294901760, %v9666_v31  ;;  %v2891_v30 = vand.u32 4294901760, %v2890_v58 }
 0x4d4   : > { %v9686_v50 = vsub.f32 %v2798_v54, %v9668_v9  ;;  %v2900_v11 = vsub.f32 %v9666_v31, %v2899_v53 }
 0x4d6   : > { %v2909_v1 = vand.u32 4294901760, %v9686_v50 }
 0x4f1   : > { %v2747_v62 = vpop.xlane.xlu0 %2746 }
 0x4f2   : > { %8083 = vrcp.f32 %v2747_v62 }
 0x4f5   : > { %v2750_v21 = vpop.xlane.xlu1 %2749  ;;  %v2778_v47 = vpop.permute.xlu0 %2777 }
 0x4f6   : > { %8085 = vrcp.f32 %v2750_v21  ;;  %v9648_v63 = vand.u32 4294901760, %v2778_v47 }
 0x4f8   : > { %v9656_v28 = vsub.f32 %v2778_v47, %v9648_v63  ;;  %7247 = vmatpush3.msra.mxu0 %v9648_v63  ;;  %v2901_v47 = vand.u32 4294901760, %v2900_v11 }
 0x4f9   : > { %v2753_v32 = vpop.xlane.xlu1 %2752  ;;  %v2776_v51 = vpop.permute.xlu0 %2775  ;;  %7248 = vmatprep.subr.mxu0 %v11268_v3 }
 0x4fa   : > { %v2999_v2 = vand.u32 4294901760, %v9656_v28  ;;  %8087 = vrcp.f32 %v2753_v32  ;;  %v9662_v24 = vand.u32 4294901760, %v2776_v51 }
 0x4fc   : > { %v3000_v61 = vsub.f32 %v9656_v28, %v2999_v2  ;;  %v9674_v6 = vsub.f32 %v2776_v51, %v9662_v24  ;;  %7249 = vmatpush3.msra.mxu0 %v9662_v24 }
 0x4fd   : > { %v2756_v22 = vpop.xlane.xlu1 %2755  ;;  %v2774_v10 = vpop.permute.xlu0 %2773  ;;  %7250 = vmatprep.subr.mxu0 %v11268_v3 }
 0x4fe   : > { %v3001_v38 = vand.u32 4294901760, %v3000_v61  ;;  %v3006_v23 = vand.u32 4294901760, %v9674_v6  ;;  %v9679_v45 = vand.u32 4294901760, %v2774_v10  ;;  %8089 = vrcp.f32 %v2756_v22 }
 0x4ff   : > { %v8084_v8 = vpop.eup %8083 }
 0x500   : > { %v3007_v40 = vsub.f32 %v9674_v6, %v3006_v23  ;;  %v9692_v42 = vsub.f32 %v2774_v10, %v9679_v45  ;;  %7251 = vmatpush3.msra.mxu0 %v9679_v45  ;;  %7282 = vmatpush3.msra.mxu1 %v3001_v38  ;;  %v2767_v46 = vmul.f32 %v8084_v8, %v9579_v13 }
 0x501   : > { %v2772_v0 = vpop.permute.xlu0 %2771  ;;  %7252 = vmatprep.subr.mxu0 %v11268_v3  ;;  %7283 = vmatprep.subr.mxu1 %v11268_v3 }
 0x502   : > { %v3008_v12 = vand.u32 4294901760, %v3007_v40  ;;  %v3013_v52 = vand.u32 4294901760, %v9692_v42  ;;  %v9699_v34 = vand.u32 4294901760, %v2772_v0  ;;  %v2801_v13 = vsel %vm2692_vm9, %v2767_v46, 0 }
 0x503   : > { %v8086_v17 = vpop.eup %8085  ;;  %v9713_v4 = vand.u32 4294901760, %v2801_v13 }
 0x504   : > { %v3014_v55 = vsub.f32 %v9692_v42, %v3013_v52  ;;  %v9710_v19 = vsub.f32 %v2772_v0, %v9699_v34  ;;  %7253 = vmatpush3.msra.mxu0 %v9699_v34  ;;  %7284 = vmatpush3.msra.mxu1 %v3008_v12  ;;  %v2768_v62 = vmul.f32 %v8086_v17, %v9583_v41 }
 0x505   : > { %7255 = vmatmul.mubr.f32.vlgmr.msra.gmra.mxu0 %v2891_v30  ;;  %7310 = vmatprep.subr.mxu0 %v11268_v3  ;;  %v2910_v41 = vsub.f32 %v9686_v50, %v2909_v1  ;;  %v9727_v54 = vsub.f32 %v2801_v13, %v9713_v4 }
 0x506   : > { %v3015_v33 = vand.u32 4294901760, %v3014_v55  ;;  %v3020_v7 = vand.u32 4294901760, %v9710_v19  ;;  %7311 = vmatpush3.msra.mxu0 %v9561_v37  ;;  %7285 = vmatprep.subr.mxu1 %v11268_v3  ;;  %v2804_v51 = vsel %vm2692_vm9, %v2768_v62, 0 }
 0x507   : > { %v8088_v21 = vpop.eup %8087  ;;  %7312 = vmatprep.subr.mxu0 %v11268_v3  ;;  %7257 = vmatprep.mubr.msk.f32.mxu0 %vm8130_vm3, %v11268_v3  ;;  %v2919_v22 = vand.u32 4294901760, %v9727_v54  ;;  %v9739_v38 = vand.u32 4294901760, %v2804_v51  ;;  %v2911_v8 = vand.u32 4294901760, %v2910_v41 }
 0x508   : > { %v3021_v32 = vsub.f32 %v9710_v19, %v3020_v7  ;;  %7286 = vmatpush3.msra.mxu1 %v3015_v33  ;;  %7313 = vmatpush3.msra.mxu0 %v9626_v57  ;;  %v2769_v61 = vmul.f32 %v8088_v21, %v9587_v5 }
 0x509   : > { %7258 = vmatmul.mubr.f32.gmra.mxu0 %v2901_v47  ;;  %7314 = vmatprep.subr.mxu0 %v11268_v3  ;;  %v9746_v5 = vsub.f32 %v2804_v51, %v9739_v38  ;;  %v2920_v46 = vsub.f32 %v9727_v54, %v2919_v22 }
 0x50a   : > { %v3022_v10 = vand.u32 4294901760, %v3021_v32  ;;  %7315 = vmatpush3.msra.mxu0 %v9620_v18  ;;  %7287 = vmatprep.subr.mxu1 %v11268_v3  ;;  %v2807_v58 = vsel %vm2692_vm9, %v2769_v61, 0  ;;  %v3624_v61 = vpop.permute.xlu0 %3623 }
 0x50b   : > { %7316 = vmatprep.subr.mxu0 %v11268_v3  ;;  %7260 = vmatprep.mubr.msk.f32.mxu0 %vm8130_vm3, %v11268_v3  ;;  %v8090_v40 = vpop.eup %8089  ;;  %v9753_v0 = vand.u32 4294901760, %v2807_v58  ;;  %v2929_v12 = vand.u32 4294901760, %v9746_v5  ;;  %v2921_v11 = vand.u32 4294901760, %v2920_v46 }
 0x50c   : > { %7288 = vmatpush3.msra.mxu1 %v3022_v10  ;;  %7317 = vmatpush3.msra.mxu0 %v9656_v28  ;;  %v2770_v30 = vmul.f32 %v8090_v40, %v9591_v14 }
 0x50d   : > { %7261 = vmatmul.mubr.f32.gmra.mxu0 %v2911_v8  ;;  %7290 = vmatmul.mubr.f32.vlgmr.msra.gmra.mxu1 %v9644_v26  ;;  %v9763_v17 = vsub.f32 %v2807_v58, %v9753_v0  ;;  %v2930_v13 = vsub.f32 %v9746_v5, %v2929_v12 }
 0x50e   : > { %7318 = vmatprep.subr.mxu0 %v11268_v3  ;;  %7345 = vmatprep.subr.mxu1 %v11268_v3  ;;  %v2810_v14 = vsel %vm2692_vm9, %v2770_v30, 0  ;;  %v3622_v8 = vpop.permute.xlu0 %3621 }
 0x50f   : > { %7319 = vmatpush3.msra.mxu0 %v9674_v6  ;;  %7346 = vmatpush3.msra.mxu1 %v9556_v49  ;;  %v2939_v55 = vand.u32 4294901760, %v9763_v17  ;;  %v9780_v62 = vand.u32 4294901760, %v2810_v14  ;;  %v2931_v33 = vand.u32 4294901760, %v2930_v13  ;;  %v3614_v6 = vpop.permute.xlu1 %3613 }
 0x510   : > { %7320 = vmatprep.subr.mxu0 %v11268_v3  ;;  %7347 = vmatprep.subr.mxu1 %v11268_v3 }
 0x511   : > { %7263 = vmatprep.mubr.msk.f32.mxu0 %vm8130_vm3, %v11268_v3  ;;  %7292 = vmatprep.mubr.msk.f32.mxu1 %vm8130_vm3, %v11268_v3  ;;  %v2940_v21 = vsub.f32 %v9763_v17, %v2939_v55  ;;  %v9791_v47 = vsub.f32 %v2810_v14, %v9780_v62 }
 0x512   : > { %7321 = vmatpush3.msra.mxu0 %v9692_v42  ;;  %7348 = vmatpush3.msra.mxu1 %v9622_v56  ;;  %v3620_v37 = vpop.permute.xlu0 %3619 }
 0x513   : > { %7264 = vmatmul.mubr.f32.gmra.mxu0 %v2921_v11  ;;  %7293 = vmatmul.mubr.f32.gmra.mxu1 %v9653_v16  ;;  %v2949_v41 = vand.u32 4294901760, %v9791_v47  ;;  %v2941_v32 = vand.u32 4294901760, %v2940_v21 }
 0x514   : > { %7322 = vmatprep.subr.mxu0 %v11268_v3  ;;  %7349 = vmatprep.subr.mxu1 %v11268_v3 }
 0x515   : > { %7323 = vmatpush3.msra.mxu0 %v9710_v19  ;;  %7350 = vmatpush3.msra.mxu1 %v9617_v43  ;;  %v2950_v51 = vsub.f32 %v9791_v47, %v2949_v41 }
 0x516   : > { %7351 = vmatprep.subr.mxu1 %v11268_v3  ;;  %7266 = vmatprep.mubr.msk.f32.mxu0 %vm8130_vm3, %v11268_v3 }
 0x517   : > { %7295 = vmatprep.mubr.msk.f32.mxu1 %vm8130_vm3, %v11268_v3  ;;  %7352 = vmatpush3.msra.mxu1 %v9648_v63  ;;  %v2951_v10 = vand.u32 4294901760, %v2950_v51 }
 0x518   : > { %7267 = vmatmul.mubr.f32.gmra.mxu0 %v2931_v33  ;;  %7296 = vmatmul.mubr.f32.gmra.mxu1 %v9668_v9  ;;  %v3604_v33 = vpop.permute.xlu1 %3603 }
 0x519   : > { %7353 = vmatprep.subr.mxu1 %v11268_v3  ;;  %7269 = vmatprep.mubr.msk.f32.mxu0 %vm8130_vm3, %v11268_v3  ;;  %v3631_v51 = vsel %vm1881_vm8, %v3604_v33, 0 }
 0x51a   : > { %7354 = vmatpush3.msra.mxu1 %v9662_v24  ;;  %7298 = vmatprep.mubr.msk.f32.mxu1 %vm8130_vm3, %v11268_v3 }
 0x51b   : > { %7355 = vmatprep.subr.mxu1 %v11268_v3  ;;  %7380 = vmatprep.subr.mxu0 %v11268_v3 }
 0x51c   : > { %7356 = vmatpush3.msra.mxu1 %v9679_v45  ;;  %7270 = vmatmul.mubr.f32.gmra.mxu0 %v2941_v32 }
 0x51d   : > { %7299 = vmatmul.mubr.f32.gmra.mxu1 %v9713_v4  ;;  %7357 = vmatprep.subr.mxu1 %v11268_v3 }
 0x51e   : > { %7358 = vmatpush3.msra.mxu1 %v9699_v34  ;;  %7272 = vmatprep.mubr.msk.f32.mxu0 %vm8130_vm3, %v11268_v3 }
 0x51f   : > { %7301 = vmatprep.mubr.msk.f32.mxu1 %vm8130_vm3, %v11268_v3  ;;  %7415 = vmatprep.subr.mxu1 %v11268_v3 }
 0x520   : > { %7273 = vmatmul.mubr.f32.gmra.mxu0 %v2951_v10 }
 0x521   : > { %7302 = vmatmul.mubr.f32.gmra.mxu1 %v9739_v38  ;;  %7324 = vmatprep.mubr.msk.f32.mxu0 %vm8130_vm3, %v11268_v3 }
 0x522   : > { %7304 = vmatprep.mubr.msk.f32.mxu1 %vm8130_vm3, %v11268_v3 }
 0x524   : > { %7325 = vmatmul.mubr.f32.vlgmr.msra.gmra.mxu0 %v9651_v29 }
 0x525   : > { %7305 = vmatmul.mubr.f32.gmra.mxu1 %v9753_v0  ;;  %7381 = vmatpush3.msra.mxu0 %v2978_v59  ;;  %v3618_v59 = vpop.permute.xlu0 %3617 }
 0x526   : > { %7382 = vmatprep.subr.mxu0 %v11268_v3  ;;  %7307 = vmatprep.mubr.msk.f32.mxu1 %vm8130_vm3, %v11268_v3 }
 0x527   : > { %7383 = vmatpush3.msra.mxu0 %v2985_v60  ;;  %7327 = vmatprep.mubr.msk.f32.mxu0 %vm8130_vm3, %v11268_v3 }
 0x528   : > { %7384 = vmatprep.subr.mxu0 %v11268_v3  ;;  %7328 = vmatmul.mubr.f32.gmra.mxu0 %v9666_v31 }
 0x529   : > { %7308 = vmatmul.mubr.f32.gmra.mxu1 %v9780_v62  ;;  %7385 = vmatpush3.msra.mxu0 %v2992_v36  ;;  %v3616_v18 = vpop.permute.xlu0 %3615 }
 0x52a   : > { %7386 = vmatprep.subr.mxu0 %v11268_v3  ;;  %7330 = vmatprep.mubr.msk.f32.mxu0 %vm8130_vm3, %v11268_v3 }
 0x52b   : > { %7387 = vmatpush3.msra.mxu0 %v2999_v2  ;;  %7359 = vmatprep.mubr.msk.f32.mxu1 %vm8130_vm3, %v11268_v3 }
 0x52c   : > { %7388 = vmatprep.subr.mxu0 %v11268_v3  ;;  %7331 = vmatmul.mubr.f32.gmra.mxu0 %v9686_v50  ;;  %v3643_v50 = vsel %vm1881_vm8, %v3616_v18, 0 }
 0x52d   : > { %7360 = vmatmul.mubr.f32.vlgmr.msra.gmra.mxu1 %v2889_v39  ;;  %7389 = vmatpush3.msra.mxu0 %v3006_v23  ;;  %v3612_v36 = vpop.permute.xlu0 %3611  ;;  %v3645_v39 = vsel %vm1881_vm8, %v3618_v59, 0 }
 0x52e   : > { %7416 = vmatpush3.msra.mxu1 %v9556_v49  ;;  %7390 = vmatprep.subr.mxu0 %v11268_v3  ;;  %v3651_v49 = vsel %vm1881_vm8, %v3624_v61, 0  ;;  %v3639_v11 = vsel %vm1881_vm8, %v3612_v36, 0 }
 0x52f   : > { %7417 = vmatprep.subr.mxu1 %v11268_v3  ;;  %7391 = vmatpush3.msra.mxu0 %v3013_v52  ;;  %v3641_v52 = vsel %vm1881_vm8, %v3614_v6, 0  ;;  %v10004_v32 = vand.u32 4294901760, %v3639_v11 }
 0x530   : > { %7418 = vmatpush3.msra.mxu1 %v9622_v56  ;;  %7333 = vmatprep.mubr.msk.f32.mxu0 %vm8130_vm3, %v11268_v3  ;;  %v3649_v56 = vsel %vm1881_vm8, %v3622_v8, 0  ;;  %v9968_v58 = vand.u32 4294901760, %v3641_v52 }
 0x531   : > { %7362 = vmatprep.mubr.msk.f32.mxu1 %vm8130_vm3, %v11268_v3  ;;  %7392 = vmatprep.subr.mxu0 %v11268_v3  ;;  %v9904_v60 = vand.u32 4294901760, %v3649_v56 }
 0x532   : > { %7419 = vmatprep.subr.mxu1 %v11268_v3  ;;  %7334 = vmatmul.mubr.f32.gmra.mxu0 %v9727_v54  ;;  %v9994_v14 = vsub.f32 %v3641_v52, %v9968_v58 }
 0x533   : > { %7363 = vmatmul.mubr.f32.gmra.mxu1 %v2899_v53  ;;  %7393 = vmatpush3.msra.mxu0 %v3020_v7  ;;  %v9917_v28 = vsub.f32 %v3649_v56, %v9904_v60  ;;  %v9938_v53 = vand.u32 4294901760, %v3645_v39  ;;  %v10031_v56 = vand.u32 4294901760, %v3631_v51 }
 0x534   : > { %7420 = vmatpush3.msra.mxu1 %v9617_v43  ;;  %7336 = vmatprep.mubr.msk.f32.mxu0 %vm8130_vm3, %v11268_v3  ;;  %v9884_v43 = vand.u32 4294901760, %v3651_v49 }
 0x535   : > { %7421 = vmatprep.subr.mxu1 %v11268_v3  ;;  %7365 = vmatprep.mubr.msk.f32.mxu1 %vm8130_vm3, %v11268_v3  ;;  %v3823_v23 = vand.u32 4294901760, %v9917_v28  ;;  %v9957_v54 = vsub.f32 %v3645_v39, %v9938_v53 }
 0x536   : > { %7422 = vmatpush3.msra.mxu1 %v9648_v63  ;;  %7337 = vmatmul.mubr.f32.gmra.mxu0 %v9746_v5  ;;  %v9899_v57 = vsub.f32 %v3651_v49, %v9884_v43  ;;  %v3647_v63 = vsel %vm1881_vm8, %v3620_v37, 0  ;;  %v10027_v49 = vsub.f32 %v3639_v11, %v10004_v32 }
 0x537   : > { %7423 = vmatprep.subr.mxu1 %v11268_v3  ;;  %7366 = vmatmul.mubr.f32.gmra.mxu1 %v2909_v1  ;;  %v9919_v2 = vand.u32 4294901760, %v3647_v63  ;;  %v3824_v19 = vsub.f32 %v9917_v28, %v3823_v23 }
 0x538   : > { %7424 = vmatpush3.msra.mxu1 %v9662_v24  ;;  %7339 = vmatprep.mubr.msk.f32.mxu0 %vm8130_vm3, %v11268_v3  ;;  %v3816_v29 = vand.u32 4294901760, %v9899_v57  ;;  %v3598_v24 = vpop.permute.xlu0 %3597 }
 0x539   : > { %7425 = vmatprep.subr.mxu1 %v11268_v3  ;;  %7368 = vmatprep.mubr.msk.f32.mxu1 %vm8130_vm3, %v11268_v3  ;;  %v3625_v1 = vsel %vm1881_vm8, %v3598_v24, 0  ;;  %v3825_v46 = vand.u32 4294901760, %v3824_v19 }
 0x53a   : > { %7426 = vmatpush3.msra.mxu1 %v9679_v45  ;;  %7340 = vmatmul.mubr.f32.gmra.mxu0 %v9763_v17  ;;  %v3817_v31 = vsub.f32 %v9899_v57, %v3816_v29  ;;  %v9936_v45 = vsub.f32 %v3647_v63, %v9919_v2  ;;  %v9964_v5 = vand.u32 4294901760, %v3625_v1 }
 0x53b   : > { %7427 = vmatprep.subr.mxu1 %v11268_v3  ;;  %7369 = vmatmul.mubr.f32.gmra.mxu1 %v2919_v22  ;;  %v9959_v22 = vand.u32 4294901760, %v3643_v50 }
 0x53c   : > { %7428 = vmatpush3.msra.mxu1 %v9699_v34  ;;  %7342 = vmatprep.mubr.msk.f32.mxu0 %vm8130_vm3, %v11268_v3  ;;  %v3600_v42 = vpop.permute.xlu0 %3599  ;;  %v3818_v34 = vand.u32 4294901760, %v3817_v31  ;;  %v3830_v7 = vand.u32 4294901760, %v9936_v45  ;;  %v9987_v13 = vsub.f32 %v3625_v1, %v9964_v5  ;;  %v3608_v31 = vpop.permute.xlu1 %3607 }
 0x53d   : > { %7371 = vmatprep.mubr.msk.f32.mxu1 %vm8130_vm3, %v11268_v3  ;;  %7450 = vmatprep.subr.mxu0 %v11268_v3  ;;  %v3627_v40 = vsel %vm1881_vm8, %v3600_v42, 0  ;;  %v9979_v17 = vsub.f32 %v3643_v50, %v9959_v22  ;;  %v3858_v50 = vand.u32 4294901760, %v10027_v49  ;;  %v10055_v42 = vsub.f32 %v3631_v51, %v10031_v56 }
 0x53e   : > { %7343 = vmatmul.mubr.f32.gmra.mxu0 %v9791_v47  ;;  %7485 = vmatprep.subr.mxu1 %v11268_v3  ;;  %v3727_v61 = vand.u32 4294901760, %v9987_v13 }
 0x53f   : > { %7372 = vmatmul.mubr.f32.gmra.mxu1 %v2929_v12  ;;  %7394 = vmatprep.mubr.msk.f32.mxu0 %vm8130_vm3, %v11268_v3  ;;  %v3837_v12 = vand.u32 4294901760, %v9957_v54 }
 0x540   : > { %7374 = vmatprep.mubr.msk.f32.mxu1 %vm8130_vm3, %v11268_v3  ;;  %v3602_v30 = vpop.permute.xlu0 %3601  ;;  %v3728_v36 = vsub.f32 %v9987_v13, %v3727_v61 }
 0x541   : > { %v3629_v21 = vsel %vm1881_vm8, %v3602_v30, 0  ;;  %v3838_v47 = vsub.f32 %v9957_v54, %v3837_v12  ;;  %v3757_v30 = vand.u32 4294901760, %v10055_v42 }
 0x542   : > { %7395 = vmatmul.mubr.f32.vlgmr.msra.gmra.mxu0 %v9644_v26  ;;  %v10015_v8 = vand.u32 4294901760, %v3629_v21  ;;  %v3729_v52 = vand.u32 4294901760, %v3728_v36 }
 0x543   : > { %7375 = vmatmul.mubr.f32.gmra.mxu1 %v2939_v55  ;;  %7451 = vmatpush3.xpose.msra.mxu0 %v9884_v43  ;;  %v9989_v55 = vand.u32 4294901760, %v3627_v40  ;;  %v3839_v37 = vand.u32 4294901760, %v3838_v47  ;;  %v3758_v51 = vsub.f32 %v10055_v42, %v3757_v30 }
 0x544   : > { %7377 = vmatprep.mubr.msk.f32.mxu1 %vm8130_vm3, %v11268_v3  ;;  %7397 = vmatprep.mubr.msk.f32.mxu0 %vm8130_vm3, %v11268_v3  ;;  %v3606_v18 = vpop.permute.xlu0 %3605  ;;  %v10040_v24 = vsub.f32 %v3629_v21, %v10015_v8 }
 0x545   : > { %7452 = vmatprep.subr.mxu0 %v11268_v3  ;;  %v10013_v10 = vsub.f32 %v3627_v40, %v9989_v55  ;;  %v3633_v39 = vsel %vm1881_vm8, %v3606_v18, 0  ;;  %v3635_v40 = vsel %vm1881_vm8, %v3608_v31, 0 }
 0x546   : > { %7398 = vmatmul.mubr.f32.gmra.mxu0 %v9653_v16  ;;  %v3747_v1 = vand.u32 4294901760, %v10040_v24  ;;  %v10063_v19 = vand.u32 4294901760, %v3633_v39  ;;  %v10078_v11 = vand.u32 4294901760, %v3635_v40 }
 0x547   : > { %7378 = vmatmul.mubr.f32.gmra.mxu1 %v2949_v41  ;;  %7453 = vmatpush3.xpose.msra.mxu0 %v9904_v60  ;;  %v3844_v41 = vand.u32 4294901760, %v9979_v17  ;;  %v3737_v63 = vand.u32 4294901760, %v10013_v10 }
 0x548   : > { %7400 = vmatprep.mubr.msk.f32.mxu0 %vm8130_vm3, %v11268_v3  ;;  %7429 = vmatprep.mubr.msk.f32.mxu1 %vm8130_vm3, %v11268_v3  ;;  %v3748_v21 = vsub.f32 %v10040_v24, %v3747_v1 }
 0x549   : > { %7454 = vmatprep.subr.mxu0 %v11268_v3  ;;  %v3845_v59 = vsub.f32 %v9979_v17, %v3844_v41 }
 0x54a   : > { %7401 = vmatmul.mubr.f32.gmra.mxu0 %v9668_v9 }
 0x54b   : > { %7430 = vmatmul.mubr.f32.vlgmr.msra.gmra.mxu1 %v9644_v26  ;;  %7455 = vmatpush3.xpose.msra.mxu0 %v9919_v2  ;;  %v3831_v26 = vsub.f32 %v9936_v45, %v3830_v7  ;;  %v3846_v6 = vand.u32 4294901760, %v3845_v59  ;;  %v3749_v59 = vand.u32 4294901760, %v3748_v21 }
 0x54c   : > { %7486 = vmatpush3.xpose.msra.mxu1 %v3818_v34  ;;  %7403 = vmatprep.mubr.msk.f32.mxu0 %vm8130_vm3, %v11268_v3  ;;  %v3738_v34 = vsub.f32 %v10013_v10, %v3737_v63 }
 0x54d   : > { %7432 = vmatprep.mubr.msk.f32.mxu1 %vm8130_vm3, %v11268_v3  ;;  %7456 = vmatprep.subr.mxu0 %v11268_v3 }
 0x54e   : > { %7487 = vmatprep.subr.mxu1 %v11268_v3  ;;  %7404 = vmatmul.mubr.f32.gmra.mxu0 %v9713_v4  ;;  %v3739_v33 = vand.u32 4294901760, %v3738_v34 }
 0x54f   : > { %7433 = vmatmul.mubr.f32.gmra.mxu1 %v9653_v16  ;;  %7457 = vmatpush3.xpose.msra.mxu0 %v9938_v53  ;;  %v3832_v16 = vand.u32 4294901760, %v3831_v26  ;;  %v3610_v26 = vpop.permute.xlu0 %3609 }
 0x550   : > { %7488 = vmatpush3.xpose.msra.mxu1 %v3825_v46  ;;  %7406 = vmatprep.mubr.msk.f32.mxu0 %vm8130_vm3, %v11268_v3  ;;  %v3859_v46 = vsub.f32 %v10027_v49, %v3858_v50  ;;  %v3637_v47 = vsel %vm1881_vm8, %v3610_v26, 0 }
 0x551   : > { %7435 = vmatprep.mubr.msk.f32.mxu1 %vm8130_vm3, %v11268_v3  ;;  %7458 = vmatprep.subr.mxu0 %v11268_v3  ;;  %v10102_v36 = vand.u32 4294901760, %v3637_v47 }
 0x552   : > { %7489 = vmatprep.subr.mxu1 %v11268_v3  ;;  %7407 = vmatmul.mubr.f32.gmra.mxu0 %v9739_v38 }
 0x553   : > { %7436 = vmatmul.mubr.f32.gmra.mxu1 %v9668_v9  ;;  %7459 = vmatpush3.xpose.msra.mxu0 %v9959_v22  ;;  %v3851_v9 = vand.u32 4294901760, %v9994_v14  ;;  %v10117_v31 = vsub.f32 %v3637_v47, %v10102_v36 }
 0x554   : > { %7490 = vmatpush3.xpose.msra.mxu1 %v3832_v16  ;;  %7409 = vmatprep.mubr.msk.f32.mxu0 %vm8130_vm3, %v11268_v3  ;;  %v10084_v16 = vsub.f32 %v3633_v39, %v10063_v19 }
 0x555   : > { %7438 = vmatprep.mubr.msk.f32.mxu1 %vm8130_vm3, %v11268_v3  ;;  %7460 = vmatprep.subr.mxu0 %v11268_v3  ;;  %v3787_v34 = vand.u32 4294901760, %v10117_v31 }
 0x556   : > { %7491 = vmatprep.subr.mxu1 %v11268_v3  ;;  %7410 = vmatmul.mubr.f32.gmra.mxu0 %v9753_v0  ;;  %v3767_v18 = vand.u32 4294901760, %v10084_v16 }
 0x557   : > { %7439 = vmatmul.mubr.f32.gmra.mxu1 %v9713_v4  ;;  %7461 = vmatpush3.xpose.msra.mxu0 %v9968_v58  ;;  %v3852_v4 = vsub.f32 %v9994_v14, %v3851_v9 }
 0x558   : > { %7492 = vmatpush3.xpose.msra.mxu1 %v3839_v37  ;;  %7412 = vmatprep.mubr.msk.f32.mxu0 %vm8130_vm3, %v11268_v3  ;;  %v10099_v37 = vsub.f32 %v3635_v40, %v10078_v11 }
 0x559   : > { %7441 = vmatprep.mubr.msk.f32.mxu1 %vm8130_vm3, %v11268_v3  ;;  %7462 = vmatprep.subr.mxu0 %v11268_v3 }
 0x55a   : > { %7493 = vmatprep.subr.mxu1 %v11268_v3  ;;  %7413 = vmatmul.mubr.f32.gmra.mxu0 %v9780_v62  ;;  %v3777_v39 = vand.u32 4294901760, %v10099_v37 }
 0x55b   : > { %7442 = vmatmul.mubr.f32.gmra.mxu1 %v9739_v38  ;;  %7463 = vmatpush3.xpose.msra.mxu0 %v10004_v32  ;;  %v3853_v38 = vand.u32 4294901760, %v3852_v4  ;;  %v3768_v4 = vsub.f32 %v10084_v16, %v3767_v18 }
 0x55c   : > { %7494 = vmatpush3.xpose.msra.mxu1 %v3846_v6  ;;  %7444 = vmatprep.mubr.msk.f32.mxu1 %vm8130_vm3, %v11268_v3  ;;  %v3778_v6 = vsub.f32 %v10099_v37, %v3777_v39 }
 0x55d   : > { %7464 = vmatprep.mubr.msk.f32.mxu0 %vm8130_vm3, %v11268_v3  ;;  %7495 = vmatprep.subr.mxu1 %v11268_v3 }
 0x55e   : > { %7520 = vmatprep.subr.mxu0 %v11268_v3  ;;  %7465 = vmatmul.mubr.f32.vlgmr.msra.gmra.mxu0 %v3729_v52  ;;  %v3769_v52 = vand.u32 4294901760, %v3768_v4  ;;  %v3779_v40 = vand.u32 4294901760, %v3778_v6 }
 0x55f   : > { %7445 = vmatmul.mubr.f32.gmra.mxu1 %v9753_v0  ;;  %7521 = vmatpush3.xpose.msra.mxu0 %v9899_v57  ;;  %v3860_v0 = vand.u32 4294901760, %v3859_v46 }
 0x560   : > { %7496 = vmatpush3.xpose.msra.mxu1 %v3853_v38  ;;  %7447 = vmatprep.mubr.msk.f32.mxu1 %vm8130_vm3, %v11268_v3  ;;  %v3788_v38 = vsub.f32 %v10117_v31, %v3787_v34 }
 0x561   : > { %7467 = vmatprep.mubr.msk.f32.mxu0 %vm8130_vm3, %v11268_v3  ;;  %7497 = vmatprep.subr.mxu1 %v11268_v3 }
 0x562   : > { %7522 = vmatprep.subr.mxu0 %v11268_v3  ;;  %7468 = vmatmul.mubr.f32.gmra.mxu0 %v3739_v33  ;;  %v3789_v46 = vand.u32 4294901760, %v3788_v38 }
 0x563   : > { %7448 = vmatmul.mubr.f32.gmra.mxu1 %v9780_v62  ;;  %7523 = vmatpush3.xpose.msra.mxu0 %v9917_v28  ;;  %v3759_v62 = vand.u32 4294901760, %v3758_v51 }
 0x564   : > { %7498 = vmatpush3.xpose.msra.mxu1 %v3860_v0  ;;  %7470 = vmatprep.mubr.msk.f32.mxu0 %vm8130_vm3, %v11268_v3 }
 0x565   : > { %7499 = vmatprep.mubr.msk.f32.mxu1 %vm8130_vm3, %v11268_v3  ;;  %7524 = vmatprep.subr.mxu0 %v11268_v3 }
 0x566   : > { %7555 = vmatprep.subr.mxu1 %v11268_v3  ;;  %7471 = vmatmul.mubr.f32.gmra.mxu0 %v3749_v59 }
 0x567   : > { %7500 = vmatmul.mubr.f32.vlgmr.msra.gmra.mxu1 %v9964_v5  ;;  %7525 = vmatpush3.xpose.msra.mxu0 %v9936_v45 }
 0x568   : > { %7556 = vmatpush3.xpose.msra.mxu1 %v9884_v43  ;;  %7473 = vmatprep.mubr.msk.f32.mxu0 %vm8130_vm3, %v11268_v3 }
 0x569   : > { %7502 = vmatprep.mubr.msk.f32.mxu1 %vm8130_vm3, %v11268_v3  ;;  %7526 = vmatprep.subr.mxu0 %v11268_v3 }
 0x56a   : > { %7557 = vmatprep.subr.mxu1 %v11268_v3  ;;  %7474 = vmatmul.mubr.f32.gmra.mxu0 %v3759_v62 }
 0x56b   : > { %7503 = vmatmul.mubr.f32.gmra.mxu1 %v9989_v55  ;;  %7527 = vmatpush3.xpose.msra.mxu0 %v9957_v54 }
 0x56c   : > { %7558 = vmatpush3.xpose.msra.mxu1 %v9904_v60  ;;  %7476 = vmatprep.mubr.msk.f32.mxu0 %vm8130_vm3, %v11268_v3 }
 0x56d   : > { %7505 = vmatprep.mubr.msk.f32.mxu1 %vm8130_vm3, %v11268_v3  ;;  %7528 = vmatprep.subr.mxu0 %v11268_v3 }
 0x56e   : > { %7559 = vmatprep.subr.mxu1 %v11268_v3  ;;  %7477 = vmatmul.mubr.f32.gmra.mxu0 %v3769_v52 }
 0x56f   : > { %7506 = vmatmul.mubr.f32.gmra.mxu1 %v10015_v8  ;;  %7529 = vmatpush3.xpose.msra.mxu0 %v9979_v17 }
 0x570   : > { %7560 = vmatpush3.xpose.msra.mxu1 %v9919_v2  ;;  %7479 = vmatprep.mubr.msk.f32.mxu0 %vm8130_vm3, %v11268_v3 }
 0x571   : > { %7508 = vmatprep.mubr.msk.f32.mxu1 %vm8130_vm3, %v11268_v3  ;;  %7530 = vmatprep.subr.mxu0 %v11268_v3 }
 0x572   : > { %7561 = vmatprep.subr.mxu1 %v11268_v3  ;;  %7480 = vmatmul.mubr.f32.gmra.mxu0 %v3779_v40 }
 0x573   : > { %7509 = vmatmul.mubr.f32.gmra.mxu1 %v10031_v56  ;;  %7531 = vmatpush3.xpose.msra.mxu0 %v9994_v14 }
 0x574   : > { %7562 = vmatpush3.xpose.msra.mxu1 %v9938_v53  ;;  %7482 = vmatprep.mubr.msk.f32.mxu0 %vm8130_vm3, %v11268_v3 }
 0x575   : > { %7511 = vmatprep.mubr.msk.f32.mxu1 %vm8130_vm3, %v11268_v3  ;;  %7532 = vmatprep.subr.mxu0 %v11268_v3 }
 0x576   : > { %7563 = vmatprep.subr.mxu1 %v11268_v3  ;;  %7483 = vmatmul.mubr.f32.gmra.mxu0 %v3789_v46 }
 0x577   : > { %7512 = vmatmul.mubr.f32.gmra.mxu1 %v10063_v19  ;;  %7533 = vmatpush3.xpose.msra.mxu0 %v10027_v49 }
 0x578   : > { %7564 = vmatpush3.xpose.msra.mxu1 %v9959_v22  ;;  %7514 = vmatprep.mubr.msk.f32.mxu1 %vm8130_vm3, %v11268_v3 }
 0x579   : > { %7534 = vmatprep.mubr.msk.f32.mxu0 %vm8130_vm3, %v11268_v3  ;;  %7565 = vmatprep.subr.mxu1 %v11268_v3 }
 0x57a   : > { %7590 = vmatprep.subr.mxu0 %v11268_v3  ;;  %7535 = vmatmul.mubr.f32.vlgmr.msra.gmra.mxu0 %v9987_v13 }
 0x57b   : > { %7515 = vmatmul.mubr.f32.gmra.mxu1 %v10078_v11  ;;  %7591 = vmatpush3.xpose.msra.mxu0 %v3816_v29 }
 0x57c   : > { %7566 = vmatpush3.xpose.msra.mxu1 %v9968_v58  ;;  %7517 = vmatprep.mubr.msk.f32.mxu1 %vm8130_vm3, %v11268_v3 }
 0x57d   : > { %7537 = vmatprep.mubr.msk.f32.mxu0 %vm8130_vm3, %v11268_v3  ;;  %7567 = vmatprep.subr.mxu1 %v11268_v3 }
 0x57e   : > { %7592 = vmatprep.subr.mxu0 %v11268_v3  ;;  %7538 = vmatmul.mubr.f32.gmra.mxu0 %v10013_v10 }
 0x57f   : > { %7518 = vmatmul.mubr.f32.gmra.mxu1 %v10102_v36  ;;  %7593 = vmatpush3.xpose.msra.mxu0 %v3823_v23 }
 0x580   : > { %7568 = vmatpush3.xpose.msra.mxu1 %v10004_v32  ;;  %7540 = vmatprep.mubr.msk.f32.mxu0 %vm8130_vm3, %v11268_v3 }
 0x581   : > { %7569 = vmatprep.mubr.msk.f32.mxu1 %vm8130_vm3, %v11268_v3  ;;  %7594 = vmatprep.subr.mxu0 %v11268_v3 }
 0x582   : > { %7625 = vmatprep.subr.mxu1 %v11268_v3  ;;  %7541 = vmatmul.mubr.f32.gmra.mxu0 %v10040_v24 }
 0x583   : > { %7570 = vmatmul.mubr.f32.vlgmr.msra.gmra.mxu1 %v3727_v61  ;;  %7595 = vmatpush3.xpose.msra.mxu0 %v3830_v7 }
 0x584   : > { %7626 = vmatpush3.xpose.msra.mxu1 %v9884_v43  ;;  %7543 = vmatprep.mubr.msk.f32.mxu0 %vm8130_vm3, %v11268_v3 }
 0x585   : > { %7572 = vmatprep.mubr.msk.f32.mxu1 %vm8130_vm3, %v11268_v3  ;;  %7596 = vmatprep.subr.mxu0 %v11268_v3 }
 0x586   : > { %7627 = vmatprep.subr.mxu1 %v11268_v3  ;;  %7544 = vmatmul.mubr.f32.gmra.mxu0 %v10055_v42 }
 0x587   : > { %7573 = vmatmul.mubr.f32.gmra.mxu1 %v3737_v63  ;;  %7597 = vmatpush3.xpose.msra.mxu0 %v3837_v12 }
 0x588   : > { %7628 = vmatpush3.xpose.msra.mxu1 %v9904_v60  ;;  %7546 = vmatprep.mubr.msk.f32.mxu0 %vm8130_vm3, %v11268_v3 }
 0x589   : > { %7575 = vmatprep.mubr.msk.f32.mxu1 %vm8130_vm3, %v11268_v3  ;;  %7598 = vmatprep.subr.mxu0 %v11268_v3 }
 0x58a   : > { %7629 = vmatprep.subr.mxu1 %v11268_v3  ;;  %7547 = vmatmul.mubr.f32.gmra.mxu0 %v10084_v16 }
 0x58b   : > { %7576 = vmatmul.mubr.f32.gmra.mxu1 %v3747_v1  ;;  %7599 = vmatpush3.xpose.msra.mxu0 %v3844_v41 }
 0x58c   : > { %7630 = vmatpush3.xpose.msra.mxu1 %v9919_v2  ;;  %7549 = vmatprep.mubr.msk.f32.mxu0 %vm8130_vm3, %v11268_v3 }
 0x58d   : > { %7578 = vmatprep.mubr.msk.f32.mxu1 %vm8130_vm3, %v11268_v3  ;;  %7600 = vmatprep.subr.mxu0 %v11268_v3 }
 0x58e   : > { %7631 = vmatprep.subr.mxu1 %v11268_v3  ;;  %7550 = vmatmul.mubr.f32.gmra.mxu0 %v10099_v37 }
 0x58f   : > { %7579 = vmatmul.mubr.f32.gmra.mxu1 %v3757_v30  ;;  %7601 = vmatpush3.xpose.msra.mxu0 %v3851_v9 }
 0x590   : > { %7632 = vmatpush3.xpose.msra.mxu1 %v9938_v53  ;;  %7552 = vmatprep.mubr.msk.f32.mxu0 %vm8130_vm3, %v11268_v3 }
 0x591   : > { %7581 = vmatprep.mubr.msk.f32.mxu1 %vm8130_vm3, %v11268_v3  ;;  %7602 = vmatprep.subr.mxu0 %v11268_v3 }
 0x592   : > { %7633 = vmatprep.subr.mxu1 %v11268_v3  ;;  %7553 = vmatmul.mubr.f32.gmra.mxu0 %v10117_v31 }
 0x593   : > { %7582 = vmatmul.mubr.f32.gmra.mxu1 %v3767_v18  ;;  %7603 = vmatpush3.xpose.msra.mxu0 %v3858_v50 }
 0x594   : > { %7634 = vmatpush3.xpose.msra.mxu1 %v9959_v22  ;;  %7584 = vmatprep.mubr.msk.f32.mxu1 %vm8130_vm3, %v11268_v3 }
 0x595   : > { %7604 = vmatprep.mubr.msk.f32.mxu0 %vm8130_vm3, %v11268_v3  ;;  %7635 = vmatprep.subr.mxu1 %v11268_v3 }
 0x596   : > { %7605 = vmatmul.mubr.f32.vlgmr.msra.gmra.mxu0 %v9964_v5  ;;  %7660 = vmatprep.subr.mxu0 %v11268_v3 }
 0x597   : > { %7585 = vmatmul.mubr.f32.gmra.mxu1 %v3777_v39  ;;  %7607 = vmatprep.mubr.msk.f32.mxu0 %vm8130_vm3, %v11268_v3 }
 0x598   : > { %7636 = vmatpush3.xpose.msra.mxu1 %v9968_v58  ;;  %7587 = vmatprep.mubr.msk.f32.mxu1 %vm8130_vm3, %v11268_v3 }
 0x599   : > { %7637 = vmatprep.subr.mxu1 %v11268_v3 }
 0x59a   : > { %7608 = vmatmul.mubr.f32.gmra.mxu0 %v9989_v55 }
 0x59b   : > { %7588 = vmatmul.mubr.f32.gmra.mxu1 %v3787_v34  ;;  %7610 = vmatprep.mubr.msk.f32.mxu0 %vm8130_vm3, %v11268_v3 }
 0x59c   : > { %7638 = vmatpush3.xpose.msra.mxu1 %v10004_v32  ;;  %7639 = vmatprep.mubr.msk.f32.mxu1 %vm8130_vm3, %v11268_v3 }
 0x59d   : > { %7695 = vmatprep.subr.mxu1 %v11268_v3 }
 0x59e   : > { %7611 = vmatmul.mubr.f32.gmra.mxu0 %v10015_v8 }
 0x59f   : > { %7640 = vmatmul.mubr.f32.vlgmr.msra.gmra.mxu1 %v9964_v5  ;;  %7613 = vmatprep.mubr.msk.f32.mxu0 %vm8130_vm3, %v11268_v3 }
 0x5a0   : > { %7642 = vmatprep.mubr.msk.f32.mxu1 %vm8130_vm3, %v11268_v3 }
 0x5a2   : > { %7614 = vmatmul.mubr.f32.gmra.mxu0 %v10031_v56 }
 0x5a3   : > { %7643 = vmatmul.mubr.f32.gmra.mxu1 %v9989_v55  ;;  %7616 = vmatprep.mubr.msk.f32.mxu0 %vm8130_vm3, %v11268_v3 }
 0x5a4   : > { %7645 = vmatprep.mubr.msk.f32.mxu1 %vm8130_vm3, %v11268_v3 }
 0x5a6   : > { %7617 = vmatmul.mubr.f32.gmra.mxu0 %v10063_v19 }
 0x5a7   : > { %7646 = vmatmul.mubr.f32.gmra.mxu1 %v10015_v8  ;;  %7619 = vmatprep.mubr.msk.f32.mxu0 %vm8130_vm3, %v11268_v3 }
 0x5a8   : > { %7648 = vmatprep.mubr.msk.f32.mxu1 %vm8130_vm3, %v11268_v3 }
 0x5aa   : > { %7620 = vmatmul.mubr.f32.gmra.mxu0 %v10078_v11 }
 0x5ab   : > { %7649 = vmatmul.mubr.f32.gmra.mxu1 %v10031_v56  ;;  %7622 = vmatprep.mubr.msk.f32.mxu0 %vm8130_vm3, %v11268_v3 }
 0x5ac   : > { %7651 = vmatprep.mubr.msk.f32.mxu1 %vm8130_vm3, %v11268_v3 }
 0x5ae   : > { %7623 = vmatmul.mubr.f32.gmra.mxu0 %v10102_v36 }
 0x5af   : > { %7652 = vmatmul.mubr.f32.gmra.mxu1 %v10063_v19  ;;  %7674 = vmatprep.mubr.msk.f32.mxu0 %vm8130_vm3, %v11268_v3 }
 0x5b0   : > { %7654 = vmatprep.mubr.msk.f32.mxu1 %vm8130_vm3, %v11268_v3 }
 0x5b3   : > { %7655 = vmatmul.mubr.f32.gmra.mxu1 %v10078_v11 }
 0x5b4   : > { %7657 = vmatprep.mubr.msk.f32.mxu1 %vm8130_vm3, %v11268_v3 }
 0x5b7   : > { %7658 = vmatmul.mubr.f32.gmra.mxu1 %v10102_v36 }
 0x5b8   : > { %7709 = vmatprep.mubr.msk.f32.mxu1 %vm8130_vm3, %v11268_v3 }
 0x5c5   : > { %v2893_v43 = vpop.f32.mrf.mxu0 }
 0x5c7   : > { %v7256_v57 = vpop.f32.mrf.mxu0 }
 0x5c9   : > { %v2903_v60 = vpop.f32.mrf.mxu0 }
 0x5cb   : > { %v7259_v29 = vpop.f32.mrf.mxu0 }
 0x5cd   : > { %v2913_v28 = vpop.f32.mrf.mxu0  ;;  %v3059_v2 = vpop.f32.mrf.mxu1 }
 0x5ce   : > { %v3060_v23 = vadd.f32 %v3059_v2, %v2893_v43 }
 0x5cf   : > { %v7262_v45 = vpop.f32.mrf.mxu0  ;;  %v7291_v53 = vpop.f32.mrf.mxu1 }
 0x5d3   : > { %v2923_v7 = vpop.f32.mrf.mxu0  ;;  %v3065_v54 = vpop.f32.mrf.mxu1 }
 0x5d4   : > { %v3066_v22 = vadd.f32 %v3065_v54, %v2903_v60 }
 0x5d5   : > { %v7265_v5 = vpop.f32.mrf.mxu0  ;;  %v7294_v58 = vpop.f32.mrf.mxu1 }
 0x5d8   : > { %v2933_v12 = vpop.f32.mrf.mxu0  ;;  %v3071_v17 = vpop.f32.mrf.mxu1 }
 0x5d9   : > { %v3072_v13 = vadd.f32 %v3071_v17, %v2913_v28 }
 0x5da   : > { %v7268_v55 = vpop.f32.mrf.mxu0  ;;  %v7297_v14 = vpop.f32.mrf.mxu1 }
 0x5dc   : > { %v2943_v41 = vpop.f32.mrf.mxu0 }
 0x5dd   : > { %v3077_v32 = vpop.f32.mrf.mxu1 }
 0x5de   : > { %v3078_v61 = vadd.f32 %v3077_v32, %v2923_v7  ;;  %v7271_v10 = vpop.f32.mrf.mxu0 }
 0x5df   : > { %v7300_v8 = vpop.f32.mrf.mxu1 }
 0x5e0   : > { %v2953_v9 = vpop.f32.mrf.mxu0 }
 0x5e1   : > { %v3083_v49 = vpop.f32.mrf.mxu1 }
 0x5e2   : > { %v3084_v56 = vadd.f32 %v3083_v49, %v2933_v12  ;;  %v7274_v63 = vpop.f32.mrf.mxu0 }
 0x5e3   : > { %v7303_v24 = vpop.f32.mrf.mxu1 }
 0x5e4   : > { %v3181_v50 = vpop.f32.mrf.mxu0 }
 0x5e5   : > { %v3089_v42 = vpop.f32.mrf.mxu1  ;;  %v3182_v1 = vadd.f32 %v3181_v50, %v3060_v23 }
 0x5e6   : > { %v3090_v19 = vadd.f32 %v3089_v42, %v2943_v41  ;;  %v7326_v26 = vpop.f32.mrf.mxu0 }
 0x5e7   : > { %v7306_v30 = vpop.f32.mrf.mxu1 }
 0x5e8   : > { %v3188_v11 = vpop.f32.mrf.mxu0 }
 0x5e9   : > { %v3095_v33 = vpop.f32.mrf.mxu1  ;;  %v3189_v21 = vadd.f32 %v3188_v11, %v3066_v22 }
 0x5ea   : > { %v3096_v16 = vadd.f32 %v3095_v33, %v2953_v9  ;;  %v7329_v47 = vpop.f32.mrf.mxu0 }
 0x5eb   : > { %v7309_v0 = vpop.f32.mrf.mxu1 }
 0x5ec   : > { %v3195_v51 = vpop.f32.mrf.mxu0 }
 0x5ed   : > { %v3196_v37 = vadd.f32 %v3195_v51, %v3072_v13  ;;  %v3303_v59 = vpop.f32.mrf.mxu1 }
 0x5ee   : > { %v3304_v18 = vadd.f32 %v3303_v59, %v3182_v1  ;;  %v7332_v36 = vpop.f32.mrf.mxu0 }
 0x5ef   : > { %v7361_v62 = vpop.f32.mrf.mxu1 }
 0x5f2   : > { %v3202_v39 = vpop.f32.mrf.mxu0 }
 0x5f3   : > { %v3203_v4 = vadd.f32 %v3202_v39, %v3078_v61  ;;  %v3311_v31 = vpop.f32.mrf.mxu1 }
 0x5f4   : > { %v3312_v6 = vadd.f32 %v3311_v31, %v3189_v21  ;;  %v7335_v52 = vpop.f32.mrf.mxu0 }
 0x5f5   : > { %v7364_v34 = vpop.f32.mrf.mxu1 }
 0x5f6   : > { %v3209_v40 = vpop.f32.mrf.mxu0 }
 0x5f7   : > { %v3210_v38 = vadd.f32 %v3209_v40, %v3084_v56  ;;  %v3319_v46 = vpop.f32.mrf.mxu1 }
 0x5f8   : > { %v3320_v43 = vadd.f32 %v3319_v46, %v3196_v37  ;;  %v7338_v57 = vpop.f32.mrf.mxu0 }
 0x5f9   : > { %v7367_v60 = vpop.f32.mrf.mxu1 }
 0x5fa   : > { %v3216_v29 = vpop.f32.mrf.mxu0 }
 0x5fb   : > { %v3217_v28 = vadd.f32 %v3216_v29, %v3090_v19  ;;  %v3327_v2 = vpop.f32.mrf.mxu1 }
 0x5fc   : > { %v3328_v23 = vadd.f32 %v3327_v2, %v3203_v4  ;;  %v7341_v45 = vpop.f32.mrf.mxu0 }
 0x5fd   : > { %v7370_v53 = vpop.f32.mrf.mxu1 }
 0x5fe   : > { %v3223_v7 = vpop.f32.mrf.mxu0 }
 0x5ff   : > { %v3224_v54 = vadd.f32 %v3223_v7, %v3096_v16  ;;  %v3335_v22 = vpop.f32.mrf.mxu1 }
 0x600   : > { %v3336_v5 = vadd.f32 %v3335_v22, %v3210_v38  ;;  %v7344_v58 = vpop.f32.mrf.mxu0 }
 0x601   : > { %v7373_v12 = vpop.f32.mrf.mxu1 }
 0x602   : > { %v3443_v17 = vpop.f32.mrf.mxu0 }
 0x603   : > { %v3343_v13 = vpop.f32.mrf.mxu1  ;;  %v3444_v55 = vadd.f32 %v3443_v17, %v3304_v18 }
 0x604   : > { %v3344_v14 = vadd.f32 %v3343_v13, %v3217_v28  ;;  %v7396_v41 = vpop.f32.mrf.mxu0 }
 0x605   : > { %v7376_v32 = vpop.f32.mrf.mxu1 }
 0x606   : > { %v3449_v61 = vpop.f32.mrf.mxu0 }
 0x607   : > { %v3351_v10 = vpop.f32.mrf.mxu1  ;;  %v3450_v8 = vadd.f32 %v3449_v61, %v3312_v6 }
 0x608   : > { %v3352_v9 = vadd.f32 %v3351_v10, %v3224_v54  ;;  %v7399_v49 = vpop.f32.mrf.mxu0 }
 0x609   : > { %v7379_v56 = vpop.f32.mrf.mxu1 }
 0x60a   : > { %v3455_v63 = vpop.f32.mrf.mxu0 }
 0x60b   : > { %v3456_v24 = vadd.f32 %v3455_v63, %v3320_v43  ;;  %v3557_v50 = vpop.f32.mrf.mxu1 }
 0x60c   : > { %v10305_v42 = vadd.f32 %v3557_v50, %v3444_v55  ;;  %v7402_v1 = vpop.f32.mrf.mxu0 }
 0x60d   : > { %v7431_v19 = vpop.f32.mrf.mxu1 }
 0x60e   : > { %v3461_v26 = vpop.f32.mrf.mxu0 }
 0x60f   : > { %v3462_v30 = vadd.f32 %v3461_v26, %v3328_v23  ;;  %v3563_v11 = vpop.f32.mrf.mxu1  ;;  %v1859_v26 = vld [vmem:[%s11204_s5 + $0x68] sm:$0xf] }
 0x610   : > { %v10307_v33 = vadd.f32 %v3563_v11, %v3450_v8  ;;  %v7405_v21 = vpop.f32.mrf.mxu0 }
 0x611   : > { %v7434_v16 = vpop.f32.mrf.mxu1 }
 0x612   : > { %v3467_v47 = vpop.f32.mrf.mxu0 }
 0x613   : > { %v3468_v0 = vadd.f32 %v3467_v47, %v3336_v5  ;;  %v3569_v51 = vpop.f32.mrf.mxu1 }
 0x614   : > { %v10309_v37 = vadd.f32 %v3569_v51, %v3456_v24  ;;  %v7408_v59 = vpop.f32.mrf.mxu0 }
 0x615   : > { %v7437_v18 = vpop.f32.mrf.mxu1 }
 0x616   : > { %v3473_v36 = vpop.f32.mrf.mxu0 }
 0x617   : > { %v3474_v62 = vadd.f32 %v3473_v36, %v3344_v14  ;;  %v3575_v39 = vpop.f32.mrf.mxu1 }
 0x618   : > { %v10311_v4 = vadd.f32 %v3575_v39, %v3462_v30  ;;  %v7411_v31 = vpop.f32.mrf.mxu0 }
 0x619   : > { %v7440_v6 = vpop.f32.mrf.mxu1 }
 0x61a   : > { %v3479_v52 = vpop.f32.mrf.mxu0 }
 0x61b   : > { %v3480_v34 = vadd.f32 %v3479_v52, %v3352_v9  ;;  %v3581_v40 = vpop.f32.mrf.mxu1 }
 0x61c   : > { %v10313_v38 = vadd.f32 %v3581_v40, %v3468_v0  ;;  %v7414_v46 = vpop.f32.mrf.mxu0 }
 0x61d   : > { %v7443_v43 = vpop.f32.mrf.mxu1 }
 0x61e   : > { %v10315_v57 = vpop.f32.mrf.mxu0 }
 0x61f   : > { %v3587_v60 = vpop.f32.mrf.mxu1 }
 0x620   : > { %v10317_v29 = vadd.f32 %v3587_v60, %v3474_v62  ;;  %v7466_v28 = vpop.f32.mrf.mxu0 }
 0x621   : > { %v7446_v2 = vpop.f32.mrf.mxu1 }
 0x622   : > { %v10319_v23 = vpop.f32.mrf.mxu0 }
 0x623   : > { %v3593_v45 = vpop.f32.mrf.mxu1 }
 0x624   : > { %v10321_v53 = vadd.f32 %v3593_v45, %v3480_v34  ;;  %v7469_v7 = vpop.f32.mrf.mxu0 }
 0x625   : > { %v7449_v54 = vpop.f32.mrf.mxu1 }
 0x626   : > { %v10323_v22 = vpop.f32.mrf.mxu0 }
 0x627   : > { %v3897_v5 = vpop.f32.mrf.mxu1 }
 0x628   : > { %v7472_v58 = vpop.f32.mrf.mxu0 }
 0x629   : > { %v7501_v12 = vpop.f32.mrf.mxu1 }
 0x62a   : > { %v10325_v17 = vpop.f32.mrf.mxu0  ;;  %v1853_v12 = vld [vmem:[%s11204_s5 + $0x38] sm:$0xff] }
 0x62b   : > { %v3903_v13 = vpop.f32.mrf.mxu1 }
 0x62c   : > { %v7475_v55 = vpop.f32.mrf.mxu0 }
 0x62d   : > { %v7504_v14 = vpop.f32.mrf.mxu1 }
 0x62e   : > { %v10327_v41 = vpop.f32.mrf.mxu0 }
 0x62f   : > { %v10329_v32 = vpop.f32.mrf.mxu1 }
 0x630   : > { %v7478_v61 = vpop.f32.mrf.mxu0 }
 0x631   : > { %v7507_v10 = vpop.f32.mrf.mxu1 }
 0x632   : > { %v10331_v8 = vpop.f32.mrf.mxu0 }
 0x633   : > { %v10333_v9 = vpop.f32.mrf.mxu1 }
 0x634   : > { %v7481_v49 = vpop.f32.mrf.mxu0 }
 0x635   : > { %v7510_v56 = vpop.f32.mrf.mxu1  ;;  %v3732_v49 = vadd.f32 %v10315_v57, %v1853_v12 }
 0x636   : > { %v3791_v63 = vpop.f32.mrf.mxu0 }
 0x637   : > { %v10335_v24 = vpop.f32.mrf.mxu1  ;;  %v3792_v16 = vadd.f32 %v3791_v63, %v1859_v26  ;;  %v1854_v63 = vld [vmem:[%s11204_s5 + $0x40] sm:$0xff] }
 0x638   : > { %v7484_v50 = vpop.f32.mrf.mxu0 }
 0x639   : > { %v7513_v1 = vpop.f32.mrf.mxu1 }
 0x63a   : > { %v4019_v19 = vpop.f32.mrf.mxu0  ;;  %v3898_v1 = vadd.f32 %v3897_v5, %v3732_v49 }
 0x63b   : > { %v10340_v30 = vpop.f32.mrf.mxu1 }
 0x63c   : > { %v7536_v11 = vpop.f32.mrf.mxu0 }
 0x63d   : > { %v7516_v21 = vpop.f32.mrf.mxu1 }
 0x63e   : > { %v4026_v47 = vpop.f32.mrf.mxu0  ;;  %v3742_v21 = vadd.f32 %v10319_v23, %v1854_v63  ;;  %v1856_v23 = vld [vmem:[%s11204_s5 + $0x50] sm:$0xff] }
 0x63f   : > { %v3933_v0 = vpop.f32.mrf.mxu1  ;;  %v3762_v12 = vadd.f32 %v10325_v17, %v1856_v23 }
 0x640   : > { %v3934_v51 = vadd.f32 %v3933_v0, %v3792_v16  ;;  %v7539_v59 = vpop.f32.mrf.mxu0  ;;  %v4020_v16 = vadd.f32 %v4019_v19, %v3898_v1  ;;  %v3904_v57 = vadd.f32 %v3903_v13, %v3742_v21 }
 0x641   : > { %v7519_v18 = vpop.f32.mrf.mxu1 }
 0x642   : > { %v4033_v36 = vpop.f32.mrf.mxu0  ;;  %v4027_v5 = vadd.f32 %v4026_v47, %v3904_v57 }
 0x643   : > { %v4141_v62 = vpop.f32.mrf.mxu1 }
 0x644   : > { %v7542_v39 = vpop.f32.mrf.mxu0  ;;  %v4142_v18 = vadd.f32 %v4141_v62, %v4020_v16  ;;  %v1858_v16 = vld [vmem:[%s11204_s5 + $0x60] sm:$0xff] }
 0x645   : > { %v7571_v31 = vpop.f32.mrf.mxu1 }
 0x646   : > { %v4040_v6 = vpop.f32.mrf.mxu0 }
 0x647   : > { %v4149_v52 = vpop.f32.mrf.mxu1 }
 0x648   : > { %v7545_v34 = vpop.f32.mrf.mxu0 }
 0x649   : > { %v7574_v40 = vpop.f32.mrf.mxu1 }
 0x64a   : > { %v10342_v46 = vpop.f32.mrf.mxu0 }
 0x64b   : > { %v4157_v43 = vpop.f32.mrf.mxu1 }
 0x64c   : > { %v7548_v60 = vpop.f32.mrf.mxu0 }
 0x64d   : > { %v7577_v28 = vpop.f32.mrf.mxu1 }
 0x64e   : > { %v10344_v2 = vpop.f32.mrf.mxu0 }
 0x64f   : > { %v4165_v45 = vpop.f32.mrf.mxu1 }
 0x650   : > { %v7551_v7 = vpop.f32.mrf.mxu0 }
 0x651   : > { %v7580_v54 = vpop.f32.mrf.mxu1 }
 0x652   : > { %v4061_v58 = vpop.f32.mrf.mxu0  ;;  %v4150_v54 = vadd.f32 %v4149_v52, %v4027_v5 }
 0x653   : > { %v4062_v55 = vadd.f32 %v4061_v58, %v3934_v51  ;;  %v10349_v14 = vpop.f32.mrf.mxu1  ;;  %v1855_v51 = vld [vmem:[%s11204_s5 + $0x48] sm:$0xff] }
 0x654   : > { %v7554_v61 = vpop.f32.mrf.mxu0  ;;  %v3752_v40 = vadd.f32 %v10323_v22, %v1855_v51 }
 0x655   : > { %v7583_v10 = vpop.f32.mrf.mxu1 }
 0x656   : > { %v4281_v56 = vpop.f32.mrf.mxu0  ;;  %v3910_v7 = vadd.f32 %v10329_v32, %v3752_v40  ;;  %v1857_v10 = vld [vmem:[%s11204_s5 + $0x58] sm:$0xff]  ;;  %v3916_v32 = vadd.f32 %v10333_v9, %v3762_v12 }
 0x657   : > { %v10355_v50 = vpop.f32.mrf.mxu1  ;;  %v4282_v60 = vadd.f32 %v4281_v56, %v4142_v18  ;;  %v3772_v17 = vadd.f32 %v10327_v41, %v1857_v10  ;;  %v3782_v18 = vadd.f32 %v10331_v8, %v1858_v16 }
 0x658   : > { %v7606_v26 = vpop.f32.mrf.mxu0 }
 0x659   : > { %v7586_v11 = vpop.f32.mrf.mxu1  ;;  %v3922_v51 = vadd.f32 %v10335_v24, %v3772_v17  ;;  %v3928_v5 = vadd.f32 %v10340_v30, %v3782_v18 }
 0x65a   : > { %v4287_v0 = vpop.f32.mrf.mxu0 }
 0x65b   : > { %v4189_v59 = vpop.f32.mrf.mxu1  ;;  %v4288_v61 = vadd.f32 %v4287_v0, %v4150_v54  ;;  %v4048_v41 = vadd.f32 %v10342_v46, %v3922_v51  ;;  %v4055_v23 = vadd.f32 %v10344_v2, %v3928_v5 }
 0x65c   : > { %v10361_v39 = vadd.f32 %v4189_v59, %v4062_v55  ;;  %v7609_v31 = vpop.f32.mrf.mxu0  ;;  %v4034_v55 = vadd.f32 %v4033_v36, %v3910_v7  ;;  %v4041_v36 = vadd.f32 %v4040_v6, %v3916_v32 }
 0x65d   : > { %v7589_v34 = vpop.f32.mrf.mxu1  ;;  %v4182_v54 = vadd.f32 %v10355_v50, %v4055_v23 }
 0x65e   : > { %v4293_v28 = vpop.f32.mrf.mxu0  ;;  %v4158_v52 = vadd.f32 %v4157_v43, %v4034_v55  ;;  %v4166_v9 = vadd.f32 %v4165_v45, %v4041_v36 }
 0x65f   : > { %v4395_v19 = vpop.f32.mrf.mxu1 }
 0x660   : > { %v10368_v58 = vadd.f32 %v4395_v19, %v4282_v60  ;;  %v7612_v13 = vpop.f32.mrf.mxu0  ;;  %v4294_v26 = vadd.f32 %v4293_v28, %v4158_v52  ;;  %v4174_v60 = vadd.f32 %v10349_v14, %v4048_v41 }
 0x661   : > { %v7641_v62 = vpop.f32.mrf.mxu1 }
 0x662   : > { %v4435_v22 = vsel %vm2692_vm9, %v10368_v58, -inf  ;;  %v4299_v47 = vpop.f32.mrf.mxu0 }
 0x663   : > { %v4401_v49 = vpop.f32.mrf.mxu1  ;;  %4436 = vmax.xlane.f32.xlu1 %v4435_v22  ;;  %v4300_v6 = vadd.f32 %v4299_v47, %v4166_v9 }
 0x664   : > { %v4402_v56 = vadd.f32 %v4401_v49, %v4288_v61  ;;  %v7615_v63 = vpop.f32.mrf.mxu0 }
 0x665   : > { %v7644_v1 = vpop.f32.mrf.mxu1 }
 0x666   : > { %v4438_v11 = vsel %vm2692_vm9, %v4402_v56, -inf  ;;  %v4305_v21 = vpop.f32.mrf.mxu0 }
 0x667   : > { %v4407_v0 = vpop.f32.mrf.mxu1  ;;  %4439 = vmax.xlane.f32.xlu0 %v4438_v11  ;;  %v4306_v19 = vadd.f32 %v4305_v21, %v4174_v60 }
 0x668   : > { %v4408_v43 = vadd.f32 %v4407_v0, %v4294_v26  ;;  %v7618_v59 = vpop.f32.mrf.mxu0 }
 0x669   : > { %v7647_v57 = vpop.f32.mrf.mxu1 }
 0x66a   : > { %v4441_v31 = vsel %vm2692_vm9, %v4408_v43, -inf  ;;  %v4311_v34 = vpop.f32.mrf.mxu0 }
 0x66b   : > { %v4413_v40 = vpop.f32.mrf.mxu1  ;;  %4442 = vmax.xlane.f32.xlu0 %v4441_v31  ;;  %v4312_v12 = vadd.f32 %v4311_v34, %v4182_v54 }
 0x66c   : > { %v10388_v28 = vadd.f32 %v4413_v40, %v4300_v6  ;;  %v7621_v24 = vpop.f32.mrf.mxu0 }
 0x66d   : > { %v7650_v45 = vpop.f32.mrf.mxu1 }
 0x66e   : > { %v4444_v8 = vsel %vm2692_vm9, %v10388_v28, -inf  ;;  %v4317_v46 = vpop.f32.mrf.mxu0 }
 0x66f   : > { %v4419_v7 = vpop.f32.mrf.mxu1  ;;  %4445 = vmax.xlane.f32.xlu1 %v4444_v8  ;;  %v4318_v50 = vadd.f32 %v4317_v46, %v10361_v39 }
 0x670   : > { %v4420_v13 = vadd.f32 %v4419_v7, %v4306_v19  ;;  %v7624_v62 = vpop.f32.mrf.mxu0 }
 0x671   : > { %v7653_v30 = vpop.f32.mrf.mxu1 }
 0x672   : > { %v4447_v14 = vsel %vm2692_vm9, %v4420_v13, -inf }
 0x673   : > { %v4425_v55 = vpop.f32.mrf.mxu1  ;;  %4448 = vmax.xlane.f32.xlu0 %v4447_v14 }
 0x674   : > { %v4426_v61 = vadd.f32 %v4425_v55, %v4312_v12 }
 0x675   : > { %v7656_v22 = vpop.f32.mrf.mxu1 }
 0x676   : > { %v4450_v2 = vsel %vm2692_vm9, %v4426_v61, -inf }
 0x677   : > { %v4431_v47 = vpop.f32.mrf.mxu1  ;;  %4451 = vmax.xlane.f32.xlu1 %v4450_v2 }
 0x678   : > { %v4432_v49 = vadd.f32 %v4431_v47, %v4318_v50 }
 0x679   : > { %v7659_v10 = vpop.f32.mrf.mxu1 }
 0x67a   : > { %v4453_v32 = vsel %vm2711_vm10, %v4432_v49, -inf }
 0x689   : > { %4524 = vrot.lane.b32.xlu0 %v9098_v44, %s8134_s14 }
 0x6a8   : > { %4454 = vmax.xlane.f32.xlu0 %v4453_v32 }
 0x6ec   : > { %v4437_v52 = vpop.xlane.xlu1 %4436 }
 0x6ed   : > { %v4456_v63 = vsub.f32 %v10368_v58, %v4437_v52 }
 0x6ef   : > { %v4463_v1 = vmul.f32 1.442695, %v4456_v63 }
 0x6f0   : > { %v4440_v17 = vpop.xlane.xlu0 %4439 }
 0x6f1   : > { %8091 = vpow2.f32 %v4463_v1  ;;  %v4457_v36 = vsub.f32 %v4402_v56, %v4440_v17 }
 0x6f3   : > { %v4465_v26 = vmul.f32 1.442695, %v4457_v36 }
 0x6f4   : > { %v4443_v11 = vpop.xlane.xlu0 %4442 }
 0x6f5   : > { %8093 = vpow2.f32 %v4465_v26  ;;  %v4458_v21 = vsub.f32 %v4408_v43, %v4443_v11 }
 0x6f7   : > { %v4467_v16 = vmul.f32 1.442695, %v4458_v21 }
 0x6f8   : > { %v4446_v34 = vpop.xlane.xlu1 %4445 }
 0x6f9   : > { %8095 = vpow2.f32 %v4467_v16  ;;  %v4459_v40 = vsub.f32 %v10388_v28, %v4446_v34 }
 0x6fb   : > { %v4469_v5 = vmul.f32 1.442695, %v4459_v40 }
 0x6fc   : > { %v4449_v44 = vpop.xlane.xlu0 %4448 }
 0x6fd   : > { %v4460_v60 = vsub.f32 %v4420_v13, %v4449_v44  ;;  %8097 = vpow2.f32 %v4469_v5 }
 0x6fe   : > { %v10401_v0 = vpop.eup %8091 }
 0x6ff   : > { %v4477_v39 = vsel %vm2692_vm9, %v10401_v0, 0.0  ;;  %v4471_v45 = vmul.f32 1.442695, %v4460_v60 }
 0x700   : > { %v4525_v51 = vpop.permute.xlu0 %4524  ;;  %4478 = vadd.xlane.f32.xlu1 %v4477_v39  ;;  %v4452_v24 = vpop.xlane.xlu1 %4451 }
 0x701   : > { %v4553_v58 = vsel %vm2812_vm11, %v4525_v51, 0  ;;  %v4461_v23 = vsub.f32 %v4426_v61, %v4452_v24  ;;  %8099 = vpow2.f32 %v4471_v45 }
 0x702   : > { %v10406_v9 = vpop.eup %8093  ;;  %v10408_v59 = vand.u32 4294901760, %v4553_v58 }
 0x703   : > { %v4480_v56 = vsel %vm2692_vm9, %v10406_v9, 0.0  ;;  %v4473_v19 = vmul.f32 1.442695, %v4461_v23 }
 0x704   : > { %v10413_v43 = vsub.f32 %v4553_v58, %v10408_v59  ;;  %7661 = vmatpush3.msra.mxu0 %v10408_v59  ;;  %4481 = vadd.xlane.f32.xlu0 %v4480_v56 }
 0x705   : > { %7662 = vmatprep.subr.mxu0 %v11268_v3  ;;  %8101 = vpow2.f32 %v4473_v19 }
 0x706   : > { %v10417_v57 = vpop.eup %8095  ;;  %v4718_v18 = vand.u32 4294901760, %v10413_v43 }
 0x707   : > { %v4483_v41 = vsel %vm2692_vm9, %v10417_v57, 0.0 }
 0x708   : > { %v4719_v6 = vsub.f32 %v10413_v43, %v4718_v18  ;;  %4484 = vadd.xlane.f32.xlu1 %v4483_v41 }
 0x70a   : > { %v4720_v31 = vand.u32 4294901760, %v4719_v6  ;;  %v10431_v54 = vpop.eup %8097 }
 0x70c   : > { %7696 = vmatpush3.msra.mxu1 %v4720_v31 }
 0x70d   : > { %7697 = vmatprep.subr.mxu1 %v11268_v3 }
 0x719   : > { %4522 = vrot.lane.b32.xlu1 %v9092_v48, %s8134_s14  ;;  %v4486_v48 = vsel %vm2692_vm9, %v10431_v54, 0.0 }
 0x71a   : > { %4520 = vrot.lane.b32.xlu0 %v9105_v20, %s8134_s14  ;;  %v10435_v20 = vpop.eup %8099 }
 0x71b   : > { %v4489_v28 = vsel %vm2692_vm9, %v10435_v20, 0.0  ;;  %v10439_v13 = vpop.eup %8101 }
 0x71c   : > { %v4492_v62 = vsel %vm2692_vm9, %v10439_v13, 0.0 }
 0x731   : > { %v4455_v8 = vpop.xlane.xlu0 %4454 }
 0x732   : > { %v4462_v46 = vsub.f32 %v4432_v49, %v4455_v8 }
 0x734   : > { %v4475_v7 = vmul.f32 1.442695, %v4462_v46 }
 0x736   : > { %8103 = vpow2.f32 %v4475_v7 }
 0x739   : > { %4487 = vadd.xlane.f32.xlu0 %v4486_v48 }
 0x73d   : > { %4490 = vadd.xlane.f32.xlu1 %v4489_v28 }
 0x741   : > { %4493 = vadd.xlane.f32.xlu1 %v4492_v62 }
 0x743   : > { %v10443_v30 = vpop.eup %8103 }
 0x744   : > { %v4495_v12 = vsel %vm2711_vm10, %v10443_v30, 0.0 }
 0x745   : > { %4496 = vadd.xlane.f32.xlu1 %v4495_v12 }
 0x74f   : > { %4518 = vrot.lane.b32.xlu0 %v9096_v15, %s8134_s14 }
 0x753   : > { %4516 = vrot.lane.b32.xlu0 %v9110_v25, %s8134_s14 }
 0x757   : > { %4514 = vrot.lane.b32.xlu0 %v9102_v35, %s8134_s14 }
 0x75b   : > { %4512 = vrot.lane.b32.xlu0 %v9113_v27, %s8134_s14 }
 0x789   : > { %v4479_v14 = vpop.xlane.xlu1 %4478 }
 0x78a   : > { %8105 = vrcp.f32 %v4479_v14 }
 0x78d   : > { %v4482_v55 = vpop.xlane.xlu0 %4481 }
 0x78e   : > { %8107 = vrcp.f32 %v4482_v55 }
 0x791   : > { %v4485_v61 = vpop.xlane.xlu1 %4484  ;;  %v4521_v22 = vpop.permute.xlu0 %4520 }
 0x792   : > { %v10455_v2 = vand.u32 4294901760, %v4521_v22  ;;  %8109 = vrcp.f32 %v4485_v61 }
 0x794   : > { %v10458_v47 = vsub.f32 %v4521_v22, %v10455_v2 }
 0x795   : > { %v4523_v10 = vpop.permute.xlu1 %4522 }
 0x796   : > { %v10460_v15 = vand.u32 4294901760, %v4523_v10  ;;  %v4732_v25 = vand.u32 4294901760, %v10458_v47 }
 0x797   : > { %v8106_v63 = vpop.eup %8105 }
 0x798   : > { %v10464_v50 = vsub.f32 %v4523_v10, %v10460_v15  ;;  %7663 = vmatpush3.msra.mxu0 %v10460_v15  ;;  %v4733_v27 = vsub.f32 %v10458_v47, %v4732_v25  ;;  %v4505_v1 = vmul.f32 %v8106_v63, %v10401_v0 }
 0x799   : > { %7664 = vmatprep.subr.mxu0 %v11268_v3 }
 0x79a   : > { %v4725_v35 = vand.u32 4294901760, %v10464_v50  ;;  %7665 = vmatpush3.msra.mxu0 %v10455_v2  ;;  %v4734_v52 = vand.u32 4294901760, %v4733_v27  ;;  %v4533_v36 = vsel %vm2692_vm9, %v4505_v1, 0 }
 0x79b   : > { %7666 = vmatprep.subr.mxu0 %v11268_v3  ;;  %v8108_v17 = vpop.eup %8107  ;;  %v10482_v16 = vand.u32 4294901760, %v4533_v36 }
 0x79c   : > { %v4726_v49 = vsub.f32 %v10464_v50, %v4725_v35  ;;  %v4506_v26 = vmul.f32 %v8108_v17, %v10406_v9 }
 0x79d   : > { %v10489_v0 = vsub.f32 %v4533_v36, %v10482_v16 }
 0x79e   : > { %v4727_v32 = vand.u32 4294901760, %v4726_v49  ;;  %v4536_v39 = vsel %vm2692_vm9, %v4506_v26, 0 }
 0x79f   : > { %v8110_v11 = vpop.eup %8109  ;;  %v10491_v41 = vand.u32 4294901760, %v4536_v39  ;;  %v4629_v5 = vand.u32 4294901760, %v10489_v0 }
 0x7a0   : > { %7698 = vmatpush3.msra.mxu1 %v4727_v32  ;;  %v4507_v44 = vmul.f32 %v8110_v11, %v10417_v57 }
 0x7a1   : > { %7699 = vmatprep.subr.mxu1 %v11268_v3  ;;  %v10504_v60 = vsub.f32 %v4536_v39, %v10491_v41  ;;  %v4630_v62 = vsub.f32 %v10489_v0, %v4629_v5 }
 0x7a2   : > { %7700 = vmatpush3.msra.mxu1 %v4734_v52  ;;  %v4539_v6 = vsel %vm2692_vm9, %v4507_v44, 0 }
 0x7a3   : > { %7701 = vmatprep.subr.mxu1 %v11268_v3  ;;  %v10506_v24 = vand.u32 4294901760, %v4539_v6  ;;  %v4639_v12 = vand.u32 4294901760, %v10504_v60  ;;  %v4631_v63 = vand.u32 4294901760, %v4630_v62 }
 0x7a5   : > { %v10524_v14 = vsub.f32 %v4539_v6, %v10506_v24  ;;  %v4640_v1 = vsub.f32 %v10504_v60, %v4639_v12 }
 0x7a7   : > { %v4649_v17 = vand.u32 4294901760, %v10524_v14  ;;  %v4641_v6 = vand.u32 4294901760, %v4640_v1 }
 0x7c2   : > { %v4488_v21 = vpop.xlane.xlu0 %4487 }
 0x7c3   : > { %8111 = vrcp.f32 %v4488_v21 }
 0x7c6   : > { %v4491_v51 = vpop.xlane.xlu1 %4490  ;;  %v4519_v58 = vpop.permute.xlu0 %4518 }
 0x7c7   : > { %8113 = vrcp.f32 %v4491_v51  ;;  %v10486_v56 = vand.u32 4294901760, %v4519_v58 }
 0x7c9   : > { %v10494_v9 = vsub.f32 %v4519_v58, %v10486_v56  ;;  %7667 = vmatpush3.msra.mxu0 %v10486_v56 }
 0x7ca   : > { %v4494_v57 = vpop.xlane.xlu1 %4493  ;;  %v4517_v31 = vpop.permute.xlu0 %4516  ;;  %7668 = vmatprep.subr.mxu0 %v11268_v3 }
 0x7cb   : > { %v4739_v34 = vand.u32 4294901760, %v10494_v9  ;;  %8115 = vrcp.f32 %v4494_v57  ;;  %v10500_v40 = vand.u32 4294901760, %v4517_v31  ;;  %v4650_v57 = vsub.f32 %v10524_v14, %v4649_v17 }
 0x7cd   : > { %v4740_v45 = vsub.f32 %v10494_v9, %v4739_v34  ;;  %v10512_v23 = vsub.f32 %v4517_v31, %v10500_v40  ;;  %7669 = vmatpush3.msra.mxu0 %v10500_v40 }
 0x7ce   : > { %v4497_v19 = vpop.xlane.xlu1 %4496  ;;  %v4515_v8 = vpop.permute.xlu0 %4514  ;;  %7670 = vmatprep.subr.mxu0 %v11268_v3 }
 0x7cf   : > { %v4741_v46 = vand.u32 4294901760, %v4740_v45  ;;  %v4746_v7 = vand.u32 4294901760, %v10512_v23  ;;  %8117 = vrcp.f32 %v4497_v19  ;;  %v10517_v48 = vand.u32 4294901760, %v4515_v8 }
 0x7d0   : > { %v8112_v28 = vpop.eup %8111 }
 0x7d1   : > { %v4508_v55 = vmul.f32 %v8112_v28, %v10431_v54  ;;  %v4747_v61 = vsub.f32 %v10512_v23, %v4746_v7  ;;  %v10531_v22 = vsub.f32 %v4515_v8, %v10517_v48  ;;  %7671 = vmatpush3.msra.mxu0 %v10517_v48  ;;  %7702 = vmatpush3.msra.mxu1 %v4741_v46 }
 0x7d2   : > { %v4513_v10 = vpop.permute.xlu0 %4512  ;;  %7672 = vmatprep.subr.mxu0 %v11268_v3  ;;  %7703 = vmatprep.subr.mxu1 %v11268_v3 }
 0x7d3   : > { %v4748_v27 = vand.u32 4294901760, %v4747_v61  ;;  %v4753_v49 = vand.u32 4294901760, %v10531_v22  ;;  %v10537_v32 = vand.u32 4294901760, %v4513_v10  ;;  %v4542_v54 = vsel %vm2692_vm9, %v4508_v55, 0 }
 0x7d4   : > { %v8114_v52 = vpop.eup %8113  ;;  %v10544_v36 = vand.u32 4294901760, %v4542_v54  ;;  %v4651_v55 = vand.u32 4294901760, %v4650_v57 }
 0x7d5   : > { %v4509_v26 = vmul.f32 %v8114_v52, %v10435_v20  ;;  %v4754_v11 = vsub.f32 %v10531_v22, %v4753_v49  ;;  %v10551_v21 = vsub.f32 %v4513_v10, %v10537_v32  ;;  %7673 = vmatpush3.msra.mxu0 %v10537_v32  ;;  %7704 = vmatpush3.msra.mxu1 %v4748_v27 }
 0x7d6   : > { %7675 = vmatmul.mubr.f32.vlgmr.msra.gmra.mxu0 %v4631_v63  ;;  %7730 = vmatprep.subr.mxu0 %v11268_v3  ;;  %v10556_v44 = vsub.f32 %v4542_v54, %v10544_v36 }
 0x7d7   : > { %v4755_v39 = vand.u32 4294901760, %v4754_v11  ;;  %v4760_v51 = vand.u32 4294901760, %v10551_v21  ;;  %7731 = vmatpush3.msra.mxu0 %v10413_v43  ;;  %7705 = vmatprep.subr.mxu1 %v11268_v3  ;;  %v4545_v20 = vsel %vm2692_vm9, %v4509_v26, 0  ;;  %v5374_v43 = vld [vmem:[%s11205_s6 + $0x10] sm:$0xff] }
 0x7d8   : > { %v8116_v58 = vpop.eup %8115  ;;  %7732 = vmatprep.subr.mxu0 %v11268_v3  ;;  %7677 = vmatprep.mubr.msk.f32.mxu0 %vm8130_vm3, %v11268_v3  ;;  %v10568_v31 = vand.u32 4294901760, %v4545_v20  ;;  %v4659_v8 = vand.u32 4294901760, %v10556_v44 }
 0x7d9   : > { %v4510_v45 = vmul.f32 %v8116_v58, %v10439_v13  ;;  %v4761_v19 = vsub.f32 %v10551_v21, %v4760_v51  ;;  %7706 = vmatpush3.msra.mxu1 %v4755_v39  ;;  %7733 = vmatpush3.msra.mxu0 %v10464_v50 }
 0x7da   : > { %7678 = vmatmul.mubr.f32.gmra.mxu0 %v4641_v6  ;;  %7734 = vmatprep.subr.mxu0 %v11268_v3  ;;  %v10580_v28 = vsub.f32 %v4545_v20, %v10568_v31  ;;  %v4660_v27 = vsub.f32 %v10556_v44, %v4659_v8 }
 0x7db   : > { %v4762_v46 = vand.u32 4294901760, %v4761_v19  ;;  %7735 = vmatpush3.msra.mxu0 %v10458_v47  ;;  %7707 = vmatprep.subr.mxu1 %v11268_v3  ;;  %v4548_v13 = vsel %vm2692_vm9, %v4510_v45, 0 }
 0x7dc   : > { %v8118_v62 = vpop.eup %8117  ;;  %7736 = vmatprep.subr.mxu0 %v11268_v3  ;;  %7680 = vmatprep.mubr.msk.f32.mxu0 %vm8130_vm3, %v11268_v3  ;;  %v10586_v61 = vand.u32 4294901760, %v4548_v13  ;;  %v4669_v54 = vand.u32 4294901760, %v10580_v28  ;;  %v4661_v1 = vand.u32 4294901760, %v4660_v27 }
 0x7dd   : > { %v4511_v10 = vmul.f32 %v8118_v62, %v10443_v30  ;;  %7708 = vmatpush3.msra.mxu1 %v4762_v46  ;;  %7737 = vmatpush3.msra.mxu0 %v10494_v9 }
 0x7de   : > { %7681 = vmatmul.mubr.f32.gmra.mxu0 %v4651_v55  ;;  %7710 = vmatmul.mubr.f32.vlgmr.msra.gmra.mxu1 %v10482_v16  ;;  %v10598_v52 = vsub.f32 %v4548_v13, %v10586_v61  ;;  %v4670_v26 = vsub.f32 %v10580_v28, %v4669_v54 }
 0x7df   : > { %7738 = vmatprep.subr.mxu0 %v11268_v3  ;;  %7765 = vmatprep.subr.mxu1 %v11268_v3  ;;  %v4551_v30 = vsel %vm2692_vm9, %v4511_v10, 0 }
 0x7e0   : > { %7739 = vmatpush3.msra.mxu0 %v10512_v23  ;;  %7766 = vmatpush3.msra.mxu1 %v10408_v59  ;;  %v10603_v63 = vand.u32 4294901760, %v4551_v30  ;;  %v4679_v11 = vand.u32 4294901760, %v10598_v52  ;;  %v4671_v20 = vand.u32 4294901760, %v4670_v26 }
 0x7e1   : > { %7740 = vmatprep.subr.mxu0 %v11268_v3  ;;  %7767 = vmatprep.subr.mxu1 %v11268_v3 }
 0x7e2   : > { %7683 = vmatprep.mubr.msk.f32.mxu0 %vm8130_vm3, %v11268_v3  ;;  %7712 = vmatprep.mubr.msk.f32.mxu1 %vm8130_vm3, %v11268_v3  ;;  %v10618_v39 = vsub.f32 %v4551_v30, %v10603_v63  ;;  %v4680_v58 = vsub.f32 %v10598_v52, %v4679_v11 }
 0x7e3   : > { %7741 = vmatpush3.msra.mxu0 %v10531_v22  ;;  %7768 = vmatpush3.msra.mxu1 %v10460_v15 }
 0x7e4   : > { %7684 = vmatmul.mubr.f32.gmra.mxu0 %v4661_v1  ;;  %7713 = vmatmul.mubr.f32.gmra.mxu1 %v10491_v41  ;;  %v4689_v6 = vand.u32 4294901760, %v10618_v39  ;;  %v4681_v57 = vand.u32 4294901760, %v4680_v58 }
 0x7e5   : > { %7742 = vmatprep.subr.mxu0 %v11268_v3  ;;  %7769 = vmatprep.subr.mxu1 %v11268_v3 }
 0x7e6   : > { %7743 = vmatpush3.msra.mxu0 %v10551_v21  ;;  %7770 = vmatpush3.msra.mxu1 %v10455_v2  ;;  %v4690_v45 = vsub.f32 %v10618_v39, %v4689_v6 }
 0x7e7   : > { %7771 = vmatprep.subr.mxu1 %v11268_v3  ;;  %7686 = vmatprep.mubr.msk.f32.mxu0 %vm8130_vm3, %v11268_v3 }
 0x7e8   : > { %7715 = vmatprep.mubr.msk.f32.mxu1 %vm8130_vm3, %v11268_v3  ;;  %7772 = vmatpush3.msra.mxu1 %v10486_v56  ;;  %v4691_v19 = vand.u32 4294901760, %v4690_v45 }
 0x7e9   : > { %7687 = vmatmul.mubr.f32.gmra.mxu0 %v4671_v20  ;;  %7716 = vmatmul.mubr.f32.gmra.mxu1 %v10506_v24 }
 0x7ea   : > { %7773 = vmatprep.subr.mxu1 %v11268_v3  ;;  %7689 = vmatprep.mubr.msk.f32.mxu0 %vm8130_vm3, %v11268_v3 }
 0x7eb   : > { %7774 = vmatpush3.msra.mxu1 %v10500_v40  ;;  %7718 = vmatprep.mubr.msk.f32.mxu1 %vm8130_vm3, %v11268_v3 }
 0x7ec   : > { %7775 = vmatprep.subr.mxu1 %v11268_v3  ;;  %7800 = vmatprep.subr.mxu0 %v11268_v3 }
 0x7ed   : > { %7776 = vmatpush3.msra.mxu1 %v10517_v48  ;;  %7690 = vmatmul.mubr.f32.gmra.mxu0 %v4681_v57 }
 0x7ee   : > { %7719 = vmatmul.mubr.f32.gmra.mxu1 %v10544_v36  ;;  %7777 = vmatprep.subr.mxu1 %v11268_v3 }
 0x7ef   : > { %7778 = vmatpush3.msra.mxu1 %v10537_v32  ;;  %7692 = vmatprep.mubr.msk.f32.mxu0 %vm8130_vm3, %v11268_v3 }
 0x7f0   : > { %7721 = vmatprep.mubr.msk.f32.mxu1 %vm8130_vm3, %v11268_v3  ;;  %7835 = vmatprep.subr.mxu1 %v11268_v3 }
 0x7f1   : > { %7693 = vmatmul.mubr.f32.gmra.mxu0 %v4691_v19  ;;  %v5373_v19 = vld [vmem:[%s11205_s6 + $0x8] sm:$0xff] }
 0x7f2   : > { %7722 = vmatmul.mubr.f32.gmra.mxu1 %v10568_v31  ;;  %7744 = vmatprep.mubr.msk.f32.mxu0 %vm8130_vm3, %v11268_v3 }
 0x7f3   : > { %7724 = vmatprep.mubr.msk.f32.mxu1 %vm8130_vm3, %v11268_v3 }
 0x7f5   : > { %7745 = vmatmul.mubr.f32.vlgmr.msra.gmra.mxu0 %v10489_v0 }
 0x7f6   : > { %7725 = vmatmul.mubr.f32.gmra.mxu1 %v10586_v61  ;;  %7801 = vmatpush3.msra.mxu0 %v4718_v18 }
 0x7f7   : > { %7802 = vmatprep.subr.mxu0 %v11268_v3  ;;  %7727 = vmatprep.mubr.msk.f32.mxu1 %vm8130_vm3, %v11268_v3 }
 0x7f8   : > { %7803 = vmatpush3.msra.mxu0 %v4725_v35  ;;  %7747 = vmatprep.mubr.msk.f32.mxu0 %vm8130_vm3, %v11268_v3 }
 0x7f9   : > { %7804 = vmatprep.subr.mxu0 %v11268_v3  ;;  %7748 = vmatmul.mubr.f32.gmra.mxu0 %v10504_v60 }
 0x7fa   : > { %7728 = vmatmul.mubr.f32.gmra.mxu1 %v10603_v63  ;;  %7805 = vmatpush3.msra.mxu0 %v4732_v25 }
 0x7fb   : > { %7806 = vmatprep.subr.mxu0 %v11268_v3  ;;  %7750 = vmatprep.mubr.msk.f32.mxu0 %vm8130_vm3, %v11268_v3 }
 0x7fc   : > { %7807 = vmatpush3.msra.mxu0 %v4739_v34  ;;  %7779 = vmatprep.mubr.msk.f32.mxu1 %vm8130_vm3, %v11268_v3 }
 0x7fd   : > { %7808 = vmatprep.subr.mxu0 %v11268_v3  ;;  %7751 = vmatmul.mubr.f32.gmra.mxu0 %v10524_v14 }
 0x7fe   : > { %7780 = vmatmul.mubr.f32.vlgmr.msra.gmra.mxu1 %v4629_v5  ;;  %7809 = vmatpush3.msra.mxu0 %v4746_v7 }
 0x7ff   : > { %7836 = vmatpush3.msra.mxu1 %v10408_v59  ;;  %7810 = vmatprep.subr.mxu0 %v11268_v3  ;;  %v5375_v59 = vld [vmem:[%s11205_s6 + $0x18] sm:$0xff] }
 0x800   : > { %7837 = vmatprep.subr.mxu1 %v11268_v3  ;;  %7811 = vmatpush3.msra.mxu0 %v4753_v49  ;;  %v10799_v18 = vand.u32 4294901760, %v5375_v59 }
 0x801   : > { %7838 = vmatpush3.msra.mxu1 %v10460_v15  ;;  %7753 = vmatprep.mubr.msk.f32.mxu0 %vm8130_vm3, %v11268_v3 }
 0x802   : > { %7782 = vmatprep.mubr.msk.f32.mxu1 %vm8130_vm3, %v11268_v3  ;;  %7812 = vmatprep.subr.mxu0 %v11268_v3  ;;  %v10805_v47 = vsub.f32 %v5375_v59, %v10799_v18 }
 0x803   : > { %7839 = vmatprep.subr.mxu1 %v11268_v3  ;;  %7754 = vmatmul.mubr.f32.gmra.mxu0 %v10556_v44 }
 0x804   : > { %7783 = vmatmul.mubr.f32.gmra.mxu1 %v4639_v12  ;;  %7813 = vmatpush3.msra.mxu0 %v4760_v51  ;;  %v5570_v25 = vand.u32 4294901760, %v10805_v47 }
 0x805   : > { %7840 = vmatpush3.msra.mxu1 %v10455_v2  ;;  %7756 = vmatprep.mubr.msk.f32.mxu0 %vm8130_vm3, %v11268_v3  ;;  %v10801_v2 = vand.u32 4294901760, %v5374_v43 }
 0x806   : > { %7841 = vmatprep.subr.mxu1 %v11268_v3  ;;  %7785 = vmatprep.mubr.msk.f32.mxu1 %vm8130_vm3, %v11268_v3  ;;  %v5571_v35 = vsub.f32 %v10805_v47, %v5570_v25 }
 0x807   : > { %7842 = vmatpush3.msra.mxu1 %v10486_v56  ;;  %7757 = vmatmul.mubr.f32.gmra.mxu0 %v10580_v28  ;;  %v10808_v15 = vsub.f32 %v5374_v43, %v10801_v2  ;;  %v10858_v43 = vand.u32 4294901760, %v5373_v19 }
 0x808   : > { %7843 = vmatprep.subr.mxu1 %v11268_v3  ;;  %7786 = vmatmul.mubr.f32.gmra.mxu1 %v4649_v17  ;;  %v5572_v56 = vand.u32 4294901760, %v5571_v35 }
 0x809   : > { %7844 = vmatpush3.msra.mxu1 %v10500_v40  ;;  %7759 = vmatprep.mubr.msk.f32.mxu0 %vm8130_vm3, %v11268_v3  ;;  %v5577_v50 = vand.u32 4294901760, %v10808_v15 }
 0x80a   : > { %7845 = vmatprep.subr.mxu1 %v11268_v3  ;;  %7788 = vmatprep.mubr.msk.f32.mxu1 %vm8130_vm3, %v11268_v3 }
 0x80b   : > { %7846 = vmatpush3.msra.mxu1 %v10517_v48  ;;  %7760 = vmatmul.mubr.f32.gmra.mxu0 %v10598_v52 }
 0x80c   : > { %7847 = vmatprep.subr.mxu1 %v11268_v3  ;;  %7789 = vmatmul.mubr.f32.gmra.mxu1 %v4659_v8 }
 0x80d   : > { %7848 = vmatpush3.msra.mxu1 %v10537_v32  ;;  %7762 = vmatprep.mubr.msk.f32.mxu0 %vm8130_vm3, %v11268_v3 }
 0x80e   : > { %7791 = vmatprep.mubr.msk.f32.mxu1 %vm8130_vm3, %v11268_v3  ;;  %7870 = vmatprep.subr.mxu0 %v11268_v3 }
 0x80f   : > { %7763 = vmatmul.mubr.f32.gmra.mxu0 %v10618_v39  ;;  %7899 = vmatprep.subr.mxu1 %v11268_v3 }
 0x810   : > { %7792 = vmatmul.mubr.f32.gmra.mxu1 %v4669_v54  ;;  %7814 = vmatprep.mubr.msk.f32.mxu0 %vm8130_vm3, %v11268_v3 }
 0x811   : > { %7794 = vmatprep.mubr.msk.f32.mxu1 %vm8130_vm3, %v11268_v3 }
 0x813   : > { %7815 = vmatmul.mubr.f32.vlgmr.msra.gmra.mxu0 %v10482_v16 }
 0x814   : > { %7795 = vmatmul.mubr.f32.gmra.mxu1 %v4679_v11  ;;  %7817 = vmatprep.mubr.msk.f32.mxu0 %vm8130_vm3, %v11268_v3 }
 0x815   : > { %7797 = vmatprep.mubr.msk.f32.mxu1 %vm8130_vm3, %v11268_v3  ;;  %7871 = vmatpush3.msra.mxu0 %v10799_v18 }
 0x816   : > { %7872 = vmatprep.subr.mxu0 %v11268_v3 }
 0x817   : > { %7818 = vmatmul.mubr.f32.gmra.mxu0 %v10491_v41 }
 0x818   : > { %7798 = vmatmul.mubr.f32.gmra.mxu1 %v4689_v6  ;;  %7820 = vmatprep.mubr.msk.f32.mxu0 %vm8130_vm3, %v11268_v3 }
 0x819   : > { %7849 = vmatprep.mubr.msk.f32.mxu1 %vm8130_vm3, %v11268_v3  ;;  %7873 = vmatpush3.msra.mxu0 %v10801_v2 }
 0x81a   : > { %7874 = vmatprep.subr.mxu0 %v11268_v3 }
 0x81b   : > { %7821 = vmatmul.mubr.f32.gmra.mxu0 %v10506_v24 }
 0x81c   : > { %7850 = vmatmul.mubr.f32.vlgmr.msra.gmra.mxu1 %v10482_v16  ;;  %7823 = vmatprep.mubr.msk.f32.mxu0 %vm8130_vm3, %v11268_v3  ;;  %v5578_v16 = vsub.f32 %v10808_v15, %v5577_v50 }
 0x81d   : > { %7852 = vmatprep.mubr.msk.f32.mxu1 %vm8130_vm3, %v11268_v3  ;;  %7900 = vmatpush3.msra.mxu1 %v5572_v56 }
 0x81e   : > { %v5579_v0 = vand.u32 4294901760, %v5578_v16  ;;  %7901 = vmatprep.subr.mxu1 %v11268_v3  ;;  %v5372_v16 = vld [vmem:[%s11205_s6] sm:$0xff]  ;;  %7875 = vmatpush3.msra.mxu0 %v10858_v43 }
 0x81f   : > { %7824 = vmatmul.mubr.f32.gmra.mxu0 %v10544_v36  ;;  %7876 = vmatprep.subr.mxu0 %v11268_v3 }
 0x820   : > { %7853 = vmatmul.mubr.f32.gmra.mxu1 %v10491_v41  ;;  %7826 = vmatprep.mubr.msk.f32.mxu0 %vm8130_vm3, %v11268_v3 }
 0x821   : > { %7855 = vmatprep.mubr.msk.f32.mxu1 %vm8130_vm3, %v11268_v3  ;;  %7902 = vmatpush3.msra.mxu1 %v5579_v0  ;;  %v10867_v0 = vsub.f32 %v5373_v19, %v10858_v43 }
 0x822   : > { %7903 = vmatprep.subr.mxu1 %v11268_v3 }
 0x823   : > { %7827 = vmatmul.mubr.f32.gmra.mxu0 %v10568_v31 }
 0x824   : > { %7856 = vmatmul.mubr.f32.gmra.mxu1 %v10506_v24  ;;  %7829 = vmatprep.mubr.msk.f32.mxu0 %vm8130_vm3, %v11268_v3 }
 0x825   : > { %7858 = vmatprep.mubr.msk.f32.mxu1 %vm8130_vm3, %v11268_v3 }
 0x827   : > { %7830 = vmatmul.mubr.f32.gmra.mxu0 %v10586_v61 }
 0x828   : > { %7859 = vmatmul.mubr.f32.gmra.mxu1 %v10544_v36  ;;  %7832 = vmatprep.mubr.msk.f32.mxu0 %vm8130_vm3, %v11268_v3 }
 0x829   : > { %7861 = vmatprep.mubr.msk.f32.mxu1 %vm8130_vm3, %v11268_v3 }
 0x82b   : > { %7833 = vmatmul.mubr.f32.gmra.mxu0 %v10603_v63 }
 0x82c   : > { %7862 = vmatmul.mubr.f32.gmra.mxu1 %v10568_v31  ;;  %7878 = vmatprep.mubr.msk.f32.mxu0 %vm8130_vm3, %v11268_v3 }
 0x82d   : > { %7864 = vmatprep.mubr.msk.f32.mxu1 %vm8130_vm3, %v11268_v3 }
 0x830   : > { %7865 = vmatmul.mubr.f32.gmra.mxu1 %v10586_v61 }
 0x831   : > { %7867 = vmatprep.mubr.msk.f32.mxu1 %vm8130_vm3, %v11268_v3 }
 0x834   : > { %7868 = vmatmul.mubr.f32.gmra.mxu1 %v10603_v63 }
 0x835   : > { %7907 = vmatprep.mubr.msk.f32.mxu1 %vm8130_vm3, %v11268_v3 }
 0x896   : > { %v10823_v41 = vpop.f32.mrf.mxu0 }
 0x898   : > { %v7676_v9 = vpop.f32.mrf.mxu0 }
 0x899   : > { %v10869_v9 = vand.u32 4294901760, %v5372_v16 }
 0x89a   : > { %v10825_v34 = vpop.f32.mrf.mxu0 }
 0x89b   : > { %7877 = vmatpush3.msra.mxu0 %v10869_v9 }
 0x89c   : > { %v7679_v40 = vpop.f32.mrf.mxu0  ;;  %7928 = vmatprep.subr.mxu0 %v11268_v3 }
 0x89e   : > { %v10827_v5 = vpop.f32.mrf.mxu0  ;;  %v10829_v60 = vpop.f32.mrf.mxu1 }
 0x8a0   : > { %v7682_v24 = vpop.f32.mrf.mxu0  ;;  %v7711_v23 = vpop.f32.mrf.mxu1 }
 0x8a1   : > { %v5584_v23 = vand.u32 4294901760, %v10867_v0 }
 0x8a4   : > { %v10831_v7 = vpop.f32.mrf.mxu0  ;;  %v10833_v48 = vpop.f32.mrf.mxu1 }
 0x8a6   : > { %v7685_v12 = vpop.f32.mrf.mxu0  ;;  %v7714_v14 = vpop.f32.mrf.mxu1 }
 0x8a7   : > { %v10874_v12 = vsub.f32 %v5372_v16, %v10869_v9 }
 0x8a9   : > { %v10835_v22 = vpop.f32.mrf.mxu0  ;;  %v10837_v49 = vpop.f32.mrf.mxu1 }
 0x8ab   : > { %v7688_v32 = vpop.f32.mrf.mxu0  ;;  %v7717_v17 = vpop.f32.mrf.mxu1 }
 0x8ac   : > { %v5585_v17 = vsub.f32 %v10867_v0, %v5584_v23 }
 0x8ad   : > { %v10839_v36 = vpop.f32.mrf.mxu0 }
 0x8ae   : > { %v10841_v21 = vpop.f32.mrf.mxu1 }
 0x8af   : > { %v7691_v44 = vpop.f32.mrf.mxu0 }
 0x8b0   : > { %v7720_v51 = vpop.f32.mrf.mxu1  ;;  %v5591_v44 = vand.u32 4294901760, %v10874_v12 }
 0x8b1   : > { %v10843_v31 = vpop.f32.mrf.mxu0 }
 0x8b2   : > { %v10845_v8 = vpop.f32.mrf.mxu1 }
 0x8b3   : > { %v7694_v46 = vpop.f32.mrf.mxu0 }
 0x8b4   : > { %v7723_v28 = vpop.f32.mrf.mxu1 }
 0x8b5   : > { %v4921_v13 = vpop.f32.mrf.mxu0  ;;  %v5586_v28 = vand.u32 4294901760, %v5585_v17 }
 0x8b6   : > { %v10847_v62 = vpop.f32.mrf.mxu1 }
 0x8b7   : > { %v7746_v55 = vpop.f32.mrf.mxu0  ;;  %7904 = vmatpush3.msra.mxu1 %v5586_v28 }
 0x8b8   : > { %v7726_v61 = vpop.f32.mrf.mxu1  ;;  %v5592_v55 = vsub.f32 %v10874_v12, %v5591_v44  ;;  %7905 = vmatprep.subr.mxu1 %v11268_v3 }
 0x8b9   : > { %v4928_v10 = vpop.f32.mrf.mxu0 }
 0x8ba   : > { %v10849_v27 = vpop.f32.mrf.mxu1 }
 0x8bb   : > { %v7749_v54 = vpop.f32.mrf.mxu0 }
 0x8bc   : > { %v7729_v52 = vpop.f32.mrf.mxu1 }
 0x8bd   : > { %v4935_v30 = vpop.f32.mrf.mxu0  ;;  %v5593_v52 = vand.u32 4294901760, %v5592_v55 }
 0x8be   : > { %v5043_v63 = vpop.f32.mrf.mxu1 }
 0x8bf   : > { %v7752_v1 = vpop.f32.mrf.mxu0  ;;  %7906 = vmatpush3.msra.mxu1 %v5593_v52 }
 0x8c0   : > { %v7781_v26 = vpop.f32.mrf.mxu1  ;;  %v4800_v1 = vadd.f32 %v10829_v60, %v10823_v41  ;;  %7957 = vmatprep.subr.mxu1 %v11268_v3  ;;  %v4812_v60 = vadd.f32 %v10837_v49, %v10827_v5 }
 0x8c3   : > { %v10851_v11 = vpop.f32.mrf.mxu0 }
 0x8c4   : > { %v5051_v39 = vpop.f32.mrf.mxu1 }
 0x8c5   : > { %v7755_v20 = vpop.f32.mrf.mxu0 }
 0x8c6   : > { %v7784_v58 = vpop.f32.mrf.mxu1 }
 0x8c7   : > { %v10853_v6 = vpop.f32.mrf.mxu0  ;;  %v4922_v58 = vadd.f32 %v4921_v13, %v4800_v1  ;;  %v4936_v1 = vadd.f32 %v4935_v30, %v4812_v60 }
 0x8c8   : > { %v5059_v57 = vpop.f32.mrf.mxu1 }
 0x8c9   : > { %v7758_v45 = vpop.f32.mrf.mxu0  ;;  %v5044_v16 = vadd.f32 %v5043_v63, %v4922_v58  ;;  %v5060_v63 = vadd.f32 %v5059_v57, %v4936_v1 }
 0x8ca   : > { %v7787_v59 = vpop.f32.mrf.mxu1 }
 0x8cb   : > { %v10860_v35 = vpop.f32.mrf.mxu0  ;;  %v4806_v59 = vadd.f32 %v10833_v48, %v10825_v34 }
 0x8cc   : > { %v5067_v56 = vpop.f32.mrf.mxu1 }
 0x8cd   : > { %v7761_v40 = vpop.f32.mrf.mxu0  ;;  %v4929_v17 = vadd.f32 %v4928_v10, %v4806_v59  ;;  %v4818_v10 = vadd.f32 %v10841_v21, %v10831_v7 }
 0x8ce   : > { %v7790_v24 = vpop.f32.mrf.mxu1 }
 0x8cf   : > { %v10877_v14 = vpop.f32.mrf.mxu0  ;;  %v5052_v28 = vadd.f32 %v5051_v39, %v4929_v17  ;;  %v4943_v5 = vadd.f32 %v10851_v11, %v4818_v10  ;;  %v4830_v11 = vadd.f32 %v10847_v62, %v10839_v36 }
 0x8d0   : > { %v5075_v32 = vpop.f32.mrf.mxu1 }
 0x8d1   : > { %v7764_v51 = vpop.f32.mrf.mxu0  ;;  %v5068_v59 = vadd.f32 %v5067_v56, %v4943_v5 }
 0x8d2   : > { %v7793_v46 = vpop.f32.mrf.mxu1 }
 0x8d3   : > { %v5183_v61 = vpop.f32.mrf.mxu0 }
 0x8d4   : > { %v5083_v54 = vpop.f32.mrf.mxu1  ;;  %v5184_v51 = vadd.f32 %v5183_v61, %v5044_v16 }
 0x8d5   : > { %v7816_v26 = vpop.f32.mrf.mxu0 }
 0x8d6   : > { %v7796_v20 = vpop.f32.mrf.mxu1 }
 0x8d7   : > { %v5189_v45 = vpop.f32.mrf.mxu0 }
 0x8d8   : > { %v5091_v19 = vpop.f32.mrf.mxu1  ;;  %v5190_v26 = vadd.f32 %v5189_v45, %v5052_v28  ;;  %v4824_v45 = vadd.f32 %v10845_v8, %v10835_v22  ;;  %v4957_v22 = vadd.f32 %v10860_v35, %v4830_v11 }
 0x8d9   : > { %v7819_v40 = vpop.f32.mrf.mxu0 }
 0x8da   : > { %v7799_v24 = vpop.f32.mrf.mxu1  ;;  %v4950_v7 = vadd.f32 %v10853_v6, %v4824_v45  ;;  %v4836_v6 = vadd.f32 %v10849_v27, %v10843_v31 }
 0x8db   : > { %v5195_v46 = vpop.f32.mrf.mxu0 }
 0x8dc   : > { %v5297_v41 = vpop.f32.mrf.mxu1  ;;  %v5196_v49 = vadd.f32 %v5195_v46, %v5060_v63  ;;  %v4964_v36 = vadd.f32 %v10877_v14, %v4836_v6 }
 0x8dd   : > { %v5298_v55 = vadd.f32 %v5297_v41, %v5184_v51  ;;  %v7822_v13 = vpop.f32.mrf.mxu0  ;;  %v5076_v51 = vadd.f32 %v5075_v32, %v4950_v7 }
 0x8de   : > { %v7851_v52 = vpop.f32.mrf.mxu1 }
 0x8df   : > { %5344 = vrot.lane.b32.xlu0 %v5298_v55, %s8135_s24  ;;  %v5201_v34 = vpop.f32.mrf.mxu0  ;;  %v5084_v55 = vadd.f32 %v5083_v54, %v4957_v22 }
 0x8e0   : > { %v5303_v48 = vpop.f32.mrf.mxu1  ;;  %v5202_v21 = vadd.f32 %v5201_v34, %v5068_v59 }
 0x8e1   : > { %v5304_v61 = vadd.f32 %v5303_v48, %v5190_v26  ;;  %v7825_v20 = vpop.f32.mrf.mxu0  ;;  %v5092_v26 = vadd.f32 %v5091_v19, %v4964_v36 }
 0x8e2   : > { %v7854_v58 = vpop.f32.mrf.mxu1 }
 0x8e3   : > { %5346 = vrot.lane.b32.xlu0 %v5304_v61, %s8135_s24  ;;  %v5207_v39 = vpop.f32.mrf.mxu0 }
 0x8e4   : > { %v5309_v30 = vpop.f32.mrf.mxu1  ;;  %v5208_v8 = vadd.f32 %v5207_v39, %v5076_v51 }
 0x8e5   : > { %v5310_v16 = vadd.f32 %v5309_v30, %v5196_v49  ;;  %v7828_v40 = vpop.f32.mrf.mxu0 }
 0x8e6   : > { %v7857_v24 = vpop.f32.mrf.mxu1 }
 0x8e7   : > { %5348 = vrot.lane.b32.xlu0 %v5310_v16, %s8135_s24  ;;  %v5213_v57 = vpop.f32.mrf.mxu0 }
 0x8e8   : > { %v5315_v17 = vpop.f32.mrf.mxu1  ;;  %v5214_v62 = vadd.f32 %v5213_v57, %v5084_v55 }
 0x8e9   : > { %v5316_v46 = vadd.f32 %v5315_v17, %v5202_v21  ;;  %v7831_v41 = vpop.f32.mrf.mxu0 }
 0x8ea   : > { %v7860_v60 = vpop.f32.mrf.mxu1 }
 0x8eb   : > { %5350 = vrot.lane.b32.xlu0 %v5316_v46, %s8135_s24  ;;  %v5219_v56 = vpop.f32.mrf.mxu0 }
 0x8ec   : > { %v5321_v28 = vpop.f32.mrf.mxu1  ;;  %v5220_v48 = vadd.f32 %v5219_v56, %v5092_v26 }
 0x8ed   : > { %v5322_v13 = vadd.f32 %v5321_v28, %v5208_v8  ;;  %v7834_v52 = vpop.f32.mrf.mxu0 }
 0x8ee   : > { %v7863_v1 = vpop.f32.mrf.mxu1 }
 0x8ef   : > { %5352 = vrot.lane.b32.xlu0 %v5322_v13, %s8135_s24 }
 0x8f0   : > { %v5327_v32 = vpop.f32.mrf.mxu1 }
 0x8f1   : > { %v5328_v35 = vadd.f32 %v5327_v32, %v5214_v62 }
 0x8f2   : > { %v7866_v34 = vpop.f32.mrf.mxu1 }
 0x8f3   : > { %5354 = vrot.lane.b32.xlu1 %v5328_v35, %s8135_s24 }
 0x8f4   : > { %v5333_v10 = vpop.f32.mrf.mxu1 }
 0x8f5   : > { %v5334_v63 = vadd.f32 %v5333_v10, %v5220_v48 }
 0x8f6   : > { %v7869_v61 = vpop.f32.mrf.mxu1 }
 0x8f7   : > { %5356 = vrot.lane.b32.xlu0 %v5334_v63, %s8135_s24 }
 0x951   : > { %v5345_v31 = vpop.permute.xlu0 %5344 }
 0x952   : > { %v5365_v27 = vsel %vm1881_vm8, %v10305_v42, %v5345_v31 }
 0x953   : > { %v5384_v14 = vsel %vm333_vm1, %v5365_v27, 0 }
 0x954   : > { %v10917_v54 = vand.u32 4294901760, %v5384_v14 }
 0x955   : > { %v5347_v20 = vpop.permute.xlu0 %5346 }
 0x956   : > { %v10920_v19 = vsub.f32 %v5384_v14, %v10917_v54  ;;  %v5366_v58 = vsel %vm1881_vm8, %v10307_v33, %v5347_v20  ;;  %7908 = vmatmul.mubr.f32.vlgmr.msra.gmra.mxu1 %v10917_v54 }
 0x957   : > { %v5387_v5 = vsel %vm333_vm1, %v5366_v58, 0  ;;  %7910 = vmatprep.mubr.msk.f32.mxu1 %vm8130_vm3, %v11268_v3  ;;  %7958 = vmatpush3.msra.mxu1 %v10799_v18 }
 0x958   : > { %v5475_v42 = vand.u32 4294901760, %v10920_v19  ;;  %v10930_v49 = vand.u32 4294901760, %v5387_v5  ;;  %7959 = vmatprep.subr.mxu1 %v11268_v3 }
 0x959   : > { %v5349_v39 = vpop.permute.xlu0 %5348  ;;  %7960 = vmatpush3.msra.mxu1 %v10801_v2 }
 0x95a   : > { %v5476_v33 = vsub.f32 %v10920_v19, %v5475_v42  ;;  %v10938_v30 = vsub.f32 %v5387_v5, %v10930_v49  ;;  %v5367_v45 = vsel %vm1881_vm8, %v10309_v37, %v5349_v39  ;;  %7911 = vmatmul.mubr.f32.gmra.mxu1 %v10930_v49  ;;  %7961 = vmatprep.subr.mxu1 %v11268_v3 }
 0x95b   : > { %v5390_v59 = vsel %vm333_vm1, %v5367_v45, 0  ;;  %7913 = vmatprep.mubr.msk.f32.mxu1 %vm8130_vm3, %v11268_v3  ;;  %7962 = vmatpush3.msra.mxu1 %v10858_v43 }
 0x95c   : > { %v5477_v16 = vand.u32 4294901760, %v5476_v33  ;;  %v5485_v40 = vand.u32 4294901760, %v10938_v30  ;;  %v10949_v24 = vand.u32 4294901760, %v5390_v59  ;;  %7963 = vmatprep.subr.mxu1 %v11268_v3 }
 0x95d   : > { %v5351_v7 = vpop.permute.xlu0 %5350  ;;  %7964 = vmatpush3.msra.mxu1 %v10869_v9 }
 0x95e   : > { %v10954_v37 = vsub.f32 %v5390_v59, %v10949_v24  ;;  %v5368_v21 = vsel %vm1881_vm8, %v10311_v4, %v5351_v7  ;;  %7879 = vmatmul.mubr.f32.vlgmr.msra.gmra.mxu0 %v5477_v16  ;;  %7914 = vmatmul.mubr.f32.gmra.mxu1 %v10949_v24  ;;  %v5486_v57 = vsub.f32 %v10938_v30, %v5485_v40 }
 0x95f   : > { %v5393_v17 = vsel %vm333_vm1, %v5368_v21, 0  ;;  %7881 = vmatprep.mubr.msk.f32.mxu0 %vm8130_vm3, %v11268_v3  ;;  %7916 = vmatprep.mubr.msk.f32.mxu1 %vm8130_vm3, %v11268_v3 }
 0x960   : > { %v5495_v11 = vand.u32 4294901760, %v10954_v37  ;;  %v10968_v51 = vand.u32 4294901760, %v5393_v17  ;;  %7929 = vmatpush3.msra.mxu0 %v10805_v47  ;;  %v5487_v4 = vand.u32 4294901760, %v5486_v57  ;;  %8015 = vmatprep.subr.mxu1 %v11268_v3 }
 0x961   : > { %v5353_v46 = vpop.permute.xlu0 %5352  ;;  %7930 = vmatprep.subr.mxu0 %v11268_v3 }
 0x962   : > { %v10974_v41 = vsub.f32 %v5393_v17, %v10968_v51  ;;  %v5369_v60 = vsel %vm1881_vm8, %v10313_v38, %v5353_v46  ;;  %7882 = vmatmul.mubr.f32.gmra.mxu0 %v5487_v4  ;;  %7917 = vmatmul.mubr.f32.gmra.mxu1 %v10968_v51  ;;  %v5496_v22 = vsub.f32 %v10954_v37, %v5495_v11 }
 0x963   : > { %v5396_v8 = vsel %vm333_vm1, %v5369_v60, 0  ;;  %7884 = vmatprep.mubr.msk.f32.mxu0 %vm8130_vm3, %v11268_v3  ;;  %7919 = vmatprep.mubr.msk.f32.mxu1 %vm8130_vm3, %v11268_v3 }
 0x964   : > { %v5505_v56 = vand.u32 4294901760, %v10974_v41  ;;  %v10988_v28 = vand.u32 4294901760, %v5396_v8  ;;  %v5497_v38 = vand.u32 4294901760, %v5496_v22  ;;  %7931 = vmatpush3.msra.mxu0 %v10808_v15 }
 0x965   : > { %v5355_v6 = vpop.permute.xlu1 %5354  ;;  %7932 = vmatprep.subr.mxu0 %v11268_v3 }
 0x966   : > { %v10993_v55 = vsub.f32 %v5396_v8, %v10988_v28  ;;  %v5370_v13 = vsel %vm1881_vm8, %v10317_v29, %v5355_v6  ;;  %7885 = vmatmul.mubr.f32.gmra.mxu0 %v5497_v38  ;;  %7920 = vmatmul.mubr.f32.gmra.mxu1 %v10988_v28  ;;  %v5506_v52 = vsub.f32 %v10974_v41, %v5505_v56 }
 0x967   : > { %v5399_v1 = vsel %vm333_vm1, %v5370_v13, 0  ;;  %7887 = vmatprep.mubr.msk.f32.mxu0 %vm8130_vm3, %v11268_v3  ;;  %7922 = vmatprep.mubr.msk.f32.mxu1 %vm8130_vm3, %v11268_v3 }
 0x968   : > { %v5515_v36 = vand.u32 4294901760, %v10993_v55  ;;  %v11007_v62 = vand.u32 4294901760, %v5399_v1  ;;  %v5507_v29 = vand.u32 4294901760, %v5506_v52  ;;  %7933 = vmatpush3.msra.mxu0 %v10867_v0 }
 0x969   : > { %v5357_v32 = vpop.permute.xlu0 %5356  ;;  %7934 = vmatprep.subr.mxu0 %v11268_v3 }
 0x96a   : > { %v11012_v26 = vsub.f32 %v5399_v1, %v11007_v62  ;;  %v5371_v35 = vsel %vm1881_vm8, %v10321_v53, %v5357_v32  ;;  %7888 = vmatmul.mubr.f32.gmra.mxu0 %v5507_v29  ;;  %7923 = vmatmul.mubr.f32.gmra.mxu1 %v11007_v62  ;;  %v5516_v34 = vsub.f32 %v10993_v55, %v5515_v36  ;;  %v6240_v1 = vld [vmem:[%s11206_s7] ss:$0 sm:$0xff] }
 0x96b   : > { %v5402_v48 = vsel %vm333_vm1, %v5371_v35, 0  ;;  %7890 = vmatprep.mubr.msk.f32.mxu0 %vm8130_vm3, %v11268_v3  ;;  %7925 = vmatprep.mubr.msk.f32.mxu1 %vm8130_vm3, %v11268_v3 }
 0x96c   : > { %v5525_v10 = vand.u32 4294901760, %v11012_v26  ;;  %v11024_v63 = vand.u32 4294901760, %v5402_v48  ;;  %v5517_v61 = vand.u32 4294901760, %v5516_v34  ;;  %7935 = vmatpush3.msra.mxu0 %v10874_v12 }
 0x96d   : > { %7986 = vmatprep.subr.mxu0 %v11268_v3 }
 0x96e   : > { %v5534_v53 = vsub.f32 %v5402_v48, %v11024_v63  ;;  %7891 = vmatmul.mubr.f32.gmra.mxu0 %v5517_v61  ;;  %7926 = vmatmul.mubr.f32.gmra.mxu1 %v11024_v63  ;;  %v5526_v31 = vsub.f32 %v11012_v26, %v5525_v10 }
 0x96f   : > { %7893 = vmatprep.mubr.msk.f32.mxu0 %vm8130_vm3, %v11268_v3  ;;  %7965 = vmatprep.mubr.msk.f32.mxu1 %vm8130_vm3, %v11268_v3 }
 0x970   : > { %v5535_v27 = vand.u32 4294901760, %v5534_v53  ;;  %v5527_v14 = vand.u32 4294901760, %v5526_v31 }
 0x972   : > { %7894 = vmatmul.mubr.f32.gmra.mxu0 %v5527_v14  ;;  %7966 = vmatmul.mubr.f32.vlgmr.msra.gmra.mxu1 %v5475_v42  ;;  %v5536_v20 = vsub.f32 %v5534_v53, %v5535_v27 }
 0x973   : > { %7896 = vmatprep.mubr.msk.f32.mxu0 %vm8130_vm3, %v11268_v3  ;;  %7968 = vmatprep.mubr.msk.f32.mxu1 %vm8130_vm3, %v11268_v3 }
 0x974   : > { %v5537_v58 = vand.u32 4294901760, %v5536_v20  ;;  %8016 = vmatpush3.msra.mxu1 %v10799_v18 }
 0x975   : > { %8017 = vmatprep.subr.mxu1 %v11268_v3 }
 0x976   : > { %7897 = vmatmul.mubr.f32.gmra.mxu0 %v5537_v58  ;;  %7969 = vmatmul.mubr.f32.gmra.mxu1 %v5485_v40 }
 0x977   : > { %7936 = vmatprep.mubr.msk.f32.mxu0 %vm8130_vm3, %v11268_v3  ;;  %7971 = vmatprep.mubr.msk.f32.mxu1 %vm8130_vm3, %v11268_v3 }
 0x978   : > { %8018 = vmatpush3.msra.mxu1 %v10801_v2 }
 0x979   : > { %8019 = vmatprep.subr.mxu1 %v11268_v3 }
 0x97a   : > { %7937 = vmatmul.mubr.f32.vlgmr.msra.gmra.mxu0 %v10920_v19  ;;  %7972 = vmatmul.mubr.f32.gmra.mxu1 %v5495_v11 }
 0x97b   : > { %7939 = vmatprep.mubr.msk.f32.mxu0 %vm8130_vm3, %v11268_v3  ;;  %7974 = vmatprep.mubr.msk.f32.mxu1 %vm8130_vm3, %v11268_v3 }
 0x97c   : > { %7987 = vmatpush3.msra.mxu0 %v5570_v25  ;;  %8020 = vmatpush3.msra.mxu1 %v10858_v43 }
 0x97d   : > { %7988 = vmatprep.subr.mxu0 %v11268_v3  ;;  %8021 = vmatprep.subr.mxu1 %v11268_v3 }
 0x97e   : > { %7940 = vmatmul.mubr.f32.gmra.mxu0 %v10938_v30  ;;  %7975 = vmatmul.mubr.f32.gmra.mxu1 %v5505_v56 }
 0x97f   : > { %7942 = vmatprep.mubr.msk.f32.mxu0 %vm8130_vm3, %v11268_v3  ;;  %7977 = vmatprep.mubr.msk.f32.mxu1 %vm8130_vm3, %v11268_v3 }
 0x980   : > { %7989 = vmatpush3.msra.mxu0 %v5577_v50  ;;  %8022 = vmatpush3.msra.mxu1 %v10869_v9 }
 0x981   : > { %7990 = vmatprep.subr.mxu0 %v11268_v3 }
 0x982   : > { %7943 = vmatmul.mubr.f32.gmra.mxu0 %v10954_v37  ;;  %7978 = vmatmul.mubr.f32.gmra.mxu1 %v5515_v36 }
 0x983   : > { %7945 = vmatprep.mubr.msk.f32.mxu0 %vm8130_vm3, %v11268_v3  ;;  %7980 = vmatprep.mubr.msk.f32.mxu1 %vm8130_vm3, %v11268_v3 }
 0x984   : > { %7991 = vmatpush3.msra.mxu0 %v5584_v23 }
 0x985   : > { %7992 = vmatprep.subr.mxu0 %v11268_v3 }
 0x986   : > { %7946 = vmatmul.mubr.f32.gmra.mxu0 %v10974_v41  ;;  %7981 = vmatmul.mubr.f32.gmra.mxu1 %v5525_v10 }
 0x987   : > { %7948 = vmatprep.mubr.msk.f32.mxu0 %vm8130_vm3, %v11268_v3  ;;  %7983 = vmatprep.mubr.msk.f32.mxu1 %vm8130_vm3, %v11268_v3 }
 0x988   : > { %7993 = vmatpush3.msra.mxu0 %v5591_v44 }
 0x98a   : > { %7949 = vmatmul.mubr.f32.gmra.mxu0 %v10993_v55  ;;  %7984 = vmatmul.mubr.f32.gmra.mxu1 %v5535_v27 }
 0x98b   : > { %7951 = vmatprep.mubr.msk.f32.mxu0 %vm8130_vm3, %v11268_v3  ;;  %8023 = vmatprep.mubr.msk.f32.mxu1 %vm8130_vm3, %v11268_v3 }
 0x98e   : > { %7952 = vmatmul.mubr.f32.gmra.mxu0 %v11012_v26  ;;  %8024 = vmatmul.mubr.f32.vlgmr.msra.gmra.mxu1 %v10917_v54 }
 0x98f   : > { %7954 = vmatprep.mubr.msk.f32.mxu0 %vm8130_vm3, %v11268_v3  ;;  %8026 = vmatprep.mubr.msk.f32.mxu1 %vm8130_vm3, %v11268_v3 }
 0x992   : > { %7955 = vmatmul.mubr.f32.gmra.mxu0 %v5534_v53  ;;  %8027 = vmatmul.mubr.f32.gmra.mxu1 %v10930_v49 }
 0x993   : > { %7994 = vmatprep.mubr.msk.f32.mxu0 %vm8130_vm3, %v11268_v3  ;;  %8029 = vmatprep.mubr.msk.f32.mxu1 %vm8130_vm3, %v11268_v3 }
 0x996   : > { %7995 = vmatmul.mubr.f32.vlgmr.msra.gmra.mxu0 %v10917_v54  ;;  %8030 = vmatmul.mubr.f32.gmra.mxu1 %v10949_v24 }
 0x997   : > { %7997 = vmatprep.mubr.msk.f32.mxu0 %vm8130_vm3, %v11268_v3  ;;  %8032 = vmatprep.mubr.msk.f32.mxu1 %vm8130_vm3, %v11268_v3 }
 0x99a   : > { %7998 = vmatmul.mubr.f32.gmra.mxu0 %v10930_v49  ;;  %8033 = vmatmul.mubr.f32.gmra.mxu1 %v10968_v51 }
 0x99b   : > { %8000 = vmatprep.mubr.msk.f32.mxu0 %vm8130_vm3, %v11268_v3  ;;  %8035 = vmatprep.mubr.msk.f32.mxu1 %vm8130_vm3, %v11268_v3 }
 0x99e   : > { %8001 = vmatmul.mubr.f32.gmra.mxu0 %v10949_v24  ;;  %8036 = vmatmul.mubr.f32.gmra.mxu1 %v10988_v28 }
 0x99f   : > { %8003 = vmatprep.mubr.msk.f32.mxu0 %vm8130_vm3, %v11268_v3  ;;  %8038 = vmatprep.mubr.msk.f32.mxu1 %vm8130_vm3, %v11268_v3 }
 0x9a2   : > { %8004 = vmatmul.mubr.f32.gmra.mxu0 %v10968_v51  ;;  %8039 = vmatmul.mubr.f32.gmra.mxu1 %v11007_v62 }
 0x9a3   : > { %8006 = vmatprep.mubr.msk.f32.mxu0 %vm8130_vm3, %v11268_v3  ;;  %8041 = vmatprep.mubr.msk.f32.mxu1 %vm8130_vm3, %v11268_v3 }
 0x9a6   : > { %8007 = vmatmul.mubr.f32.gmra.mxu0 %v10988_v28  ;;  %8042 = vmatmul.mubr.f32.gmra.mxu1 %v11024_v63 }
 0x9a7   : > { %8009 = vmatprep.mubr.msk.f32.mxu0 %vm8130_vm3, %v11268_v3 }
 0x9aa   : > { %8010 = vmatmul.mubr.f32.gmra.mxu0 %v11007_v62 }
 0x9ab   : > { %8012 = vmatprep.mubr.msk.f32.mxu0 %vm8130_vm3, %v11268_v3 }
 0x9ae   : > { %8013 = vmatmul.mubr.f32.gmra.mxu0 %v11024_v63 }
 0xa16   : > { %v5630_v18 = vpop.f32.mrf.mxu1 }
 0xa18   : > { %v7909_v2 = vpop.f32.mrf.mxu1 }
 0xa1a   : > { %v5636_v47 = vpop.f32.mrf.mxu1 }
 0xa1c   : > { %v7912_v15 = vpop.f32.mrf.mxu1 }
 0xa1e   : > { %v5479_v25 = vpop.f32.mrf.mxu0  ;;  %v11137_v50 = vpop.f32.mrf.mxu1 }
 0xa1f   : > { %v5480_v26 = vadd.f32 %v6240_v1, %v5479_v25 }
 0xa20   : > { %v7880_v43 = vpop.f32.mrf.mxu0  ;;  %v7915_v0 = vpop.f32.mrf.mxu1 }
 0xa21   : > { %v5631_v61 = vadd.f32 %v5630_v18, %v5480_v26 }
 0xa22   : > { %v5489_v9 = vpop.f32.mrf.mxu0  ;;  %v11139_v23 = vpop.f32.mrf.mxu1 }
 0xa23   : > { %v5490_v63 = vadd.f32 %v6240_v1, %v5489_v9 }
 0xa24   : > { %v7883_v12 = vpop.f32.mrf.mxu0  ;;  %v7918_v44 = vpop.f32.mrf.mxu1 }
 0xa25   : > { %v5637_v2 = vadd.f32 %v5636_v47, %v5490_v63 }
 0xa26   : > { %v5499_v54 = vpop.f32.mrf.mxu0  ;;  %v11141_v19 = vpop.f32.mrf.mxu1 }
 0xa27   : > { %v5500_v58 = vadd.f32 %v6240_v1, %v5499_v54 }
 0xa28   : > { %v7886_v3 = vpop.f32.mrf.mxu0  ;;  %v7921_v5 = vpop.f32.mrf.mxu1 }
 0xa29   : > { %v5643_v5 = vadd.f32 %v11137_v50, %v5500_v58 }
 0xa2a   : > { %v5509_v42 = vpop.f32.mrf.mxu0  ;;  %v11143_v49 = vpop.f32.mrf.mxu1 }
 0xa2b   : > { %v5510_v3 = vadd.f32 %v6240_v1, %v5509_v42 }
 0xa2c   : > { %v7889_v39 = vpop.f32.mrf.mxu0  ;;  %v7924_v33 = vpop.f32.mrf.mxu1 }
 0xa2d   : > { %v5649_v42 = vadd.f32 %v11139_v23, %v5510_v3 }
 0xa2e   : > { %v11145_v30 = vpop.f32.mrf.mxu0  ;;  %v11147_v45 = vpop.f32.mrf.mxu1 }
 0xa30   : > { %v7892_v59 = vpop.f32.mrf.mxu0  ;;  %v7927_v16 = vpop.f32.mrf.mxu1 }
 0xa32   : > { %v11149_v40 = vpop.f32.mrf.mxu0  ;;  %v5865_v24 = vpop.f32.mrf.mxu1 }
 0xa34   : > { %v7895_v7 = vpop.f32.mrf.mxu0  ;;  %v7967_v37 = vpop.f32.mrf.mxu1 }
 0xa36   : > { %v11151_v21 = vpop.f32.mrf.mxu0  ;;  %v5873_v57 = vpop.f32.mrf.mxu1 }
 0xa38   : > { %v7898_v17 = vpop.f32.mrf.mxu0  ;;  %v7970_v11 = vpop.f32.mrf.mxu1 }
 0xa3a   : > { %v5746_v51 = vpop.f32.mrf.mxu0  ;;  %v5881_v4 = vpop.f32.mrf.mxu1 }
 0xa3b   : > { %v5747_v27 = vadd.f32 %v5746_v51, %v5631_v61 }
 0xa3c   : > { %v7938_v46 = vpop.f32.mrf.mxu0  ;;  %v7973_v41 = vpop.f32.mrf.mxu1 }
 0xa3d   : > { %v5866_v12 = vadd.f32 %v5865_v24, %v5747_v27  ;;  %v5520_v24 = vadd.f32 %v6240_v1, %v11145_v30 }
 0xa3e   : > { %v5753_v60 = vpop.f32.mrf.mxu0  ;;  %v11153_v22 = vpop.f32.mrf.mxu1 }
 0xa3f   : > { %v5754_v0 = vadd.f32 %v5753_v60, %v5637_v2  ;;  %v5655_v60 = vadd.f32 %v11141_v19, %v5520_v24 }
 0xa40   : > { %v7941_v8 = vpop.f32.mrf.mxu0  ;;  %v7976_v56 = vpop.f32.mrf.mxu1 }
 0xa41   : > { %v5874_v33 = vadd.f32 %v5873_v57, %v5754_v0  ;;  %v5530_v57 = vadd.f32 %v6240_v1, %v11149_v40 }
 0xa42   : > { %v5760_v28 = vpop.f32.mrf.mxu0  ;;  %v11155_v38 = vpop.f32.mrf.mxu1 }
 0xa43   : > { %v5761_v47 = vadd.f32 %v5760_v28, %v5643_v5 }
 0xa44   : > { %v7944_v6 = vpop.f32.mrf.mxu0  ;;  %v7979_v55 = vpop.f32.mrf.mxu1 }
 0xa45   : > { %v5882_v51 = vadd.f32 %v5881_v4, %v5761_v47  ;;  %v5540_v4 = vadd.f32 %v6240_v1, %v11151_v21 }
 0xa46   : > { %v5767_v13 = vpop.f32.mrf.mxu0  ;;  %v11157_v52 = vpop.f32.mrf.mxu1 }
 0xa47   : > { %v5768_v17 = vadd.f32 %v5767_v13, %v5649_v42 }
 0xa48   : > { %v7947_v36 = vpop.f32.mrf.mxu0  ;;  %v7982_v62 = vpop.f32.mrf.mxu1 }
 0xa49   : > { %v5890_v6 = vadd.f32 %v11153_v22, %v5768_v17  ;;  %v5661_v36 = vadd.f32 %v11143_v49, %v5530_v57  ;;  %v5667_v22 = vadd.f32 %v11147_v45, %v5540_v4 }
 0xa4a   : > { %v5774_v29 = vpop.f32.mrf.mxu0  ;;  %v11162_v32 = vpop.f32.mrf.mxu1 }
 0xa4b   : > { %v5775_v56 = vadd.f32 %v5774_v29, %v5655_v60 }
 0xa4c   : > { %v7950_v35 = vpop.f32.mrf.mxu0  ;;  %v7985_v34 = vpop.f32.mrf.mxu1 }
 0xa4d   : > { %v5898_v29 = vadd.f32 %v11155_v38, %v5775_v56 }
 0xa4e   : > { %v5781_v48 = vpop.f32.mrf.mxu0  ;;  %v6107_v10 = vpop.f32.mrf.mxu1 }
 0xa4f   : > { %v5782_v26 = vadd.f32 %v5781_v48, %v5661_v36 }
 0xa50   : > { %v7953_v53 = vpop.f32.mrf.mxu0  ;;  %v8025_v31 = vpop.f32.mrf.mxu1 }
 0xa51   : > { %v5906_v53 = vadd.f32 %v11157_v52, %v5782_v26 }
 0xa52   : > { %v5788_v14 = vpop.f32.mrf.mxu0  ;;  %v6113_v20 = vpop.f32.mrf.mxu1 }
 0xa53   : > { %v5789_v63 = vadd.f32 %v5788_v14, %v5667_v22 }
 0xa54   : > { %v7956_v15 = vpop.f32.mrf.mxu0  ;;  %v8028_v43 = vpop.f32.mrf.mxu1 }
 0xa56   : > { %v5996_v25 = vpop.f32.mrf.mxu0  ;;  %v6119_v44 = vpop.f32.mrf.mxu1 }
 0xa57   : > { %v5997_v39 = vadd.f32 %v5996_v25, %v5866_v12 }
 0xa58   : > { %v7996_v18 = vpop.f32.mrf.mxu0  ;;  %v8031_v9 = vpop.f32.mrf.mxu1 }
 0xa59   : > { %v6108_v54 = vadd.f32 %v6107_v10, %v5997_v39 }
 0xa5a   : > { %v6002_v59 = vpop.f32.mrf.mxu0  ;;  %v6125_v16 = vpop.f32.mrf.mxu1 }
 0xa5b   : > { %6147 = vst.msk [vmem:[%s11169_s9] sm:$0xff] %vm333_vm1, %v6108_v54  ;;  %v6003_v50 = vadd.f32 %v6002_v59, %v5874_v33 }
 0xa5c   : > { %v7999_v7 = vpop.f32.mrf.mxu0  ;;  %v8034_v37 = vpop.f32.mrf.mxu1 }
 0xa5d   : > { %v6114_v11 = vadd.f32 %v6113_v20, %v6003_v50  ;;  %v5914_v20 = vadd.f32 %v11162_v32, %v5789_v63 }
 0xa5e   : > { %v6008_v46 = vpop.f32.mrf.mxu0  ;;  %v6131_v41 = vpop.f32.mrf.mxu1 }
 0xa5f   : > { %6148 = vst.msk [vmem:[%s11169_s9 + $0x8] sm:$0xff] %vm333_vm1, %v6114_v11  ;;  %v6009_v30 = vadd.f32 %v6008_v46, %v5882_v51 }
 0xa60   : > { %v8002_v8 = vpop.f32.mrf.mxu0  ;;  %v8037_v23 = vpop.f32.mrf.mxu1 }
 0xa61   : > { %v6120_v28 = vadd.f32 %v6119_v44, %v6009_v30 }
 0xa62   : > { %v6014_v55 = vpop.f32.mrf.mxu0  ;;  %v6137_v13 = vpop.f32.mrf.mxu1 }
 0xa63   : > { %6149 = vst.msk [vmem:[%s11169_s9 + $0x10] sm:$0xff] %vm333_vm1, %v6120_v28  ;;  %v6015_v40 = vadd.f32 %v6014_v55, %v5890_v6 }
 0xa64   : > { %v8005_v19 = vpop.f32.mrf.mxu0  ;;  %v8040_v62 = vpop.f32.mrf.mxu1 }
 0xa65   : > { %v6126_v35 = vadd.f32 %v6125_v16, %v6015_v40 }
 0xa66   : > { %v6020_v34 = vpop.f32.mrf.mxu0  ;;  %v6143_v10 = vpop.f32.mrf.mxu1 }
 0xa67   : > { %6150 = vst.msk [vmem:[%s11169_s9 + $0x18] sm:$0xff] %vm333_vm1, %v6126_v35  ;;  %v6021_v21 = vadd.f32 %v6020_v34, %v5898_v29 }
 0xa68   : > { %v8008_v1 = vpop.f32.mrf.mxu0  ;;  %v8043_v49 = vpop.f32.mrf.mxu1 }
 0xa69   : > { %v6132_v61 = vadd.f32 %v6131_v41, %v6021_v21 }
 0xa6a   : > { %v6026_v31 = vpop.f32.mrf.mxu0 }
 0xa6b   : > { %6151 = vst.msk [vmem:[%s11169_s9 + $0x20] sm:$0xff] %vm333_vm1, %v6132_v61  ;;  %v6027_v48 = vadd.f32 %v6026_v31, %v5906_v53 }
 0xa6c   : > { %v8011_v38 = vpop.f32.mrf.mxu0 }
 0xa6d   : > { %v6138_v27 = vadd.f32 %v6137_v13, %v6027_v48 }
 0xa6e   : > { %v6032_v58 = vpop.f32.mrf.mxu0 }
 0xa6f   : > { %6152 = vst.msk [vmem:[%s11169_s9 + $0x28] sm:$0xff] %vm333_vm1, %v6138_v27  ;;  %v6033_v45 = vadd.f32 %v6032_v58, %v5914_v20 }
 0xa70   : > { %v8014_v2 = vpop.f32.mrf.mxu0 }
 0xa71   : > { %v6144_v15 = vadd.f32 %v6143_v10, %v6033_v45 }
 0xa73   : > { %6153 = vst.msk [vmem:[%s11169_s9 + $0x30] sm:$0xf] %vm347_vm2, %v6144_v15 }
 0xa74 PF: > { %s18_s27 = sadd.s32 1, %s8125_s27  }
 0xa75   : > { %p15_p4 = scmp.ge.s32.totalorder %s18_s27, 4  }
 0xa77   :  { %17 = sbr.rel (!%p15_p4) target bundleno = 1 (0x1), region = 87 }

</bundles_post_ra>
